<compile_context>
chip_gen: v7x
topology: tpu7x:2x2x1
jax: 0.10.0
libtpu: 0.0.40
codegen_flags: <defaults>
</compile_context>

<pallas_src>
import functools

import jax
import jax.numpy as jnp
from jax import lax
from jax.experimental import pallas as pl
from jax.experimental.pallas import tpu as pltpu


def _round_up(v, m):
    return ((v + m - 1) // m) * m


# ----------------------------------------------------------------------------
# Fused ResBlock3D kernel: one grid step == one sample, layout (C, S=D*H*W).
# ----------------------------------------------------------------------------
def _resblock_kernel(x_ref, gmat_ref, par_ref, w1_ref, w2_ref, mask_ref,
                     cadd1_ref, o_ref, *, dims, rpt, eps, n_acc):
    D, H, W = dims
    S = D * H * W
    Cout = o_ref.shape[1]

    x = x_ref[0]                      # (C, S) f32, read from HBM once per sample
    gmat = gmat_ref[...]              # (C, C) block-diag(1/(Cg*S)) group-combine

    # packed per-channel params: [gn1_g, gn1_b, gn2_g, gn2_b, conv2_b]
    g1 = par_ref[:, 0:1]
    b1 = par_ref[:, 1:2]
    g2 = par_ref[:, 2:3]
    b2 = par_ref[:, 3:4]
    b2c = par_ref[:, 4:5]

    # ---- fused GroupNorm + SiLU (two-pass stats, reduce-first) --------------
    def gn_silu(v, gamma, beta):
        # lane-reduce first, then combine the per-channel sums across each
        # group with the tiny hoisted block-diagonal operator (incl. 1/(Cg*S)).
        s1 = jnp.sum(v, axis=1, keepdims=True)                          # (C, 1)
        mean = jnp.dot(gmat, s1, preferred_element_type=jnp.float32)    # (C, 1)
        d = v - mean
        s2 = jnp.sum(d * d, axis=1, keepdims=True)                      # (C, 1)
        var = jnp.dot(gmat, s2, preferred_element_type=jnp.float32)     # (C, 1)
        y = d * lax.rsqrt(var + eps) * gamma + beta
        return y * jax.nn.sigmoid(y)                                    # SiLU

    # ---- 3x3x3 conv, padding=1: stream one bf16 tap matmul at a time --------
    def conv3x3x3(a, w_ref):
        # a: (Cin, S) f32; w_ref: (27, rpt, Cin) bf16, tap t rows zero-padded
        # to rpt.  Per tap: (rpt,Cin)@(Cin,S) on the MXU, roll the product by
        # the tap's spatial offset, zero the wrapped/out-of-volume lanes with
        # the precomputed mask, and accumulate.  n_acc partial accumulators
        # break the serial VALU chain; the (27*rpt,S) product never exists.
        a16 = a.astype(jnp.bfloat16)                    # matmul operands only
        accs = [jnp.zeros((rpt, S), jnp.float32) for _ in range(n_acc)]
        t = 0
        for kd in (-1, 0, 1):
            for kh in (-1, 0, 1):
                for kw in (-1, 0, 1):
                    off = (kd * H + kh) * W + kw
                    pt = jnp.dot(w_ref[t], a16,
                                 preferred_element_type=jnp.float32)   # (rpt, S)
                    if off != 0:
                        # NOTE(v6e/v7x): lane rolls hit the XLU; production
                        # layouts with W, H*W multiples of 128 make these
                        # whole-vreg moves.
                        pt = pltpu.roll(pt, shift=(-off) % S, axis=1)
                        pt = pt * mask_ref[t]                           # (1, S)
                    accs[t % n_acc] = accs[t % n_acc] + pt
                    t += 1
        acc = accs[0]
        for extra in accs[1:]:
            acc = acc + extra
        return acc[:Cout, :]

    # ---- in_layers: GN -> SiLU -> conv1, then +(bias1 + emb) ----------------
    a1 = gn_silu(x, g1, b1)
    h = conv3x3x3(a1, w1_ref) + cadd1_ref[0]          # cadd1 = conv1_b + emb_out

    # ---- out_layers: GN -> SiLU -> Dropout -> conv2, then +bias2 ------------
    # TODO(synk): Dropout is identity (inference mode); training-mode mask omitted.
    a2 = gn_silu(h, g2, b2)
    y = conv3x3x3(a2, w2_ref) + b2c

    # ---- residual (identity skip, out_channels == channels) -----------------
    o_ref[0] = y + x


# ----------------------------------------------------------------------------
# Host-side parameter prep + pallas_call wrapper
# ----------------------------------------------------------------------------
def _stack_conv_weight(w, rpt):
    # w: (Cout, Cin, 3, 3, 3) PyTorch OIDHW -> (27, rpt, Cin) bf16, tap-major
    # (kd,kh,kw), rows zero-padded per tap to `rpt` (multiple of 8).
    Cout, Cin = w.shape[0], w.shape[1]
    wt = jnp.transpose(w, (2, 3, 4, 0, 1)).reshape(27, Cout, Cin)
    wt = jnp.pad(wt, ((0, 0), (0, rpt - Cout), (0, 0)))
    return wt.astype(jnp.bfloat16)


def _make_tap_masks(D, H, W):
    # Combined boundary masks for every tap, built from the SAME flattened
    # index formula the kernel's roll uses: s = d*H*W + h*W + w.
    S = D * H * W
    s = jnp.arange(S)
    d_i = s // (H * W)
    h_i = (s // W) % H
    w_i = s % W
    masks = []
    for kd in (-1, 0, 1):
        for kh in (-1, 0, 1):
            for kw in (-1, 0, 1):
                m = ((d_i + kd >= 0) & (d_i + kd < D) &
                     (h_i + kh >= 0) & (h_i + kh < H) &
                     (w_i + kw >= 0) & (w_i + kw < W))
                masks.append(m)
    return jnp.stack(masks).astype(jnp.float32).reshape(27, 1, S)


def resblock3d_forward(x, emb, params, *, groups=4, eps=1e-5):
    """x: (N, C, D, H, W) NCDHW (PyTorch layout); emb: (N, E)."""
    N, C, D, H, W = x.shape
    Cout = params["conv1_w"].shape[0]
    S = D * H * W
    assert C % groups == 0 and Cout % groups == 0
    # residual=True with out_channels == channels -> Identity skip connection.
    # TODO(synk): 1x1 / 3x3 skip-conv variants (out_channels != channels) not implemented.
    assert Cout == C
    rpt = _round_up(Cout, 8)

    x_flat = x.reshape(N, C, S)

    # emb_layers (SiLU -> Linear): tiny, left to XLA; result folded with the
    # conv1 bias and added per-channel inside the kernel epilogue.
    e = emb * jax.nn.sigmoid(emb)
    emb_out = e @ params["emb_w"].T + params["emb_b"]                   # (N, Cout)
    cadd1 = (emb_out + params["conv1_b"][None, :]).reshape(N, Cout, 1)

    # group-combine operator (block-diagonal ones / (Cg*S)), hoisted
    cg = C // groups
    gidx = jnp.arange(C) // cg
    gmat = (gidx[:, None] == gidx[None, :]).astype(jnp.float32) / float(cg * S)

    # coalesced per-channel parameters: [gn1_g, gn1_b, gn2_g, gn2_b, conv2_b]
    par = jnp.stack([params["gn1_gamma"], params["gn1_beta"],
                     params["gn2_gamma"], params["gn2_beta"],
                     params["conv2_b"]], axis=1).astype(jnp.float32)    # (C, 5)

    w1s = _stack_conv_weight(params["conv1_w"], rpt)                    # (27, rpt, C) bf16
    w2s = _stack_conv_weight(params["conv2_w"], rpt)                    # (27, rpt, Cout) bf16
    masks = _make_tap_masks(D, H, W)                                    # (27, 1, S)

    kern = functools.partial(_resblock_kernel, dims=(D, H, W), rpt=rpt,
                             eps=eps, n_acc=3)
    out = pl.pallas_call(
        kern,
        out_shape=jax.ShapeDtypeStruct((N, Cout, S), jnp.float32),
        grid=(N,),
        in_specs=[
            pl.BlockSpec((1, C, S), lambda n: (n, 0, 0)),        # x (read once)
            pl.BlockSpec((C, C), lambda n: (0, 0)),              # group-combine operator
            pl.BlockSpec((C, 5), lambda n: (0, 0)),              # packed per-channel params
            pl.BlockSpec((27, rpt, C), lambda n: (0, 0, 0)),     # conv1 weights (bf16, resident)
            pl.BlockSpec((27, rpt, Cout), lambda n: (0, 0, 0)),  # conv2 weights (bf16, resident)
            pl.BlockSpec((27, 1, S), lambda n: (0, 0, 0)),       # precomputed tap masks (resident)
            pl.BlockSpec((1, Cout, 1), lambda n: (n, 0, 0)),     # conv1 bias + emb (per sample)
        ],
        out_specs=pl.BlockSpec((1, Cout, S), lambda n: (n, 0, 0)),
        compiler_params=pltpu.CompilerParams(
            dimension_semantics=("parallel",),    # megacore: samples split across TCs
            # TODO(synk): re-derive per generation for production tiles
            # (v7x: 64 MiB physical VMEM; v5e/v6e: 128 MiB).
            vmem_limit_bytes=32 * 1024 * 1024,
        ),
    )(x_flat, gmat, par, w1s, w2s, masks, cadd1)
    return out.reshape(N, Cout, D, H, W)


# ----------------------------------------------------------------------------
# Pure-JAX f32 reference for verification
# ----------------------------------------------------------------------------
def _ref_gn(v, gamma, beta, groups, eps):
    N, C = v.shape[0], v.shape[1]
    vg = v.reshape(N, groups, -1)
    m = vg.mean(axis=2, keepdims=True)
    var = vg.var(axis=2, keepdims=True)
    y = ((vg - m) / jnp.sqrt(var + eps)).reshape(v.shape)
    cshape = (1, C) + (1,) * (v.ndim - 2)
    return y * gamma.reshape(cshape) + beta.reshape(cshape)


def _ref_forward(x, emb, params, groups=4, eps=1e-5):
    def silu(v):
        return v * jax.nn.sigmoid(v)

    def conv(v, w, b):
        y = lax.conv_general_dilated(v, w, (1, 1, 1), [(1, 1)] * 3,
                                     dimension_numbers=("NCDHW", "OIDHW", "NCDHW"))
        return y + b.reshape(1, -1, 1, 1, 1)

    h = conv(silu(_ref_gn(x, params["gn1_gamma"], params["gn1_beta"], groups, eps)),
             params["conv1_w"], params["conv1_b"])
    e = silu(emb) @ params["emb_w"].T + params["emb_b"]
    h = h + e[:, :, None, None, None]
    h = conv(silu(_ref_gn(h, params["gn2_gamma"], params["gn2_beta"], groups, eps)),
             params["conv2_w"], params["conv2_b"])
    return x + h


if __name__ == "__main__":
    key = jax.random.PRNGKey(0)
    N, C, D, H, W = 2, 4, 8, 8, 8
    E = 16
    Cout = C                                   # out_channels == channels -> Identity skip

    ks = jax.random.split(key, 8)
    x = jax.random.normal(ks[0], (N, C, D, H, W), jnp.float32)
    emb = jax.random.normal(ks[1], (N, E), jnp.float32)

    params = {
        # GroupNorm affine defaults (weight=1, bias=0)
        "gn1_gamma": jnp.ones((C,), jnp.float32),
        "gn1_beta": jnp.zeros((C,), jnp.float32),
        "conv1_w": 0.1 * jax.random.normal(ks[2], (Cout, C, 3, 3, 3), jnp.float32),
        "conv1_b": 0.1 * jax.random.normal(ks[3], (Cout,), jnp.float32),
        "emb_w": 0.1 * jax.random.normal(ks[4], (Cout, E), jnp.float32),   # torch Linear (out, in)
        "emb_b": 0.1 * jax.random.normal(ks[5], (Cout,), jnp.float32),
        "gn2_gamma": jnp.ones((Cout,), jnp.float32),
        "gn2_beta": jnp.zeros((Cout,), jnp.float32),
        # NOTE: PyTorch zero-initializes conv2 (zero_module); deterministic
        # nonzero values are used so the kernel path is actually exercised.
        "conv2_w": 0.05 * jax.random.normal(ks[6], (Cout, Cout, 3, 3, 3), jnp.float32),
        "conv2_b": 0.05 * jax.random.normal(ks[7], (Cout,), jnp.float32),
    }

    fwd = jax.jit(resblock3d_forward)
    out = jax.block_until_ready(fwd(x, emb, params))
    ref = _ref_forward(x, emb, params)
    assert out.shape == (N, Cout, D, H, W)
    err = float(jnp.max(jnp.abs(out - ref)))
    # Tolerance reflects bf16 MXU operands on the two 3x3x3 convs; everything
    # else (GN stats, SiLU, biases, emb, residual) is f32 in the kernel.
    assert err < 5e-2, err
    print("KERNEL_OK")
</pallas_src>

<mosaic_0001>
module attributes {stable_mosaic.version = 11 : i64} {
  func.func @_resblock_kernel(%arg0: i32, %arg1: memref<1x4x512xf32, #tpu.memory_space<vmem>>, %arg2: memref<4x4xf32, #tpu.memory_space<vmem>>, %arg3: memref<4x5xf32, #tpu.memory_space<vmem>>, %arg4: memref<27x8x4xbf16, #tpu.memory_space<vmem>>, %arg5: memref<27x8x4xbf16, #tpu.memory_space<vmem>>, %arg6: memref<27x1x512xf32, #tpu.memory_space<vmem>>, %arg7: memref<1x4x1xf32, #tpu.memory_space<vmem>>, %arg8: memref<1x4x512xf32, #tpu.memory_space<vmem>>) attributes {dimension_semantics = [#tpu.dimension_semantics<parallel>], iteration_bounds = array<i64: 2>, scalar_prefetch = 0 : i64, scratch_operands = 0 : i64, tpu.core_type = #tpu.core_type<tc>, window_params = [{transform_indices = @transform_0, window_bounds = array<i64: 1, 4, 512>}, {pipeline_mode = #tpu.pipeline_mode<synchronous>, transform_indices = @transform_1, window_bounds = array<i64: 4, 4>}, {pipeline_mode = #tpu.pipeline_mode<synchronous>, transform_indices = @transform_2, window_bounds = array<i64: 4, 5>}, {pipeline_mode = #tpu.pipeline_mode<synchronous>, transform_indices = @transform_3, window_bounds = array<i64: 27, 8, 4>}, {pipeline_mode = #tpu.pipeline_mode<synchronous>, transform_indices = @transform_4, window_bounds = array<i64: 27, 8, 4>}, {pipeline_mode = #tpu.pipeline_mode<synchronous>, transform_indices = @transform_5, window_bounds = array<i64: 27, 1, 512>}, {transform_indices = @transform_6, window_bounds = array<i64: 1, 4, 1>}, {transform_indices = @transform_7, window_bounds = array<i64: 1, 4, 512>}]} {
    %c0 = arith.constant 0 : index
    %c0_0 = arith.constant 0 : index
    %c0_1 = arith.constant 0 : index
    %0 = vector.load %arg1[%c0, %c0_0, %c0_1] : memref<1x4x512xf32, #tpu.memory_space<vmem>>, vector<1x4x512xf32>
    %1 = vector.shape_cast %0 : vector<1x4x512xf32> to vector<4x512xf32>
    %c0_2 = arith.constant 0 : index
    %c0_3 = arith.constant 0 : index
    %2 = vector.load %arg2[%c0_2, %c0_3] : memref<4x4xf32, #tpu.memory_space<vmem>>, vector<4x4xf32>
    %c0_4 = arith.constant 0 : index
    %c0_5 = arith.constant 0 : index
    %3 = vector.load %arg3[%c0_4, %c0_5] : memref<4x5xf32, #tpu.memory_space<vmem>>, vector<4x1xf32>
    %c0_6 = arith.constant 0 : index
    %c1 = arith.constant 1 : index
    %4 = vector.load %arg3[%c0_6, %c1] : memref<4x5xf32, #tpu.memory_space<vmem>>, vector<4x1xf32>
    %c0_7 = arith.constant 0 : index
    %c2 = arith.constant 2 : index
    %5 = vector.load %arg3[%c0_7, %c2] : memref<4x5xf32, #tpu.memory_space<vmem>>, vector<4x1xf32>
    %c0_8 = arith.constant 0 : index
    %c3 = arith.constant 3 : index
    %6 = vector.load %arg3[%c0_8, %c3] : memref<4x5xf32, #tpu.memory_space<vmem>>, vector<4x1xf32>
    %c0_9 = arith.constant 0 : index
    %c4 = arith.constant 4 : index
    %7 = vector.load %arg3[%c0_9, %c4] : memref<4x5xf32, #tpu.memory_space<vmem>>, vector<4x1xf32>
    %cst = arith.constant dense<0.000000e+00> : vector<4xf32>
    %8 = vector.multi_reduction <add>, %1, %cst [1] : vector<4x512xf32> to vector<4xf32>
    %9 = vector.shape_cast %8 : vector<4xf32> to vector<4x1xf32>
    %cst_10 = arith.constant dense<0.000000e+00> : vector<4x1xf32>
    %10 = tpu.matmul %2, %9, %cst_10 {dimension_numbers = #tpu.dot_dimension_numbers<[1], [0], [0], [1], [0, 0, 1, 1], [], []>} : vector<4x4xf32>, vector<4x1xf32>, vector<4x1xf32> -> vector<4x1xf32>
    %11 = vector.broadcast %10 : vector<4x1xf32> to vector<4x512xf32>
    %12 = arith.subf %1, %11 : vector<4x512xf32>
    %13 = arith.mulf %12, %12 : vector<4x512xf32>
    %cst_11 = arith.constant dense<0.000000e+00> : vector<4xf32>
    %14 = vector.multi_reduction <add>, %13, %cst_11 [1] : vector<4x512xf32> to vector<4xf32>
    %15 = vector.shape_cast %14 : vector<4xf32> to vector<4x1xf32>
    %cst_12 = arith.constant dense<0.000000e+00> : vector<4x1xf32>
    %16 = tpu.matmul %2, %15, %cst_12 {dimension_numbers = #tpu.dot_dimension_numbers<[1], [0], [0], [1], [0, 0, 1, 1], [], []>} : vector<4x4xf32>, vector<4x1xf32>, vector<4x1xf32> -> vector<4x1xf32>
    %cst_13 = arith.constant 9.99999974E-6 : f32
    %17 = vector.broadcast %cst_13 : f32 to vector<4x1xf32>
    %18 = arith.addf %16, %17 : vector<4x1xf32>
    %19 = math.rsqrt %18 : vector<4x1xf32>
    %20 = vector.broadcast %19 : vector<4x1xf32> to vector<4x512xf32>
    %21 = arith.mulf %12, %20 : vector<4x512xf32>
    %22 = vector.broadcast %3 : vector<4x1xf32> to vector<4x512xf32>
    %23 = arith.mulf %21, %22 : vector<4x512xf32>
    %24 = vector.broadcast %4 : vector<4x1xf32> to vector<4x512xf32>
    %25 = arith.addf %23, %24 : vector<4x512xf32>
    %26 = arith.negf %25 : vector<4x512xf32>
    %27 = math.exp %26 : vector<4x512xf32>
    %cst_14 = arith.constant 1.000000e+00 : f32
    %28 = vector.broadcast %cst_14 : f32 to vector<4x512xf32>
    %29 = arith.addf %28, %27 : vector<4x512xf32>
    %30 = arith.divf %28, %29 : vector<4x512xf32>
    %31 = arith.mulf %25, %30 : vector<4x512xf32>
    %32 = arith.truncf %31 : vector<4x512xf32> to vector<4x512xbf16>
    %cst_15 = arith.constant 0.000000e+00 : f32
    %33 = vector.broadcast %cst_15 : f32 to vector<8x512xf32>
    %cst_16 = arith.constant 0.000000e+00 : f32
    %34 = vector.broadcast %cst_16 : f32 to vector<8x512xf32>
    %cst_17 = arith.constant 0.000000e+00 : f32
    %35 = vector.broadcast %cst_17 : f32 to vector<8x512xf32>
    %c0_18 = arith.constant 0 : index
    %c0_19 = arith.constant 0 : index
    %c0_20 = arith.constant 0 : index
    %36 = vector.load %arg4[%c0_18, %c0_19, %c0_20] : memref<27x8x4xbf16, #tpu.memory_space<vmem>>, vector<1x8x4xbf16>
    %37 = vector.shape_cast %36 : vector<1x8x4xbf16> to vector<8x4xbf16>
    %cst_21 = arith.constant dense<0.000000e+00> : vector<8x512xf32>
    %38 = tpu.matmul %37, %32, %cst_21 {dimension_numbers = #tpu.dot_dimension_numbers<[1], [0], [0], [1], [0, 0, 1, 1], [], []>} : vector<8x4xbf16>, vector<4x512xbf16>, vector<8x512xf32> -> vector<8x512xf32>
    %c73_i32 = arith.constant 73 : i32
    %39 = tpu.dynamic_rotate %38 by %c73_i32 dim 1 : vector<8x512xf32>, i32 -> vector<8x512xf32>
    %c0_22 = arith.constant 0 : index
    %c0_23 = arith.constant 0 : index
    %c0_24 = arith.constant 0 : index
    %40 = vector.load %arg6[%c0_22, %c0_23, %c0_24] : memref<27x1x512xf32, #tpu.memory_space<vmem>>, vector<1x1x512xf32>
    %41 = vector.shape_cast %40 : vector<1x1x512xf32> to vector<1x512xf32>
    %42 = vector.broadcast %41 : vector<1x512xf32> to vector<8x512xf32>
    %43 = arith.mulf %39, %42 : vector<8x512xf32>
    %44 = arith.addf %33, %43 : vector<8x512xf32>
    %c1_25 = arith.constant 1 : index
    %c0_26 = arith.constant 0 : index
    %c0_27 = arith.constant 0 : index
    %45 = vector.load %arg4[%c1_25, %c0_26, %c0_27] : memref<27x8x4xbf16, #tpu.memory_space<vmem>>, vector<1x8x4xbf16>
    %46 = vector.shape_cast %45 : vector<1x8x4xbf16> to vector<8x4xbf16>
    %cst_28 = arith.constant dense<0.000000e+00> : vector<8x512xf32>
    %47 = tpu.matmul %46, %32, %cst_28 {dimension_numbers = #tpu.dot_dimension_numbers<[1], [0], [0], [1], [0, 0, 1, 1], [], []>} : vector<8x4xbf16>, vector<4x512xbf16>, vector<8x512xf32> -> vector<8x512xf32>
    %c72_i32 = arith.constant 72 : i32
    %48 = tpu.dynamic_rotate %47 by %c72_i32 dim 1 : vector<8x512xf32>, i32 -> vector<8x512xf32>
    %c1_29 = arith.constant 1 : index
    %c0_30 = arith.constant 0 : index
    %c0_31 = arith.constant 0 : index
    %49 = vector.load %arg6[%c1_29, %c0_30, %c0_31] : memref<27x1x512xf32, #tpu.memory_space<vmem>>, vector<1x1x512xf32>
    %50 = vector.shape_cast %49 : vector<1x1x512xf32> to vector<1x512xf32>
    %51 = vector.broadcast %50 : vector<1x512xf32> to vector<8x512xf32>
    %52 = arith.mulf %48, %51 : vector<8x512xf32>
    %53 = arith.addf %34, %52 : vector<8x512xf32>
    %c2_32 = arith.constant 2 : index
    %c0_33 = arith.constant 0 : index
    %c0_34 = arith.constant 0 : index
    %54 = vector.load %arg4[%c2_32, %c0_33, %c0_34] : memref<27x8x4xbf16, #tpu.memory_space<vmem>>, vector<1x8x4xbf16>
    %55 = vector.shape_cast %54 : vector<1x8x4xbf16> to vector<8x4xbf16>
    %cst_35 = arith.constant dense<0.000000e+00> : vector<8x512xf32>
    %56 = tpu.matmul %55, %32, %cst_35 {dimension_numbers = #tpu.dot_dimension_numbers<[1], [0], [0], [1], [0, 0, 1, 1], [], []>} : vector<8x4xbf16>, vector<4x512xbf16>, vector<8x512xf32> -> vector<8x512xf32>
    %c71_i32 = arith.constant 71 : i32
    %57 = tpu.dynamic_rotate %56 by %c71_i32 dim 1 : vector<8x512xf32>, i32 -> vector<8x512xf32>
    %c2_36 = arith.constant 2 : index
    %c0_37 = arith.constant 0 : index
    %c0_38 = arith.constant 0 : index
    %58 = vector.load %arg6[%c2_36, %c0_37, %c0_38] : memref<27x1x512xf32, #tpu.memory_space<vmem>>, vector<1x1x512xf32>
    %59 = vector.shape_cast %58 : vector<1x1x512xf32> to vector<1x512xf32>
    %60 = vector.broadcast %59 : vector<1x512xf32> to vector<8x512xf32>
    %61 = arith.mulf %57, %60 : vector<8x512xf32>
    %62 = arith.addf %35, %61 : vector<8x512xf32>
    %c3_39 = arith.constant 3 : index
    %c0_40 = arith.constant 0 : index
    %c0_41 = arith.constant 0 : index
    %63 = vector.load %arg4[%c3_39, %c0_40, %c0_41] : memref<27x8x4xbf16, #tpu.memory_space<vmem>>, vector<1x8x4xbf16>
    %64 = vector.shape_cast %63 : vector<1x8x4xbf16> to vector<8x4xbf16>
    %cst_42 = arith.constant dense<0.000000e+00> : vector<8x512xf32>
    %65 = tpu.matmul %64, %32, %cst_42 {dimension_numbers = #tpu.dot_dimension_numbers<[1], [0], [0], [1], [0, 0, 1, 1], [], []>} : vector<8x4xbf16>, vector<4x512xbf16>, vector<8x512xf32> -> vector<8x512xf32>
    %c65_i32 = arith.constant 65 : i32
    %66 = tpu.dynamic_rotate %65 by %c65_i32 dim 1 : vector<8x512xf32>, i32 -> vector<8x512xf32>
    %c3_43 = arith.constant 3 : index
    %c0_44 = arith.constant 0 : index
    %c0_45 = arith.constant 0 : index
    %67 = vector.load %arg6[%c3_43, %c0_44, %c0_45] : memref<27x1x512xf32, #tpu.memory_space<vmem>>, vector<1x1x512xf32>
    %68 = vector.shape_cast %67 : vector<1x1x512xf32> to vector<1x512xf32>
    %69 = vector.broadcast %68 : vector<1x512xf32> to vector<8x512xf32>
    %70 = arith.mulf %66, %69 : vector<8x512xf32>
    %71 = arith.addf %44, %70 : vector<8x512xf32>
    %c4_46 = arith.constant 4 : index
    %c0_47 = arith.constant 0 : index
    %c0_48 = arith.constant 0 : index
    %72 = vector.load %arg4[%c4_46, %c0_47, %c0_48] : memref<27x8x4xbf16, #tpu.memory_space<vmem>>, vector<1x8x4xbf16>
    %73 = vector.shape_cast %72 : vector<1x8x4xbf16> to vector<8x4xbf16>
    %cst_49 = arith.constant dense<0.000000e+00> : vector<8x512xf32>
    %74 = tpu.matmul %73, %32, %cst_49 {dimension_numbers = #tpu.dot_dimension_numbers<[1], [0], [0], [1], [0, 0, 1, 1], [], []>} : vector<8x4xbf16>, vector<4x512xbf16>, vector<8x512xf32> -> vector<8x512xf32>
    %c64_i32 = arith.constant 64 : i32
    %75 = tpu.dynamic_rotate %74 by %c64_i32 dim 1 : vector<8x512xf32>, i32 -> vector<8x512xf32>
    %c4_50 = arith.constant 4 : index
    %c0_51 = arith.constant 0 : index
    %c0_52 = arith.constant 0 : index
    %76 = vector.load %arg6[%c4_50, %c0_51, %c0_52] : memref<27x1x512xf32, #tpu.memory_space<vmem>>, vector<1x1x512xf32>
    %77 = vector.shape_cast %76 : vector<1x1x512xf32> to vector<1x512xf32>
    %78 = vector.broadcast %77 : vector<1x512xf32> to vector<8x512xf32>
    %79 = arith.mulf %75, %78 : vector<8x512xf32>
    %80 = arith.addf %53, %79 : vector<8x512xf32>
    %c5 = arith.constant 5 : index
    %c0_53 = arith.constant 0 : index
    %c0_54 = arith.constant 0 : index
    %81 = vector.load %arg4[%c5, %c0_53, %c0_54] : memref<27x8x4xbf16, #tpu.memory_space<vmem>>, vector<1x8x4xbf16>
    %82 = vector.shape_cast %81 : vector<1x8x4xbf16> to vector<8x4xbf16>
    %cst_55 = arith.constant dense<0.000000e+00> : vector<8x512xf32>
    %83 = tpu.matmul %82, %32, %cst_55 {dimension_numbers = #tpu.dot_dimension_numbers<[1], [0], [0], [1], [0, 0, 1, 1], [], []>} : vector<8x4xbf16>, vector<4x512xbf16>, vector<8x512xf32> -> vector<8x512xf32>
    %c63_i32 = arith.constant 63 : i32
    %84 = tpu.dynamic_rotate %83 by %c63_i32 dim 1 : vector<8x512xf32>, i32 -> vector<8x512xf32>
    %c5_56 = arith.constant 5 : index
    %c0_57 = arith.constant 0 : index
    %c0_58 = arith.constant 0 : index
    %85 = vector.load %arg6[%c5_56, %c0_57, %c0_58] : memref<27x1x512xf32, #tpu.memory_space<vmem>>, vector<1x1x512xf32>
    %86 = vector.shape_cast %85 : vector<1x1x512xf32> to vector<1x512xf32>
    %87 = vector.broadcast %86 : vector<1x512xf32> to vector<8x512xf32>
    %88 = arith.mulf %84, %87 : vector<8x512xf32>
    %89 = arith.addf %62, %88 : vector<8x512xf32>
    %c6 = arith.constant 6 : index
    %c0_59 = arith.constant 0 : index
    %c0_60 = arith.constant 0 : index
    %90 = vector.load %arg4[%c6, %c0_59, %c0_60] : memref<27x8x4xbf16, #tpu.memory_space<vmem>>, vector<1x8x4xbf16>
    %91 = vector.shape_cast %90 : vector<1x8x4xbf16> to vector<8x4xbf16>
    %cst_61 = arith.constant dense<0.000000e+00> : vector<8x512xf32>
    %92 = tpu.matmul %91, %32, %cst_61 {dimension_numbers = #tpu.dot_dimension_numbers<[1], [0], [0], [1], [0, 0, 1, 1], [], []>} : vector<8x4xbf16>, vector<4x512xbf16>, vector<8x512xf32> -> vector<8x512xf32>
    %c57_i32 = arith.constant 57 : i32
    %93 = tpu.dynamic_rotate %92 by %c57_i32 dim 1 : vector<8x512xf32>, i32 -> vector<8x512xf32>
    %c6_62 = arith.constant 6 : index
    %c0_63 = arith.constant 0 : index
    %c0_64 = arith.constant 0 : index
    %94 = vector.load %arg6[%c6_62, %c0_63, %c0_64] : memref<27x1x512xf32, #tpu.memory_space<vmem>>, vector<1x1x512xf32>
    %95 = vector.shape_cast %94 : vector<1x1x512xf32> to vector<1x512xf32>
    %96 = vector.broadcast %95 : vector<1x512xf32> to vector<8x512xf32>
    %97 = arith.mulf %93, %96 : vector<8x512xf32>
    %98 = arith.addf %71, %97 : vector<8x512xf32>
    %c7 = arith.constant 7 : index
    %c0_65 = arith.constant 0 : index
    %c0_66 = arith.constant 0 : index
    %99 = vector.load %arg4[%c7, %c0_65, %c0_66] : memref<27x8x4xbf16, #tpu.memory_space<vmem>>, vector<1x8x4xbf16>
    %100 = vector.shape_cast %99 : vector<1x8x4xbf16> to vector<8x4xbf16>
    %cst_67 = arith.constant dense<0.000000e+00> : vector<8x512xf32>
    %101 = tpu.matmul %100, %32, %cst_67 {dimension_numbers = #tpu.dot_dimension_numbers<[1], [0], [0], [1], [0, 0, 1, 1], [], []>} : vector<8x4xbf16>, vector<4x512xbf16>, vector<8x512xf32> -> vector<8x512xf32>
    %c56_i32 = arith.constant 56 : i32
    %102 = tpu.dynamic_rotate %101 by %c56_i32 dim 1 : vector<8x512xf32>, i32 -> vector<8x512xf32>
    %c7_68 = arith.constant 7 : index
    %c0_69 = arith.constant 0 : index
    %c0_70 = arith.constant 0 : index
    %103 = vector.load %arg6[%c7_68, %c0_69, %c0_70] : memref<27x1x512xf32, #tpu.memory_space<vmem>>, vector<1x1x512xf32>
    %104 = vector.shape_cast %103 : vector<1x1x512xf32> to vector<1x512xf32>
    %105 = vector.broadcast %104 : vector<1x512xf32> to vector<8x512xf32>
    %106 = arith.mulf %102, %105 : vector<8x512xf32>
    %107 = arith.addf %80, %106 : vector<8x512xf32>
    %c8 = arith.constant 8 : index
    %c0_71 = arith.constant 0 : index
    %c0_72 = arith.constant 0 : index
    %108 = vector.load %arg4[%c8, %c0_71, %c0_72] : memref<27x8x4xbf16, #tpu.memory_space<vmem>>, vector<1x8x4xbf16>
    %109 = vector.shape_cast %108 : vector<1x8x4xbf16> to vector<8x4xbf16>
    %cst_73 = arith.constant dense<0.000000e+00> : vector<8x512xf32>
    %110 = tpu.matmul %109, %32, %cst_73 {dimension_numbers = #tpu.dot_dimension_numbers<[1], [0], [0], [1], [0, 0, 1, 1], [], []>} : vector<8x4xbf16>, vector<4x512xbf16>, vector<8x512xf32> -> vector<8x512xf32>
    %c55_i32 = arith.constant 55 : i32
    %111 = tpu.dynamic_rotate %110 by %c55_i32 dim 1 : vector<8x512xf32>, i32 -> vector<8x512xf32>
    %c8_74 = arith.constant 8 : index
    %c0_75 = arith.constant 0 : index
    %c0_76 = arith.constant 0 : index
    %112 = vector.load %arg6[%c8_74, %c0_75, %c0_76] : memref<27x1x512xf32, #tpu.memory_space<vmem>>, vector<1x1x512xf32>
    %113 = vector.shape_cast %112 : vector<1x1x512xf32> to vector<1x512xf32>
    %114 = vector.broadcast %113 : vector<1x512xf32> to vector<8x512xf32>
    %115 = arith.mulf %111, %114 : vector<8x512xf32>
    %116 = arith.addf %89, %115 : vector<8x512xf32>
    %c9 = arith.constant 9 : index
    %c0_77 = arith.constant 0 : index
    %c0_78 = arith.constant 0 : index
    %117 = vector.load %arg4[%c9, %c0_77, %c0_78] : memref<27x8x4xbf16, #tpu.memory_space<vmem>>, vector<1x8x4xbf16>
    %118 = vector.shape_cast %117 : vector<1x8x4xbf16> to vector<8x4xbf16>
    %cst_79 = arith.constant dense<0.000000e+00> : vector<8x512xf32>
    %119 = tpu.matmul %118, %32, %cst_79 {dimension_numbers = #tpu.dot_dimension_numbers<[1], [0], [0], [1], [0, 0, 1, 1], [], []>} : vector<8x4xbf16>, vector<4x512xbf16>, vector<8x512xf32> -> vector<8x512xf32>
    %c9_i32 = arith.constant 9 : i32
    %120 = tpu.dynamic_rotate %119 by %c9_i32 dim 1 : vector<8x512xf32>, i32 -> vector<8x512xf32>
    %c9_80 = arith.constant 9 : index
    %c0_81 = arith.constant 0 : index
    %c0_82 = arith.constant 0 : index
    %121 = vector.load %arg6[%c9_80, %c0_81, %c0_82] : memref<27x1x512xf32, #tpu.memory_space<vmem>>, vector<1x1x512xf32>
    %122 = vector.shape_cast %121 : vector<1x1x512xf32> to vector<1x512xf32>
    %123 = vector.broadcast %122 : vector<1x512xf32> to vector<8x512xf32>
    %124 = arith.mulf %120, %123 : vector<8x512xf32>
    %125 = arith.addf %98, %124 : vector<8x512xf32>
    %c10 = arith.constant 10 : index
    %c0_83 = arith.constant 0 : index
    %c0_84 = arith.constant 0 : index
    %126 = vector.load %arg4[%c10, %c0_83, %c0_84] : memref<27x8x4xbf16, #tpu.memory_space<vmem>>, vector<1x8x4xbf16>
    %127 = vector.shape_cast %126 : vector<1x8x4xbf16> to vector<8x4xbf16>
    %cst_85 = arith.constant dense<0.000000e+00> : vector<8x512xf32>
    %128 = tpu.matmul %127, %32, %cst_85 {dimension_numbers = #tpu.dot_dimension_numbers<[1], [0], [0], [1], [0, 0, 1, 1], [], []>} : vector<8x4xbf16>, vector<4x512xbf16>, vector<8x512xf32> -> vector<8x512xf32>
    %c8_i32 = arith.constant 8 : i32
    %129 = tpu.dynamic_rotate %128 by %c8_i32 dim 1 : vector<8x512xf32>, i32 -> vector<8x512xf32>
    %c10_86 = arith.constant 10 : index
    %c0_87 = arith.constant 0 : index
    %c0_88 = arith.constant 0 : index
    %130 = vector.load %arg6[%c10_86, %c0_87, %c0_88] : memref<27x1x512xf32, #tpu.memory_space<vmem>>, vector<1x1x512xf32>
    %131 = vector.shape_cast %130 : vector<1x1x512xf32> to vector<1x512xf32>
    %132 = vector.broadcast %131 : vector<1x512xf32> to vector<8x512xf32>
    %133 = arith.mulf %129, %132 : vector<8x512xf32>
    %134 = arith.addf %107, %133 : vector<8x512xf32>
    %c11 = arith.constant 11 : index
    %c0_89 = arith.constant 0 : index
    %c0_90 = arith.constant 0 : index
    %135 = vector.load %arg4[%c11, %c0_89, %c0_90] : memref<27x8x4xbf16, #tpu.memory_space<vmem>>, vector<1x8x4xbf16>
    %136 = vector.shape_cast %135 : vector<1x8x4xbf16> to vector<8x4xbf16>
    %cst_91 = arith.constant dense<0.000000e+00> : vector<8x512xf32>
    %137 = tpu.matmul %136, %32, %cst_91 {dimension_numbers = #tpu.dot_dimension_numbers<[1], [0], [0], [1], [0, 0, 1, 1], [], []>} : vector<8x4xbf16>, vector<4x512xbf16>, vector<8x512xf32> -> vector<8x512xf32>
    %c7_i32 = arith.constant 7 : i32
    %138 = tpu.dynamic_rotate %137 by %c7_i32 dim 1 : vector<8x512xf32>, i32 -> vector<8x512xf32>
    %c11_92 = arith.constant 11 : index
    %c0_93 = arith.constant 0 : index
    %c0_94 = arith.constant 0 : index
    %139 = vector.load %arg6[%c11_92, %c0_93, %c0_94] : memref<27x1x512xf32, #tpu.memory_space<vmem>>, vector<1x1x512xf32>
    %140 = vector.shape_cast %139 : vector<1x1x512xf32> to vector<1x512xf32>
    %141 = vector.broadcast %140 : vector<1x512xf32> to vector<8x512xf32>
    %142 = arith.mulf %138, %141 : vector<8x512xf32>
    %143 = arith.addf %116, %142 : vector<8x512xf32>
    %c12 = arith.constant 12 : index
    %c0_95 = arith.constant 0 : index
    %c0_96 = arith.constant 0 : index
    %144 = vector.load %arg4[%c12, %c0_95, %c0_96] : memref<27x8x4xbf16, #tpu.memory_space<vmem>>, vector<1x8x4xbf16>
    %145 = vector.shape_cast %144 : vector<1x8x4xbf16> to vector<8x4xbf16>
    %cst_97 = arith.constant dense<0.000000e+00> : vector<8x512xf32>
    %146 = tpu.matmul %145, %32, %cst_97 {dimension_numbers = #tpu.dot_dimension_numbers<[1], [0], [0], [1], [0, 0, 1, 1], [], []>} : vector<8x4xbf16>, vector<4x512xbf16>, vector<8x512xf32> -> vector<8x512xf32>
    %c1_i32 = arith.constant 1 : i32
    %147 = tpu.dynamic_rotate %146 by %c1_i32 dim 1 : vector<8x512xf32>, i32 -> vector<8x512xf32>
    %c12_98 = arith.constant 12 : index
    %c0_99 = arith.constant 0 : index
    %c0_100 = arith.constant 0 : index
    %148 = vector.load %arg6[%c12_98, %c0_99, %c0_100] : memref<27x1x512xf32, #tpu.memory_space<vmem>>, vector<1x1x512xf32>
    %149 = vector.shape_cast %148 : vector<1x1x512xf32> to vector<1x512xf32>
    %150 = vector.broadcast %149 : vector<1x512xf32> to vector<8x512xf32>
    %151 = arith.mulf %147, %150 : vector<8x512xf32>
    %152 = arith.addf %125, %151 : vector<8x512xf32>
    %c13 = arith.constant 13 : index
    %c0_101 = arith.constant 0 : index
    %c0_102 = arith.constant 0 : index
    %153 = vector.load %arg4[%c13, %c0_101, %c0_102] : memref<27x8x4xbf16, #tpu.memory_space<vmem>>, vector<1x8x4xbf16>
    %154 = vector.shape_cast %153 : vector<1x8x4xbf16> to vector<8x4xbf16>
    %cst_103 = arith.constant dense<0.000000e+00> : vector<8x512xf32>
    %155 = tpu.matmul %154, %32, %cst_103 {dimension_numbers = #tpu.dot_dimension_numbers<[1], [0], [0], [1], [0, 0, 1, 1], [], []>} : vector<8x4xbf16>, vector<4x512xbf16>, vector<8x512xf32> -> vector<8x512xf32>
    %156 = arith.addf %134, %155 : vector<8x512xf32>
    %c14 = arith.constant 14 : index
    %c0_104 = arith.constant 0 : index
    %c0_105 = arith.constant 0 : index
    %157 = vector.load %arg4[%c14, %c0_104, %c0_105] : memref<27x8x4xbf16, #tpu.memory_space<vmem>>, vector<1x8x4xbf16>
    %158 = vector.shape_cast %157 : vector<1x8x4xbf16> to vector<8x4xbf16>
    %cst_106 = arith.constant dense<0.000000e+00> : vector<8x512xf32>
    %159 = tpu.matmul %158, %32, %cst_106 {dimension_numbers = #tpu.dot_dimension_numbers<[1], [0], [0], [1], [0, 0, 1, 1], [], []>} : vector<8x4xbf16>, vector<4x512xbf16>, vector<8x512xf32> -> vector<8x512xf32>
    %c511_i32 = arith.constant 511 : i32
    %160 = tpu.dynamic_rotate %159 by %c511_i32 dim 1 : vector<8x512xf32>, i32 -> vector<8x512xf32>
    %c14_107 = arith.constant 14 : index
    %c0_108 = arith.constant 0 : index
    %c0_109 = arith.constant 0 : index
    %161 = vector.load %arg6[%c14_107, %c0_108, %c0_109] : memref<27x1x512xf32, #tpu.memory_space<vmem>>, vector<1x1x512xf32>
    %162 = vector.shape_cast %161 : vector<1x1x512xf32> to vector<1x512xf32>
    %163 = vector.broadcast %162 : vector<1x512xf32> to vector<8x512xf32>
    %164 = arith.mulf %160, %163 : vector<8x512xf32>
    %165 = arith.addf %143, %164 : vector<8x512xf32>
    %c15 = arith.constant 15 : index
    %c0_110 = arith.constant 0 : index
    %c0_111 = arith.constant 0 : index
    %166 = vector.load %arg4[%c15, %c0_110, %c0_111] : memref<27x8x4xbf16, #tpu.memory_space<vmem>>, vector<1x8x4xbf16>
    %167 = vector.shape_cast %166 : vector<1x8x4xbf16> to vector<8x4xbf16>
    %cst_112 = arith.constant dense<0.000000e+00> : vector<8x512xf32>
    %168 = tpu.matmul %167, %32, %cst_112 {dimension_numbers = #tpu.dot_dimension_numbers<[1], [0], [0], [1], [0, 0, 1, 1], [], []>} : vector<8x4xbf16>, vector<4x512xbf16>, vector<8x512xf32> -> vector<8x512xf32>
    %c505_i32 = arith.constant 505 : i32
    %169 = tpu.dynamic_rotate %168 by %c505_i32 dim 1 : vector<8x512xf32>, i32 -> vector<8x512xf32>
    %c15_113 = arith.constant 15 : index
    %c0_114 = arith.constant 0 : index
    %c0_115 = arith.constant 0 : index
    %170 = vector.load %arg6[%c15_113, %c0_114, %c0_115] : memref<27x1x512xf32, #tpu.memory_space<vmem>>, vector<1x1x512xf32>
    %171 = vector.shape_cast %170 : vector<1x1x512xf32> to vector<1x512xf32>
    %172 = vector.broadcast %171 : vector<1x512xf32> to vector<8x512xf32>
    %173 = arith.mulf %169, %172 : vector<8x512xf32>
    %174 = arith.addf %152, %173 : vector<8x512xf32>
    %c16 = arith.constant 16 : index
    %c0_116 = arith.constant 0 : index
    %c0_117 = arith.constant 0 : index
    %175 = vector.load %arg4[%c16, %c0_116, %c0_117] : memref<27x8x4xbf16, #tpu.memory_space<vmem>>, vector<1x8x4xbf16>
    %176 = vector.shape_cast %175 : vector<1x8x4xbf16> to vector<8x4xbf16>
    %cst_118 = arith.constant dense<0.000000e+00> : vector<8x512xf32>
    %177 = tpu.matmul %176, %32, %cst_118 {dimension_numbers = #tpu.dot_dimension_numbers<[1], [0], [0], [1], [0, 0, 1, 1], [], []>} : vector<8x4xbf16>, vector<4x512xbf16>, vector<8x512xf32> -> vector<8x512xf32>
    %c504_i32 = arith.constant 504 : i32
    %178 = tpu.dynamic_rotate %177 by %c504_i32 dim 1 : vector<8x512xf32>, i32 -> vector<8x512xf32>
    %c16_119 = arith.constant 16 : index
    %c0_120 = arith.constant 0 : index
    %c0_121 = arith.constant 0 : index
    %179 = vector.load %arg6[%c16_119, %c0_120, %c0_121] : memref<27x1x512xf32, #tpu.memory_space<vmem>>, vector<1x1x512xf32>
    %180 = vector.shape_cast %179 : vector<1x1x512xf32> to vector<1x512xf32>
    %181 = vector.broadcast %180 : vector<1x512xf32> to vector<8x512xf32>
    %182 = arith.mulf %178, %181 : vector<8x512xf32>
    %183 = arith.addf %156, %182 : vector<8x512xf32>
    %c17 = arith.constant 17 : index
    %c0_122 = arith.constant 0 : index
    %c0_123 = arith.constant 0 : index
    %184 = vector.load %arg4[%c17, %c0_122, %c0_123] : memref<27x8x4xbf16, #tpu.memory_space<vmem>>, vector<1x8x4xbf16>
    %185 = vector.shape_cast %184 : vector<1x8x4xbf16> to vector<8x4xbf16>
    %cst_124 = arith.constant dense<0.000000e+00> : vector<8x512xf32>
    %186 = tpu.matmul %185, %32, %cst_124 {dimension_numbers = #tpu.dot_dimension_numbers<[1], [0], [0], [1], [0, 0, 1, 1], [], []>} : vector<8x4xbf16>, vector<4x512xbf16>, vector<8x512xf32> -> vector<8x512xf32>
    %c503_i32 = arith.constant 503 : i32
    %187 = tpu.dynamic_rotate %186 by %c503_i32 dim 1 : vector<8x512xf32>, i32 -> vector<8x512xf32>
    %c17_125 = arith.constant 17 : index
    %c0_126 = arith.constant 0 : index
    %c0_127 = arith.constant 0 : index
    %188 = vector.load %arg6[%c17_125, %c0_126, %c0_127] : memref<27x1x512xf32, #tpu.memory_space<vmem>>, vector<1x1x512xf32>
    %189 = vector.shape_cast %188 : vector<1x1x512xf32> to vector<1x512xf32>
    %190 = vector.broadcast %189 : vector<1x512xf32> to vector<8x512xf32>
    %191 = arith.mulf %187, %190 : vector<8x512xf32>
    %192 = arith.addf %165, %191 : vector<8x512xf32>
    %c18 = arith.constant 18 : index
    %c0_128 = arith.constant 0 : index
    %c0_129 = arith.constant 0 : index
    %193 = vector.load %arg4[%c18, %c0_128, %c0_129] : memref<27x8x4xbf16, #tpu.memory_space<vmem>>, vector<1x8x4xbf16>
    %194 = vector.shape_cast %193 : vector<1x8x4xbf16> to vector<8x4xbf16>
    %cst_130 = arith.constant dense<0.000000e+00> : vector<8x512xf32>
    %195 = tpu.matmul %194, %32, %cst_130 {dimension_numbers = #tpu.dot_dimension_numbers<[1], [0], [0], [1], [0, 0, 1, 1], [], []>} : vector<8x4xbf16>, vector<4x512xbf16>, vector<8x512xf32> -> vector<8x512xf32>
    %c457_i32 = arith.constant 457 : i32
    %196 = tpu.dynamic_rotate %195 by %c457_i32 dim 1 : vector<8x512xf32>, i32 -> vector<8x512xf32>
    %c18_131 = arith.constant 18 : index
    %c0_132 = arith.constant 0 : index
    %c0_133 = arith.constant 0 : index
    %197 = vector.load %arg6[%c18_131, %c0_132, %c0_133] : memref<27x1x512xf32, #tpu.memory_space<vmem>>, vector<1x1x512xf32>
    %198 = vector.shape_cast %197 : vector<1x1x512xf32> to vector<1x512xf32>
    %199 = vector.broadcast %198 : vector<1x512xf32> to vector<8x512xf32>
    %200 = arith.mulf %196, %199 : vector<8x512xf32>
    %201 = arith.addf %174, %200 : vector<8x512xf32>
    %c19 = arith.constant 19 : index
    %c0_134 = arith.constant 0 : index
    %c0_135 = arith.constant 0 : index
    %202 = vector.load %arg4[%c19, %c0_134, %c0_135] : memref<27x8x4xbf16, #tpu.memory_space<vmem>>, vector<1x8x4xbf16>
    %203 = vector.shape_cast %202 : vector<1x8x4xbf16> to vector<8x4xbf16>
    %cst_136 = arith.constant dense<0.000000e+00> : vector<8x512xf32>
    %204 = tpu.matmul %203, %32, %cst_136 {dimension_numbers = #tpu.dot_dimension_numbers<[1], [0], [0], [1], [0, 0, 1, 1], [], []>} : vector<8x4xbf16>, vector<4x512xbf16>, vector<8x512xf32> -> vector<8x512xf32>
    %c456_i32 = arith.constant 456 : i32
    %205 = tpu.dynamic_rotate %204 by %c456_i32 dim 1 : vector<8x512xf32>, i32 -> vector<8x512xf32>
    %c19_137 = arith.constant 19 : index
    %c0_138 = arith.constant 0 : index
    %c0_139 = arith.constant 0 : index
    %206 = vector.load %arg6[%c19_137, %c0_138, %c0_139] : memref<27x1x512xf32, #tpu.memory_space<vmem>>, vector<1x1x512xf32>
    %207 = vector.shape_cast %206 : vector<1x1x512xf32> to vector<1x512xf32>
    %208 = vector.broadcast %207 : vector<1x512xf32> to vector<8x512xf32>
    %209 = arith.mulf %205, %208 : vector<8x512xf32>
    %210 = arith.addf %183, %209 : vector<8x512xf32>
    %c20 = arith.constant 20 : index
    %c0_140 = arith.constant 0 : index
    %c0_141 = arith.constant 0 : index
    %211 = vector.load %arg4[%c20, %c0_140, %c0_141] : memref<27x8x4xbf16, #tpu.memory_space<vmem>>, vector<1x8x4xbf16>
    %212 = vector.shape_cast %211 : vector<1x8x4xbf16> to vector<8x4xbf16>
    %cst_142 = arith.constant dense<0.000000e+00> : vector<8x512xf32>
    %213 = tpu.matmul %212, %32, %cst_142 {dimension_numbers = #tpu.dot_dimension_numbers<[1], [0], [0], [1], [0, 0, 1, 1], [], []>} : vector<8x4xbf16>, vector<4x512xbf16>, vector<8x512xf32> -> vector<8x512xf32>
    %c455_i32 = arith.constant 455 : i32
    %214 = tpu.dynamic_rotate %213 by %c455_i32 dim 1 : vector<8x512xf32>, i32 -> vector<8x512xf32>
    %c20_143 = arith.constant 20 : index
    %c0_144 = arith.constant 0 : index
    %c0_145 = arith.constant 0 : index
    %215 = vector.load %arg6[%c20_143, %c0_144, %c0_145] : memref<27x1x512xf32, #tpu.memory_space<vmem>>, vector<1x1x512xf32>
    %216 = vector.shape_cast %215 : vector<1x1x512xf32> to vector<1x512xf32>
    %217 = vector.broadcast %216 : vector<1x512xf32> to vector<8x512xf32>
    %218 = arith.mulf %214, %217 : vector<8x512xf32>
    %219 = arith.addf %192, %218 : vector<8x512xf32>
    %c21 = arith.constant 21 : index
    %c0_146 = arith.constant 0 : index
    %c0_147 = arith.constant 0 : index
    %220 = vector.load %arg4[%c21, %c0_146, %c0_147] : memref<27x8x4xbf16, #tpu.memory_space<vmem>>, vector<1x8x4xbf16>
    %221 = vector.shape_cast %220 : vector<1x8x4xbf16> to vector<8x4xbf16>
    %cst_148 = arith.constant dense<0.000000e+00> : vector<8x512xf32>
    %222 = tpu.matmul %221, %32, %cst_148 {dimension_numbers = #tpu.dot_dimension_numbers<[1], [0], [0], [1], [0, 0, 1, 1], [], []>} : vector<8x4xbf16>, vector<4x512xbf16>, vector<8x512xf32> -> vector<8x512xf32>
    %c449_i32 = arith.constant 449 : i32
    %223 = tpu.dynamic_rotate %222 by %c449_i32 dim 1 : vector<8x512xf32>, i32 -> vector<8x512xf32>
    %c21_149 = arith.constant 21 : index
    %c0_150 = arith.constant 0 : index
    %c0_151 = arith.constant 0 : index
    %224 = vector.load %arg6[%c21_149, %c0_150, %c0_151] : memref<27x1x512xf32, #tpu.memory_space<vmem>>, vector<1x1x512xf32>
    %225 = vector.shape_cast %224 : vector<1x1x512xf32> to vector<1x512xf32>
    %226 = vector.broadcast %225 : vector<1x512xf32> to vector<8x512xf32>
    %227 = arith.mulf %223, %226 : vector<8x512xf32>
    %228 = arith.addf %201, %227 : vector<8x512xf32>
    %c22 = arith.constant 22 : index
    %c0_152 = arith.constant 0 : index
    %c0_153 = arith.constant 0 : index
    %229 = vector.load %arg4[%c22, %c0_152, %c0_153] : memref<27x8x4xbf16, #tpu.memory_space<vmem>>, vector<1x8x4xbf16>
    %230 = vector.shape_cast %229 : vector<1x8x4xbf16> to vector<8x4xbf16>
    %cst_154 = arith.constant dense<0.000000e+00> : vector<8x512xf32>
    %231 = tpu.matmul %230, %32, %cst_154 {dimension_numbers = #tpu.dot_dimension_numbers<[1], [0], [0], [1], [0, 0, 1, 1], [], []>} : vector<8x4xbf16>, vector<4x512xbf16>, vector<8x512xf32> -> vector<8x512xf32>
    %c448_i32 = arith.constant 448 : i32
    %232 = tpu.dynamic_rotate %231 by %c448_i32 dim 1 : vector<8x512xf32>, i32 -> vector<8x512xf32>
    %c22_155 = arith.constant 22 : index
    %c0_156 = arith.constant 0 : index
    %c0_157 = arith.constant 0 : index
    %233 = vector.load %arg6[%c22_155, %c0_156, %c0_157] : memref<27x1x512xf32, #tpu.memory_space<vmem>>, vector<1x1x512xf32>
    %234 = vector.shape_cast %233 : vector<1x1x512xf32> to vector<1x512xf32>
    %235 = vector.broadcast %234 : vector<1x512xf32> to vector<8x512xf32>
    %236 = arith.mulf %232, %235 : vector<8x512xf32>
    %237 = arith.addf %210, %236 : vector<8x512xf32>
    %c23 = arith.constant 23 : index
    %c0_158 = arith.constant 0 : index
    %c0_159 = arith.constant 0 : index
    %238 = vector.load %arg4[%c23, %c0_158, %c0_159] : memref<27x8x4xbf16, #tpu.memory_space<vmem>>, vector<1x8x4xbf16>
    %239 = vector.shape_cast %238 : vector<1x8x4xbf16> to vector<8x4xbf16>
    %cst_160 = arith.constant dense<0.000000e+00> : vector<8x512xf32>
    %240 = tpu.matmul %239, %32, %cst_160 {dimension_numbers = #tpu.dot_dimension_numbers<[1], [0], [0], [1], [0, 0, 1, 1], [], []>} : vector<8x4xbf16>, vector<4x512xbf16>, vector<8x512xf32> -> vector<8x512xf32>
    %c447_i32 = arith.constant 447 : i32
    %241 = tpu.dynamic_rotate %240 by %c447_i32 dim 1 : vector<8x512xf32>, i32 -> vector<8x512xf32>
    %c23_161 = arith.constant 23 : index
    %c0_162 = arith.constant 0 : index
    %c0_163 = arith.constant 0 : index
    %242 = vector.load %arg6[%c23_161, %c0_162, %c0_163] : memref<27x1x512xf32, #tpu.memory_space<vmem>>, vector<1x1x512xf32>
    %243 = vector.shape_cast %242 : vector<1x1x512xf32> to vector<1x512xf32>
    %244 = vector.broadcast %243 : vector<1x512xf32> to vector<8x512xf32>
    %245 = arith.mulf %241, %244 : vector<8x512xf32>
    %246 = arith.addf %219, %245 : vector<8x512xf32>
    %c24 = arith.constant 24 : index
    %c0_164 = arith.constant 0 : index
    %c0_165 = arith.constant 0 : index
    %247 = vector.load %arg4[%c24, %c0_164, %c0_165] : memref<27x8x4xbf16, #tpu.memory_space<vmem>>, vector<1x8x4xbf16>
    %248 = vector.shape_cast %247 : vector<1x8x4xbf16> to vector<8x4xbf16>
    %cst_166 = arith.constant dense<0.000000e+00> : vector<8x512xf32>
    %249 = tpu.matmul %248, %32, %cst_166 {dimension_numbers = #tpu.dot_dimension_numbers<[1], [0], [0], [1], [0, 0, 1, 1], [], []>} : vector<8x4xbf16>, vector<4x512xbf16>, vector<8x512xf32> -> vector<8x512xf32>
    %c441_i32 = arith.constant 441 : i32
    %250 = tpu.dynamic_rotate %249 by %c441_i32 dim 1 : vector<8x512xf32>, i32 -> vector<8x512xf32>
    %c24_167 = arith.constant 24 : index
    %c0_168 = arith.constant 0 : index
    %c0_169 = arith.constant 0 : index
    %251 = vector.load %arg6[%c24_167, %c0_168, %c0_169] : memref<27x1x512xf32, #tpu.memory_space<vmem>>, vector<1x1x512xf32>
    %252 = vector.shape_cast %251 : vector<1x1x512xf32> to vector<1x512xf32>
    %253 = vector.broadcast %252 : vector<1x512xf32> to vector<8x512xf32>
    %254 = arith.mulf %250, %253 : vector<8x512xf32>
    %255 = arith.addf %228, %254 : vector<8x512xf32>
    %c25 = arith.constant 25 : index
    %c0_170 = arith.constant 0 : index
    %c0_171 = arith.constant 0 : index
    %256 = vector.load %arg4[%c25, %c0_170, %c0_171] : memref<27x8x4xbf16, #tpu.memory_space<vmem>>, vector<1x8x4xbf16>
    %257 = vector.shape_cast %256 : vector<1x8x4xbf16> to vector<8x4xbf16>
    %cst_172 = arith.constant dense<0.000000e+00> : vector<8x512xf32>
    %258 = tpu.matmul %257, %32, %cst_172 {dimension_numbers = #tpu.dot_dimension_numbers<[1], [0], [0], [1], [0, 0, 1, 1], [], []>} : vector<8x4xbf16>, vector<4x512xbf16>, vector<8x512xf32> -> vector<8x512xf32>
    %c440_i32 = arith.constant 440 : i32
    %259 = tpu.dynamic_rotate %258 by %c440_i32 dim 1 : vector<8x512xf32>, i32 -> vector<8x512xf32>
    %c25_173 = arith.constant 25 : index
    %c0_174 = arith.constant 0 : index
    %c0_175 = arith.constant 0 : index
    %260 = vector.load %arg6[%c25_173, %c0_174, %c0_175] : memref<27x1x512xf32, #tpu.memory_space<vmem>>, vector<1x1x512xf32>
    %261 = vector.shape_cast %260 : vector<1x1x512xf32> to vector<1x512xf32>
    %262 = vector.broadcast %261 : vector<1x512xf32> to vector<8x512xf32>
    %263 = arith.mulf %259, %262 : vector<8x512xf32>
    %264 = arith.addf %237, %263 : vector<8x512xf32>
    %c26 = arith.constant 26 : index
    %c0_176 = arith.constant 0 : index
    %c0_177 = arith.constant 0 : index
    %265 = vector.load %arg4[%c26, %c0_176, %c0_177] : memref<27x8x4xbf16, #tpu.memory_space<vmem>>, vector<1x8x4xbf16>
    %266 = vector.shape_cast %265 : vector<1x8x4xbf16> to vector<8x4xbf16>
    %cst_178 = arith.constant dense<0.000000e+00> : vector<8x512xf32>
    %267 = tpu.matmul %266, %32, %cst_178 {dimension_numbers = #tpu.dot_dimension_numbers<[1], [0], [0], [1], [0, 0, 1, 1], [], []>} : vector<8x4xbf16>, vector<4x512xbf16>, vector<8x512xf32> -> vector<8x512xf32>
    %c439_i32 = arith.constant 439 : i32
    %268 = tpu.dynamic_rotate %267 by %c439_i32 dim 1 : vector<8x512xf32>, i32 -> vector<8x512xf32>
    %c26_179 = arith.constant 26 : index
    %c0_180 = arith.constant 0 : index
    %c0_181 = arith.constant 0 : index
    %269 = vector.load %arg6[%c26_179, %c0_180, %c0_181] : memref<27x1x512xf32, #tpu.memory_space<vmem>>, vector<1x1x512xf32>
    %270 = vector.shape_cast %269 : vector<1x1x512xf32> to vector<1x512xf32>
    %271 = vector.broadcast %270 : vector<1x512xf32> to vector<8x512xf32>
    %272 = arith.mulf %268, %271 : vector<8x512xf32>
    %273 = arith.addf %246, %272 : vector<8x512xf32>
    %274 = arith.addf %255, %264 : vector<8x512xf32>
    %275 = arith.addf %274, %273 : vector<8x512xf32>
    %276 = vector.extract_strided_slice %275 {offsets = [0, 0], sizes = [4, 512], strides = [1, 1]} : vector<8x512xf32> to vector<4x512xf32>
    %c0_182 = arith.constant 0 : index
    %c0_183 = arith.constant 0 : index
    %c0_184 = arith.constant 0 : index
    %277 = vector.load %arg7[%c0_182, %c0_183, %c0_184] : memref<1x4x1xf32, #tpu.memory_space<vmem>>, vector<1x4x1xf32>
    %278 = vector.shape_cast %277 : vector<1x4x1xf32> to vector<4x1xf32>
    %279 = vector.broadcast %278 : vector<4x1xf32> to vector<4x512xf32>
    %280 = arith.addf %276, %279 : vector<4x512xf32>
    %cst_185 = arith.constant dense<0.000000e+00> : vector<4xf32>
    %281 = vector.multi_reduction <add>, %280, %cst_185 [1] : vector<4x512xf32> to vector<4xf32>
    %282 = vector.shape_cast %281 : vector<4xf32> to vector<4x1xf32>
    %cst_186 = arith.constant dense<0.000000e+00> : vector<4x1xf32>
    %283 = tpu.matmul %2, %282, %cst_186 {dimension_numbers = #tpu.dot_dimension_numbers<[1], [0], [0], [1], [0, 0, 1, 1], [], []>} : vector<4x4xf32>, vector<4x1xf32>, vector<4x1xf32> -> vector<4x1xf32>
    %284 = vector.broadcast %283 : vector<4x1xf32> to vector<4x512xf32>
    %285 = arith.subf %280, %284 : vector<4x512xf32>
    %286 = arith.mulf %285, %285 : vector<4x512xf32>
    %cst_187 = arith.constant dense<0.000000e+00> : vector<4xf32>
    %287 = vector.multi_reduction <add>, %286, %cst_187 [1] : vector<4x512xf32> to vector<4xf32>
    %288 = vector.shape_cast %287 : vector<4xf32> to vector<4x1xf32>
    %cst_188 = arith.constant dense<0.000000e+00> : vector<4x1xf32>
    %289 = tpu.matmul %2, %288, %cst_188 {dimension_numbers = #tpu.dot_dimension_numbers<[1], [0], [0], [1], [0, 0, 1, 1], [], []>} : vector<4x4xf32>, vector<4x1xf32>, vector<4x1xf32> -> vector<4x1xf32>
    %cst_189 = arith.constant 9.99999974E-6 : f32
    %290 = vector.broadcast %cst_189 : f32 to vector<4x1xf32>
    %291 = arith.addf %289, %290 : vector<4x1xf32>
    %292 = math.rsqrt %291 : vector<4x1xf32>
    %293 = vector.broadcast %292 : vector<4x1xf32> to vector<4x512xf32>
    %294 = arith.mulf %285, %293 : vector<4x512xf32>
    %295 = vector.broadcast %5 : vector<4x1xf32> to vector<4x512xf32>
    %296 = arith.mulf %294, %295 : vector<4x512xf32>
    %297 = vector.broadcast %6 : vector<4x1xf32> to vector<4x512xf32>
    %298 = arith.addf %296, %297 : vector<4x512xf32>
    %299 = arith.negf %298 : vector<4x512xf32>
    %300 = math.exp %299 : vector<4x512xf32>
    %cst_190 = arith.constant 1.000000e+00 : f32
    %301 = vector.broadcast %cst_190 : f32 to vector<4x512xf32>
    %302 = arith.addf %301, %300 : vector<4x512xf32>
    %303 = arith.divf %301, %302 : vector<4x512xf32>
    %304 = arith.mulf %298, %303 : vector<4x512xf32>
    %305 = arith.truncf %304 : vector<4x512xf32> to vector<4x512xbf16>
    %cst_191 = arith.constant 0.000000e+00 : f32
    %306 = vector.broadcast %cst_191 : f32 to vector<8x512xf32>
    %cst_192 = arith.constant 0.000000e+00 : f32
    %307 = vector.broadcast %cst_192 : f32 to vector<8x512xf32>
    %cst_193 = arith.constant 0.000000e+00 : f32
    %308 = vector.broadcast %cst_193 : f32 to vector<8x512xf32>
    %c0_194 = arith.constant 0 : index
    %c0_195 = arith.constant 0 : index
    %c0_196 = arith.constant 0 : index
    %309 = vector.load %arg5[%c0_194, %c0_195, %c0_196] : memref<27x8x4xbf16, #tpu.memory_space<vmem>>, vector<1x8x4xbf16>
    %310 = vector.shape_cast %309 : vector<1x8x4xbf16> to vector<8x4xbf16>
    %cst_197 = arith.constant dense<0.000000e+00> : vector<8x512xf32>
    %311 = tpu.matmul %310, %305, %cst_197 {dimension_numbers = #tpu.dot_dimension_numbers<[1], [0], [0], [1], [0, 0, 1, 1], [], []>} : vector<8x4xbf16>, vector<4x512xbf16>, vector<8x512xf32> -> vector<8x512xf32>
    %c73_i32_198 = arith.constant 73 : i32
    %312 = tpu.dynamic_rotate %311 by %c73_i32_198 dim 1 : vector<8x512xf32>, i32 -> vector<8x512xf32>
    %c0_199 = arith.constant 0 : index
    %c0_200 = arith.constant 0 : index
    %c0_201 = arith.constant 0 : index
    %313 = vector.load %arg6[%c0_199, %c0_200, %c0_201] : memref<27x1x512xf32, #tpu.memory_space<vmem>>, vector<1x1x512xf32>
    %314 = vector.shape_cast %313 : vector<1x1x512xf32> to vector<1x512xf32>
    %315 = vector.broadcast %314 : vector<1x512xf32> to vector<8x512xf32>
    %316 = arith.mulf %312, %315 : vector<8x512xf32>
    %317 = arith.addf %306, %316 : vector<8x512xf32>
    %c1_202 = arith.constant 1 : index
    %c0_203 = arith.constant 0 : index
    %c0_204 = arith.constant 0 : index
    %318 = vector.load %arg5[%c1_202, %c0_203, %c0_204] : memref<27x8x4xbf16, #tpu.memory_space<vmem>>, vector<1x8x4xbf16>
    %319 = vector.shape_cast %318 : vector<1x8x4xbf16> to vector<8x4xbf16>
    %cst_205 = arith.constant dense<0.000000e+00> : vector<8x512xf32>
    %320 = tpu.matmul %319, %305, %cst_205 {dimension_numbers = #tpu.dot_dimension_numbers<[1], [0], [0], [1], [0, 0, 1, 1], [], []>} : vector<8x4xbf16>, vector<4x512xbf16>, vector<8x512xf32> -> vector<8x512xf32>
    %c72_i32_206 = arith.constant 72 : i32
    %321 = tpu.dynamic_rotate %320 by %c72_i32_206 dim 1 : vector<8x512xf32>, i32 -> vector<8x512xf32>
    %c1_207 = arith.constant 1 : index
    %c0_208 = arith.constant 0 : index
    %c0_209 = arith.constant 0 : index
    %322 = vector.load %arg6[%c1_207, %c0_208, %c0_209] : memref<27x1x512xf32, #tpu.memory_space<vmem>>, vector<1x1x512xf32>
    %323 = vector.shape_cast %322 : vector<1x1x512xf32> to vector<1x512xf32>
    %324 = vector.broadcast %323 : vector<1x512xf32> to vector<8x512xf32>
    %325 = arith.mulf %321, %324 : vector<8x512xf32>
    %326 = arith.addf %307, %325 : vector<8x512xf32>
    %c2_210 = arith.constant 2 : index
    %c0_211 = arith.constant 0 : index
    %c0_212 = arith.constant 0 : index
    %327 = vector.load %arg5[%c2_210, %c0_211, %c0_212] : memref<27x8x4xbf16, #tpu.memory_space<vmem>>, vector<1x8x4xbf16>
    %328 = vector.shape_cast %327 : vector<1x8x4xbf16> to vector<8x4xbf16>
    %cst_213 = arith.constant dense<0.000000e+00> : vector<8x512xf32>
    %329 = tpu.matmul %328, %305, %cst_213 {dimension_numbers = #tpu.dot_dimension_numbers<[1], [0], [0], [1], [0, 0, 1, 1], [], []>} : vector<8x4xbf16>, vector<4x512xbf16>, vector<8x512xf32> -> vector<8x512xf32>
    %c71_i32_214 = arith.constant 71 : i32
    %330 = tpu.dynamic_rotate %329 by %c71_i32_214 dim 1 : vector<8x512xf32>, i32 -> vector<8x512xf32>
    %c2_215 = arith.constant 2 : index
    %c0_216 = arith.constant 0 : index
    %c0_217 = arith.constant 0 : index
    %331 = vector.load %arg6[%c2_215, %c0_216, %c0_217] : memref<27x1x512xf32, #tpu.memory_space<vmem>>, vector<1x1x512xf32>
    %332 = vector.shape_cast %331 : vector<1x1x512xf32> to vector<1x512xf32>
    %333 = vector.broadcast %332 : vector<1x512xf32> to vector<8x512xf32>
    %334 = arith.mulf %330, %333 : vector<8x512xf32>
    %335 = arith.addf %308, %334 : vector<8x512xf32>
    %c3_218 = arith.constant 3 : index
    %c0_219 = arith.constant 0 : index
    %c0_220 = arith.constant 0 : index
    %336 = vector.load %arg5[%c3_218, %c0_219, %c0_220] : memref<27x8x4xbf16, #tpu.memory_space<vmem>>, vector<1x8x4xbf16>
    %337 = vector.shape_cast %336 : vector<1x8x4xbf16> to vector<8x4xbf16>
    %cst_221 = arith.constant dense<0.000000e+00> : vector<8x512xf32>
    %338 = tpu.matmul %337, %305, %cst_221 {dimension_numbers = #tpu.dot_dimension_numbers<[1], [0], [0], [1], [0, 0, 1, 1], [], []>} : vector<8x4xbf16>, vector<4x512xbf16>, vector<8x512xf32> -> vector<8x512xf32>
    %c65_i32_222 = arith.constant 65 : i32
    %339 = tpu.dynamic_rotate %338 by %c65_i32_222 dim 1 : vector<8x512xf32>, i32 -> vector<8x512xf32>
    %c3_223 = arith.constant 3 : index
    %c0_224 = arith.constant 0 : index
    %c0_225 = arith.constant 0 : index
    %340 = vector.load %arg6[%c3_223, %c0_224, %c0_225] : memref<27x1x512xf32, #tpu.memory_space<vmem>>, vector<1x1x512xf32>
    %341 = vector.shape_cast %340 : vector<1x1x512xf32> to vector<1x512xf32>
    %342 = vector.broadcast %341 : vector<1x512xf32> to vector<8x512xf32>
    %343 = arith.mulf %339, %342 : vector<8x512xf32>
    %344 = arith.addf %317, %343 : vector<8x512xf32>
    %c4_226 = arith.constant 4 : index
    %c0_227 = arith.constant 0 : index
    %c0_228 = arith.constant 0 : index
    %345 = vector.load %arg5[%c4_226, %c0_227, %c0_228] : memref<27x8x4xbf16, #tpu.memory_space<vmem>>, vector<1x8x4xbf16>
    %346 = vector.shape_cast %345 : vector<1x8x4xbf16> to vector<8x4xbf16>
    %cst_229 = arith.constant dense<0.000000e+00> : vector<8x512xf32>
    %347 = tpu.matmul %346, %305, %cst_229 {dimension_numbers = #tpu.dot_dimension_numbers<[1], [0], [0], [1], [0, 0, 1, 1], [], []>} : vector<8x4xbf16>, vector<4x512xbf16>, vector<8x512xf32> -> vector<8x512xf32>
    %c64_i32_230 = arith.constant 64 : i32
    %348 = tpu.dynamic_rotate %347 by %c64_i32_230 dim 1 : vector<8x512xf32>, i32 -> vector<8x512xf32>
    %c4_231 = arith.constant 4 : index
    %c0_232 = arith.constant 0 : index
    %c0_233 = arith.constant 0 : index
    %349 = vector.load %arg6[%c4_231, %c0_232, %c0_233] : memref<27x1x512xf32, #tpu.memory_space<vmem>>, vector<1x1x512xf32>
    %350 = vector.shape_cast %349 : vector<1x1x512xf32> to vector<1x512xf32>
    %351 = vector.broadcast %350 : vector<1x512xf32> to vector<8x512xf32>
    %352 = arith.mulf %348, %351 : vector<8x512xf32>
    %353 = arith.addf %326, %352 : vector<8x512xf32>
    %c5_234 = arith.constant 5 : index
    %c0_235 = arith.constant 0 : index
    %c0_236 = arith.constant 0 : index
    %354 = vector.load %arg5[%c5_234, %c0_235, %c0_236] : memref<27x8x4xbf16, #tpu.memory_space<vmem>>, vector<1x8x4xbf16>
    %355 = vector.shape_cast %354 : vector<1x8x4xbf16> to vector<8x4xbf16>
    %cst_237 = arith.constant dense<0.000000e+00> : vector<8x512xf32>
    %356 = tpu.matmul %355, %305, %cst_237 {dimension_numbers = #tpu.dot_dimension_numbers<[1], [0], [0], [1], [0, 0, 1, 1], [], []>} : vector<8x4xbf16>, vector<4x512xbf16>, vector<8x512xf32> -> vector<8x512xf32>
    %c63_i32_238 = arith.constant 63 : i32
    %357 = tpu.dynamic_rotate %356 by %c63_i32_238 dim 1 : vector<8x512xf32>, i32 -> vector<8x512xf32>
    %c5_239 = arith.constant 5 : index
    %c0_240 = arith.constant 0 : index
    %c0_241 = arith.constant 0 : index
    %358 = vector.load %arg6[%c5_239, %c0_240, %c0_241] : memref<27x1x512xf32, #tpu.memory_space<vmem>>, vector<1x1x512xf32>
    %359 = vector.shape_cast %358 : vector<1x1x512xf32> to vector<1x512xf32>
    %360 = vector.broadcast %359 : vector<1x512xf32> to vector<8x512xf32>
    %361 = arith.mulf %357, %360 : vector<8x512xf32>
    %362 = arith.addf %335, %361 : vector<8x512xf32>
    %c6_242 = arith.constant 6 : index
    %c0_243 = arith.constant 0 : index
    %c0_244 = arith.constant 0 : index
    %363 = vector.load %arg5[%c6_242, %c0_243, %c0_244] : memref<27x8x4xbf16, #tpu.memory_space<vmem>>, vector<1x8x4xbf16>
    %364 = vector.shape_cast %363 : vector<1x8x4xbf16> to vector<8x4xbf16>
    %cst_245 = arith.constant dense<0.000000e+00> : vector<8x512xf32>
    %365 = tpu.matmul %364, %305, %cst_245 {dimension_numbers = #tpu.dot_dimension_numbers<[1], [0], [0], [1], [0, 0, 1, 1], [], []>} : vector<8x4xbf16>, vector<4x512xbf16>, vector<8x512xf32> -> vector<8x512xf32>
    %c57_i32_246 = arith.constant 57 : i32
    %366 = tpu.dynamic_rotate %365 by %c57_i32_246 dim 1 : vector<8x512xf32>, i32 -> vector<8x512xf32>
    %c6_247 = arith.constant 6 : index
    %c0_248 = arith.constant 0 : index
    %c0_249 = arith.constant 0 : index
    %367 = vector.load %arg6[%c6_247, %c0_248, %c0_249] : memref<27x1x512xf32, #tpu.memory_space<vmem>>, vector<1x1x512xf32>
    %368 = vector.shape_cast %367 : vector<1x1x512xf32> to vector<1x512xf32>
    %369 = vector.broadcast %368 : vector<1x512xf32> to vector<8x512xf32>
    %370 = arith.mulf %366, %369 : vector<8x512xf32>
    %371 = arith.addf %344, %370 : vector<8x512xf32>
    %c7_250 = arith.constant 7 : index
    %c0_251 = arith.constant 0 : index
    %c0_252 = arith.constant 0 : index
    %372 = vector.load %arg5[%c7_250, %c0_251, %c0_252] : memref<27x8x4xbf16, #tpu.memory_space<vmem>>, vector<1x8x4xbf16>
    %373 = vector.shape_cast %372 : vector<1x8x4xbf16> to vector<8x4xbf16>
    %cst_253 = arith.constant dense<0.000000e+00> : vector<8x512xf32>
    %374 = tpu.matmul %373, %305, %cst_253 {dimension_numbers = #tpu.dot_dimension_numbers<[1], [0], [0], [1], [0, 0, 1, 1], [], []>} : vector<8x4xbf16>, vector<4x512xbf16>, vector<8x512xf32> -> vector<8x512xf32>
    %c56_i32_254 = arith.constant 56 : i32
    %375 = tpu.dynamic_rotate %374 by %c56_i32_254 dim 1 : vector<8x512xf32>, i32 -> vector<8x512xf32>
    %c7_255 = arith.constant 7 : index
    %c0_256 = arith.constant 0 : index
    %c0_257 = arith.constant 0 : index
    %376 = vector.load %arg6[%c7_255, %c0_256, %c0_257] : memref<27x1x512xf32, #tpu.memory_space<vmem>>, vector<1x1x512xf32>
    %377 = vector.shape_cast %376 : vector<1x1x512xf32> to vector<1x512xf32>
    %378 = vector.broadcast %377 : vector<1x512xf32> to vector<8x512xf32>
    %379 = arith.mulf %375, %378 : vector<8x512xf32>
    %380 = arith.addf %353, %379 : vector<8x512xf32>
    %c8_258 = arith.constant 8 : index
    %c0_259 = arith.constant 0 : index
    %c0_260 = arith.constant 0 : index
    %381 = vector.load %arg5[%c8_258, %c0_259, %c0_260] : memref<27x8x4xbf16, #tpu.memory_space<vmem>>, vector<1x8x4xbf16>
    %382 = vector.shape_cast %381 : vector<1x8x4xbf16> to vector<8x4xbf16>
    %cst_261 = arith.constant dense<0.000000e+00> : vector<8x512xf32>
    %383 = tpu.matmul %382, %305, %cst_261 {dimension_numbers = #tpu.dot_dimension_numbers<[1], [0], [0], [1], [0, 0, 1, 1], [], []>} : vector<8x4xbf16>, vector<4x512xbf16>, vector<8x512xf32> -> vector<8x512xf32>
    %c55_i32_262 = arith.constant 55 : i32
    %384 = tpu.dynamic_rotate %383 by %c55_i32_262 dim 1 : vector<8x512xf32>, i32 -> vector<8x512xf32>
    %c8_263 = arith.constant 8 : index
    %c0_264 = arith.constant 0 : index
    %c0_265 = arith.constant 0 : index
    %385 = vector.load %arg6[%c8_263, %c0_264, %c0_265] : memref<27x1x512xf32, #tpu.memory_space<vmem>>, vector<1x1x512xf32>
    %386 = vector.shape_cast %385 : vector<1x1x512xf32> to vector<1x512xf32>
    %387 = vector.broadcast %386 : vector<1x512xf32> to vector<8x512xf32>
    %388 = arith.mulf %384, %387 : vector<8x512xf32>
    %389 = arith.addf %362, %388 : vector<8x512xf32>
    %c9_266 = arith.constant 9 : index
    %c0_267 = arith.constant 0 : index
    %c0_268 = arith.constant 0 : index
    %390 = vector.load %arg5[%c9_266, %c0_267, %c0_268] : memref<27x8x4xbf16, #tpu.memory_space<vmem>>, vector<1x8x4xbf16>
    %391 = vector.shape_cast %390 : vector<1x8x4xbf16> to vector<8x4xbf16>
    %cst_269 = arith.constant dense<0.000000e+00> : vector<8x512xf32>
    %392 = tpu.matmul %391, %305, %cst_269 {dimension_numbers = #tpu.dot_dimension_numbers<[1], [0], [0], [1], [0, 0, 1, 1], [], []>} : vector<8x4xbf16>, vector<4x512xbf16>, vector<8x512xf32> -> vector<8x512xf32>
    %c9_i32_270 = arith.constant 9 : i32
    %393 = tpu.dynamic_rotate %392 by %c9_i32_270 dim 1 : vector<8x512xf32>, i32 -> vector<8x512xf32>
    %c9_271 = arith.constant 9 : index
    %c0_272 = arith.constant 0 : index
    %c0_273 = arith.constant 0 : index
    %394 = vector.load %arg6[%c9_271, %c0_272, %c0_273] : memref<27x1x512xf32, #tpu.memory_space<vmem>>, vector<1x1x512xf32>
    %395 = vector.shape_cast %394 : vector<1x1x512xf32> to vector<1x512xf32>
    %396 = vector.broadcast %395 : vector<1x512xf32> to vector<8x512xf32>
    %397 = arith.mulf %393, %396 : vector<8x512xf32>
    %398 = arith.addf %371, %397 : vector<8x512xf32>
    %c10_274 = arith.constant 10 : index
    %c0_275 = arith.constant 0 : index
    %c0_276 = arith.constant 0 : index
    %399 = vector.load %arg5[%c10_274, %c0_275, %c0_276] : memref<27x8x4xbf16, #tpu.memory_space<vmem>>, vector<1x8x4xbf16>
    %400 = vector.shape_cast %399 : vector<1x8x4xbf16> to vector<8x4xbf16>
    %cst_277 = arith.constant dense<0.000000e+00> : vector<8x512xf32>
    %401 = tpu.matmul %400, %305, %cst_277 {dimension_numbers = #tpu.dot_dimension_numbers<[1], [0], [0], [1], [0, 0, 1, 1], [], []>} : vector<8x4xbf16>, vector<4x512xbf16>, vector<8x512xf32> -> vector<8x512xf32>
    %c8_i32_278 = arith.constant 8 : i32
    %402 = tpu.dynamic_rotate %401 by %c8_i32_278 dim 1 : vector<8x512xf32>, i32 -> vector<8x512xf32>
    %c10_279 = arith.constant 10 : index
    %c0_280 = arith.constant 0 : index
    %c0_281 = arith.constant 0 : index
    %403 = vector.load %arg6[%c10_279, %c0_280, %c0_281] : memref<27x1x512xf32, #tpu.memory_space<vmem>>, vector<1x1x512xf32>
    %404 = vector.shape_cast %403 : vector<1x1x512xf32> to vector<1x512xf32>
    %405 = vector.broadcast %404 : vector<1x512xf32> to vector<8x512xf32>
    %406 = arith.mulf %402, %405 : vector<8x512xf32>
    %407 = arith.addf %380, %406 : vector<8x512xf32>
    %c11_282 = arith.constant 11 : index
    %c0_283 = arith.constant 0 : index
    %c0_284 = arith.constant 0 : index
    %408 = vector.load %arg5[%c11_282, %c0_283, %c0_284] : memref<27x8x4xbf16, #tpu.memory_space<vmem>>, vector<1x8x4xbf16>
    %409 = vector.shape_cast %408 : vector<1x8x4xbf16> to vector<8x4xbf16>
    %cst_285 = arith.constant dense<0.000000e+00> : vector<8x512xf32>
    %410 = tpu.matmul %409, %305, %cst_285 {dimension_numbers = #tpu.dot_dimension_numbers<[1], [0], [0], [1], [0, 0, 1, 1], [], []>} : vector<8x4xbf16>, vector<4x512xbf16>, vector<8x512xf32> -> vector<8x512xf32>
    %c7_i32_286 = arith.constant 7 : i32
    %411 = tpu.dynamic_rotate %410 by %c7_i32_286 dim 1 : vector<8x512xf32>, i32 -> vector<8x512xf32>
    %c11_287 = arith.constant 11 : index
    %c0_288 = arith.constant 0 : index
    %c0_289 = arith.constant 0 : index
    %412 = vector.load %arg6[%c11_287, %c0_288, %c0_289] : memref<27x1x512xf32, #tpu.memory_space<vmem>>, vector<1x1x512xf32>
    %413 = vector.shape_cast %412 : vector<1x1x512xf32> to vector<1x512xf32>
    %414 = vector.broadcast %413 : vector<1x512xf32> to vector<8x512xf32>
    %415 = arith.mulf %411, %414 : vector<8x512xf32>
    %416 = arith.addf %389, %415 : vector<8x512xf32>
    %c12_290 = arith.constant 12 : index
    %c0_291 = arith.constant 0 : index
    %c0_292 = arith.constant 0 : index
    %417 = vector.load %arg5[%c12_290, %c0_291, %c0_292] : memref<27x8x4xbf16, #tpu.memory_space<vmem>>, vector<1x8x4xbf16>
    %418 = vector.shape_cast %417 : vector<1x8x4xbf16> to vector<8x4xbf16>
    %cst_293 = arith.constant dense<0.000000e+00> : vector<8x512xf32>
    %419 = tpu.matmul %418, %305, %cst_293 {dimension_numbers = #tpu.dot_dimension_numbers<[1], [0], [0], [1], [0, 0, 1, 1], [], []>} : vector<8x4xbf16>, vector<4x512xbf16>, vector<8x512xf32> -> vector<8x512xf32>
    %c1_i32_294 = arith.constant 1 : i32
    %420 = tpu.dynamic_rotate %419 by %c1_i32_294 dim 1 : vector<8x512xf32>, i32 -> vector<8x512xf32>
    %c12_295 = arith.constant 12 : index
    %c0_296 = arith.constant 0 : index
    %c0_297 = arith.constant 0 : index
    %421 = vector.load %arg6[%c12_295, %c0_296, %c0_297] : memref<27x1x512xf32, #tpu.memory_space<vmem>>, vector<1x1x512xf32>
    %422 = vector.shape_cast %421 : vector<1x1x512xf32> to vector<1x512xf32>
    %423 = vector.broadcast %422 : vector<1x512xf32> to vector<8x512xf32>
    %424 = arith.mulf %420, %423 : vector<8x512xf32>
    %425 = arith.addf %398, %424 : vector<8x512xf32>
    %c13_298 = arith.constant 13 : index
    %c0_299 = arith.constant 0 : index
    %c0_300 = arith.constant 0 : index
    %426 = vector.load %arg5[%c13_298, %c0_299, %c0_300] : memref<27x8x4xbf16, #tpu.memory_space<vmem>>, vector<1x8x4xbf16>
    %427 = vector.shape_cast %426 : vector<1x8x4xbf16> to vector<8x4xbf16>
    %cst_301 = arith.constant dense<0.000000e+00> : vector<8x512xf32>
    %428 = tpu.matmul %427, %305, %cst_301 {dimension_numbers = #tpu.dot_dimension_numbers<[1], [0], [0], [1], [0, 0, 1, 1], [], []>} : vector<8x4xbf16>, vector<4x512xbf16>, vector<8x512xf32> -> vector<8x512xf32>
    %429 = arith.addf %407, %428 : vector<8x512xf32>
    %c14_302 = arith.constant 14 : index
    %c0_303 = arith.constant 0 : index
    %c0_304 = arith.constant 0 : index
    %430 = vector.load %arg5[%c14_302, %c0_303, %c0_304] : memref<27x8x4xbf16, #tpu.memory_space<vmem>>, vector<1x8x4xbf16>
    %431 = vector.shape_cast %430 : vector<1x8x4xbf16> to vector<8x4xbf16>
    %cst_305 = arith.constant dense<0.000000e+00> : vector<8x512xf32>
    %432 = tpu.matmul %431, %305, %cst_305 {dimension_numbers = #tpu.dot_dimension_numbers<[1], [0], [0], [1], [0, 0, 1, 1], [], []>} : vector<8x4xbf16>, vector<4x512xbf16>, vector<8x512xf32> -> vector<8x512xf32>
    %c511_i32_306 = arith.constant 511 : i32
    %433 = tpu.dynamic_rotate %432 by %c511_i32_306 dim 1 : vector<8x512xf32>, i32 -> vector<8x512xf32>
    %c14_307 = arith.constant 14 : index
    %c0_308 = arith.constant 0 : index
    %c0_309 = arith.constant 0 : index
    %434 = vector.load %arg6[%c14_307, %c0_308, %c0_309] : memref<27x1x512xf32, #tpu.memory_space<vmem>>, vector<1x1x512xf32>
    %435 = vector.shape_cast %434 : vector<1x1x512xf32> to vector<1x512xf32>
    %436 = vector.broadcast %435 : vector<1x512xf32> to vector<8x512xf32>
    %437 = arith.mulf %433, %436 : vector<8x512xf32>
    %438 = arith.addf %416, %437 : vector<8x512xf32>
    %c15_310 = arith.constant 15 : index
    %c0_311 = arith.constant 0 : index
    %c0_312 = arith.constant 0 : index
    %439 = vector.load %arg5[%c15_310, %c0_311, %c0_312] : memref<27x8x4xbf16, #tpu.memory_space<vmem>>, vector<1x8x4xbf16>
    %440 = vector.shape_cast %439 : vector<1x8x4xbf16> to vector<8x4xbf16>
    %cst_313 = arith.constant dense<0.000000e+00> : vector<8x512xf32>
    %441 = tpu.matmul %440, %305, %cst_313 {dimension_numbers = #tpu.dot_dimension_numbers<[1], [0], [0], [1], [0, 0, 1, 1], [], []>} : vector<8x4xbf16>, vector<4x512xbf16>, vector<8x512xf32> -> vector<8x512xf32>
    %c505_i32_314 = arith.constant 505 : i32
    %442 = tpu.dynamic_rotate %441 by %c505_i32_314 dim 1 : vector<8x512xf32>, i32 -> vector<8x512xf32>
    %c15_315 = arith.constant 15 : index
    %c0_316 = arith.constant 0 : index
    %c0_317 = arith.constant 0 : index
    %443 = vector.load %arg6[%c15_315, %c0_316, %c0_317] : memref<27x1x512xf32, #tpu.memory_space<vmem>>, vector<1x1x512xf32>
    %444 = vector.shape_cast %443 : vector<1x1x512xf32> to vector<1x512xf32>
    %445 = vector.broadcast %444 : vector<1x512xf32> to vector<8x512xf32>
    %446 = arith.mulf %442, %445 : vector<8x512xf32>
    %447 = arith.addf %425, %446 : vector<8x512xf32>
    %c16_318 = arith.constant 16 : index
    %c0_319 = arith.constant 0 : index
    %c0_320 = arith.constant 0 : index
    %448 = vector.load %arg5[%c16_318, %c0_319, %c0_320] : memref<27x8x4xbf16, #tpu.memory_space<vmem>>, vector<1x8x4xbf16>
    %449 = vector.shape_cast %448 : vector<1x8x4xbf16> to vector<8x4xbf16>
    %cst_321 = arith.constant dense<0.000000e+00> : vector<8x512xf32>
    %450 = tpu.matmul %449, %305, %cst_321 {dimension_numbers = #tpu.dot_dimension_numbers<[1], [0], [0], [1], [0, 0, 1, 1], [], []>} : vector<8x4xbf16>, vector<4x512xbf16>, vector<8x512xf32> -> vector<8x512xf32>
    %c504_i32_322 = arith.constant 504 : i32
    %451 = tpu.dynamic_rotate %450 by %c504_i32_322 dim 1 : vector<8x512xf32>, i32 -> vector<8x512xf32>
    %c16_323 = arith.constant 16 : index
    %c0_324 = arith.constant 0 : index
    %c0_325 = arith.constant 0 : index
    %452 = vector.load %arg6[%c16_323, %c0_324, %c0_325] : memref<27x1x512xf32, #tpu.memory_space<vmem>>, vector<1x1x512xf32>
    %453 = vector.shape_cast %452 : vector<1x1x512xf32> to vector<1x512xf32>
    %454 = vector.broadcast %453 : vector<1x512xf32> to vector<8x512xf32>
    %455 = arith.mulf %451, %454 : vector<8x512xf32>
    %456 = arith.addf %429, %455 : vector<8x512xf32>
    %c17_326 = arith.constant 17 : index
    %c0_327 = arith.constant 0 : index
    %c0_328 = arith.constant 0 : index
    %457 = vector.load %arg5[%c17_326, %c0_327, %c0_328] : memref<27x8x4xbf16, #tpu.memory_space<vmem>>, vector<1x8x4xbf16>
    %458 = vector.shape_cast %457 : vector<1x8x4xbf16> to vector<8x4xbf16>
    %cst_329 = arith.constant dense<0.000000e+00> : vector<8x512xf32>
    %459 = tpu.matmul %458, %305, %cst_329 {dimension_numbers = #tpu.dot_dimension_numbers<[1], [0], [0], [1], [0, 0, 1, 1], [], []>} : vector<8x4xbf16>, vector<4x512xbf16>, vector<8x512xf32> -> vector<8x512xf32>
    %c503_i32_330 = arith.constant 503 : i32
    %460 = tpu.dynamic_rotate %459 by %c503_i32_330 dim 1 : vector<8x512xf32>, i32 -> vector<8x512xf32>
    %c17_331 = arith.constant 17 : index
    %c0_332 = arith.constant 0 : index
    %c0_333 = arith.constant 0 : index
    %461 = vector.load %arg6[%c17_331, %c0_332, %c0_333] : memref<27x1x512xf32, #tpu.memory_space<vmem>>, vector<1x1x512xf32>
    %462 = vector.shape_cast %461 : vector<1x1x512xf32> to vector<1x512xf32>
    %463 = vector.broadcast %462 : vector<1x512xf32> to vector<8x512xf32>
    %464 = arith.mulf %460, %463 : vector<8x512xf32>
    %465 = arith.addf %438, %464 : vector<8x512xf32>
    %c18_334 = arith.constant 18 : index
    %c0_335 = arith.constant 0 : index
    %c0_336 = arith.constant 0 : index
    %466 = vector.load %arg5[%c18_334, %c0_335, %c0_336] : memref<27x8x4xbf16, #tpu.memory_space<vmem>>, vector<1x8x4xbf16>
    %467 = vector.shape_cast %466 : vector<1x8x4xbf16> to vector<8x4xbf16>
    %cst_337 = arith.constant dense<0.000000e+00> : vector<8x512xf32>
    %468 = tpu.matmul %467, %305, %cst_337 {dimension_numbers = #tpu.dot_dimension_numbers<[1], [0], [0], [1], [0, 0, 1, 1], [], []>} : vector<8x4xbf16>, vector<4x512xbf16>, vector<8x512xf32> -> vector<8x512xf32>
    %c457_i32_338 = arith.constant 457 : i32
    %469 = tpu.dynamic_rotate %468 by %c457_i32_338 dim 1 : vector<8x512xf32>, i32 -> vector<8x512xf32>
    %c18_339 = arith.constant 18 : index
    %c0_340 = arith.constant 0 : index
    %c0_341 = arith.constant 0 : index
    %470 = vector.load %arg6[%c18_339, %c0_340, %c0_341] : memref<27x1x512xf32, #tpu.memory_space<vmem>>, vector<1x1x512xf32>
    %471 = vector.shape_cast %470 : vector<1x1x512xf32> to vector<1x512xf32>
    %472 = vector.broadcast %471 : vector<1x512xf32> to vector<8x512xf32>
    %473 = arith.mulf %469, %472 : vector<8x512xf32>
    %474 = arith.addf %447, %473 : vector<8x512xf32>
    %c19_342 = arith.constant 19 : index
    %c0_343 = arith.constant 0 : index
    %c0_344 = arith.constant 0 : index
    %475 = vector.load %arg5[%c19_342, %c0_343, %c0_344] : memref<27x8x4xbf16, #tpu.memory_space<vmem>>, vector<1x8x4xbf16>
    %476 = vector.shape_cast %475 : vector<1x8x4xbf16> to vector<8x4xbf16>
    %cst_345 = arith.constant dense<0.000000e+00> : vector<8x512xf32>
    %477 = tpu.matmul %476, %305, %cst_345 {dimension_numbers = #tpu.dot_dimension_numbers<[1], [0], [0], [1], [0, 0, 1, 1], [], []>} : vector<8x4xbf16>, vector<4x512xbf16>, vector<8x512xf32> -> vector<8x512xf32>
    %c456_i32_346 = arith.constant 456 : i32
    %478 = tpu.dynamic_rotate %477 by %c456_i32_346 dim 1 : vector<8x512xf32>, i32 -> vector<8x512xf32>
    %c19_347 = arith.constant 19 : index
    %c0_348 = arith.constant 0 : index
    %c0_349 = arith.constant 0 : index
    %479 = vector.load %arg6[%c19_347, %c0_348, %c0_349] : memref<27x1x512xf32, #tpu.memory_space<vmem>>, vector<1x1x512xf32>
    %480 = vector.shape_cast %479 : vector<1x1x512xf32> to vector<1x512xf32>
    %481 = vector.broadcast %480 : vector<1x512xf32> to vector<8x512xf32>
    %482 = arith.mulf %478, %481 : vector<8x512xf32>
    %483 = arith.addf %456, %482 : vector<8x512xf32>
    %c20_350 = arith.constant 20 : index
    %c0_351 = arith.constant 0 : index
    %c0_352 = arith.constant 0 : index
    %484 = vector.load %arg5[%c20_350, %c0_351, %c0_352] : memref<27x8x4xbf16, #tpu.memory_space<vmem>>, vector<1x8x4xbf16>
    %485 = vector.shape_cast %484 : vector<1x8x4xbf16> to vector<8x4xbf16>
    %cst_353 = arith.constant dense<0.000000e+00> : vector<8x512xf32>
    %486 = tpu.matmul %485, %305, %cst_353 {dimension_numbers = #tpu.dot_dimension_numbers<[1], [0], [0], [1], [0, 0, 1, 1], [], []>} : vector<8x4xbf16>, vector<4x512xbf16>, vector<8x512xf32> -> vector<8x512xf32>
    %c455_i32_354 = arith.constant 455 : i32
    %487 = tpu.dynamic_rotate %486 by %c455_i32_354 dim 1 : vector<8x512xf32>, i32 -> vector<8x512xf32>
    %c20_355 = arith.constant 20 : index
    %c0_356 = arith.constant 0 : index
    %c0_357 = arith.constant 0 : index
    %488 = vector.load %arg6[%c20_355, %c0_356, %c0_357] : memref<27x1x512xf32, #tpu.memory_space<vmem>>, vector<1x1x512xf32>
    %489 = vector.shape_cast %488 : vector<1x1x512xf32> to vector<1x512xf32>
    %490 = vector.broadcast %489 : vector<1x512xf32> to vector<8x512xf32>
    %491 = arith.mulf %487, %490 : vector<8x512xf32>
    %492 = arith.addf %465, %491 : vector<8x512xf32>
    %c21_358 = arith.constant 21 : index
    %c0_359 = arith.constant 0 : index
    %c0_360 = arith.constant 0 : index
    %493 = vector.load %arg5[%c21_358, %c0_359, %c0_360] : memref<27x8x4xbf16, #tpu.memory_space<vmem>>, vector<1x8x4xbf16>
    %494 = vector.shape_cast %493 : vector<1x8x4xbf16> to vector<8x4xbf16>
    %cst_361 = arith.constant dense<0.000000e+00> : vector<8x512xf32>
    %495 = tpu.matmul %494, %305, %cst_361 {dimension_numbers = #tpu.dot_dimension_numbers<[1], [0], [0], [1], [0, 0, 1, 1], [], []>} : vector<8x4xbf16>, vector<4x512xbf16>, vector<8x512xf32> -> vector<8x512xf32>
    %c449_i32_362 = arith.constant 449 : i32
    %496 = tpu.dynamic_rotate %495 by %c449_i32_362 dim 1 : vector<8x512xf32>, i32 -> vector<8x512xf32>
    %c21_363 = arith.constant 21 : index
    %c0_364 = arith.constant 0 : index
    %c0_365 = arith.constant 0 : index
    %497 = vector.load %arg6[%c21_363, %c0_364, %c0_365] : memref<27x1x512xf32, #tpu.memory_space<vmem>>, vector<1x1x512xf32>
    %498 = vector.shape_cast %497 : vector<1x1x512xf32> to vector<1x512xf32>
    %499 = vector.broadcast %498 : vector<1x512xf32> to vector<8x512xf32>
    %500 = arith.mulf %496, %499 : vector<8x512xf32>
    %501 = arith.addf %474, %500 : vector<8x512xf32>
    %c22_366 = arith.constant 22 : index
    %c0_367 = arith.constant 0 : index
    %c0_368 = arith.constant 0 : index
    %502 = vector.load %arg5[%c22_366, %c0_367, %c0_368] : memref<27x8x4xbf16, #tpu.memory_space<vmem>>, vector<1x8x4xbf16>
    %503 = vector.shape_cast %502 : vector<1x8x4xbf16> to vector<8x4xbf16>
    %cst_369 = arith.constant dense<0.000000e+00> : vector<8x512xf32>
    %504 = tpu.matmul %503, %305, %cst_369 {dimension_numbers = #tpu.dot_dimension_numbers<[1], [0], [0], [1], [0, 0, 1, 1], [], []>} : vector<8x4xbf16>, vector<4x512xbf16>, vector<8x512xf32> -> vector<8x512xf32>
    %c448_i32_370 = arith.constant 448 : i32
    %505 = tpu.dynamic_rotate %504 by %c448_i32_370 dim 1 : vector<8x512xf32>, i32 -> vector<8x512xf32>
    %c22_371 = arith.constant 22 : index
    %c0_372 = arith.constant 0 : index
    %c0_373 = arith.constant 0 : index
    %506 = vector.load %arg6[%c22_371, %c0_372, %c0_373] : memref<27x1x512xf32, #tpu.memory_space<vmem>>, vector<1x1x512xf32>
    %507 = vector.shape_cast %506 : vector<1x1x512xf32> to vector<1x512xf32>
    %508 = vector.broadcast %507 : vector<1x512xf32> to vector<8x512xf32>
    %509 = arith.mulf %505, %508 : vector<8x512xf32>
    %510 = arith.addf %483, %509 : vector<8x512xf32>
    %c23_374 = arith.constant 23 : index
    %c0_375 = arith.constant 0 : index
    %c0_376 = arith.constant 0 : index
    %511 = vector.load %arg5[%c23_374, %c0_375, %c0_376] : memref<27x8x4xbf16, #tpu.memory_space<vmem>>, vector<1x8x4xbf16>
    %512 = vector.shape_cast %511 : vector<1x8x4xbf16> to vector<8x4xbf16>
    %cst_377 = arith.constant dense<0.000000e+00> : vector<8x512xf32>
    %513 = tpu.matmul %512, %305, %cst_377 {dimension_numbers = #tpu.dot_dimension_numbers<[1], [0], [0], [1], [0, 0, 1, 1], [], []>} : vector<8x4xbf16>, vector<4x512xbf16>, vector<8x512xf32> -> vector<8x512xf32>
    %c447_i32_378 = arith.constant 447 : i32
    %514 = tpu.dynamic_rotate %513 by %c447_i32_378 dim 1 : vector<8x512xf32>, i32 -> vector<8x512xf32>
    %c23_379 = arith.constant 23 : index
    %c0_380 = arith.constant 0 : index
    %c0_381 = arith.constant 0 : index
    %515 = vector.load %arg6[%c23_379, %c0_380, %c0_381] : memref<27x1x512xf32, #tpu.memory_space<vmem>>, vector<1x1x512xf32>
    %516 = vector.shape_cast %515 : vector<1x1x512xf32> to vector<1x512xf32>
    %517 = vector.broadcast %516 : vector<1x512xf32> to vector<8x512xf32>
    %518 = arith.mulf %514, %517 : vector<8x512xf32>
    %519 = arith.addf %492, %518 : vector<8x512xf32>
    %c24_382 = arith.constant 24 : index
    %c0_383 = arith.constant 0 : index
    %c0_384 = arith.constant 0 : index
    %520 = vector.load %arg5[%c24_382, %c0_383, %c0_384] : memref<27x8x4xbf16, #tpu.memory_space<vmem>>, vector<1x8x4xbf16>
    %521 = vector.shape_cast %520 : vector<1x8x4xbf16> to vector<8x4xbf16>
    %cst_385 = arith.constant dense<0.000000e+00> : vector<8x512xf32>
    %522 = tpu.matmul %521, %305, %cst_385 {dimension_numbers = #tpu.dot_dimension_numbers<[1], [0], [0], [1], [0, 0, 1, 1], [], []>} : vector<8x4xbf16>, vector<4x512xbf16>, vector<8x512xf32> -> vector<8x512xf32>
    %c441_i32_386 = arith.constant 441 : i32
    %523 = tpu.dynamic_rotate %522 by %c441_i32_386 dim 1 : vector<8x512xf32>, i32 -> vector<8x512xf32>
    %c24_387 = arith.constant 24 : index
    %c0_388 = arith.constant 0 : index
    %c0_389 = arith.constant 0 : index
    %524 = vector.load %arg6[%c24_387, %c0_388, %c0_389] : memref<27x1x512xf32, #tpu.memory_space<vmem>>, vector<1x1x512xf32>
    %525 = vector.shape_cast %524 : vector<1x1x512xf32> to vector<1x512xf32>
    %526 = vector.broadcast %525 : vector<1x512xf32> to vector<8x512xf32>
    %527 = arith.mulf %523, %526 : vector<8x512xf32>
    %528 = arith.addf %501, %527 : vector<8x512xf32>
    %c25_390 = arith.constant 25 : index
    %c0_391 = arith.constant 0 : index
    %c0_392 = arith.constant 0 : index
    %529 = vector.load %arg5[%c25_390, %c0_391, %c0_392] : memref<27x8x4xbf16, #tpu.memory_space<vmem>>, vector<1x8x4xbf16>
    %530 = vector.shape_cast %529 : vector<1x8x4xbf16> to vector<8x4xbf16>
    %cst_393 = arith.constant dense<0.000000e+00> : vector<8x512xf32>
    %531 = tpu.matmul %530, %305, %cst_393 {dimension_numbers = #tpu.dot_dimension_numbers<[1], [0], [0], [1], [0, 0, 1, 1], [], []>} : vector<8x4xbf16>, vector<4x512xbf16>, vector<8x512xf32> -> vector<8x512xf32>
    %c440_i32_394 = arith.constant 440 : i32
    %532 = tpu.dynamic_rotate %531 by %c440_i32_394 dim 1 : vector<8x512xf32>, i32 -> vector<8x512xf32>
    %c25_395 = arith.constant 25 : index
    %c0_396 = arith.constant 0 : index
    %c0_397 = arith.constant 0 : index
    %533 = vector.load %arg6[%c25_395, %c0_396, %c0_397] : memref<27x1x512xf32, #tpu.memory_space<vmem>>, vector<1x1x512xf32>
    %534 = vector.shape_cast %533 : vector<1x1x512xf32> to vector<1x512xf32>
    %535 = vector.broadcast %534 : vector<1x512xf32> to vector<8x512xf32>
    %536 = arith.mulf %532, %535 : vector<8x512xf32>
    %537 = arith.addf %510, %536 : vector<8x512xf32>
    %c26_398 = arith.constant 26 : index
    %c0_399 = arith.constant 0 : index
    %c0_400 = arith.constant 0 : index
    %538 = vector.load %arg5[%c26_398, %c0_399, %c0_400] : memref<27x8x4xbf16, #tpu.memory_space<vmem>>, vector<1x8x4xbf16>
    %539 = vector.shape_cast %538 : vector<1x8x4xbf16> to vector<8x4xbf16>
    %cst_401 = arith.constant dense<0.000000e+00> : vector<8x512xf32>
    %540 = tpu.matmul %539, %305, %cst_401 {dimension_numbers = #tpu.dot_dimension_numbers<[1], [0], [0], [1], [0, 0, 1, 1], [], []>} : vector<8x4xbf16>, vector<4x512xbf16>, vector<8x512xf32> -> vector<8x512xf32>
    %c439_i32_402 = arith.constant 439 : i32
    %541 = tpu.dynamic_rotate %540 by %c439_i32_402 dim 1 : vector<8x512xf32>, i32 -> vector<8x512xf32>
    %c26_403 = arith.constant 26 : index
    %c0_404 = arith.constant 0 : index
    %c0_405 = arith.constant 0 : index
    %542 = vector.load %arg6[%c26_403, %c0_404, %c0_405] : memref<27x1x512xf32, #tpu.memory_space<vmem>>, vector<1x1x512xf32>
    %543 = vector.shape_cast %542 : vector<1x1x512xf32> to vector<1x512xf32>
    %544 = vector.broadcast %543 : vector<1x512xf32> to vector<8x512xf32>
    %545 = arith.mulf %541, %544 : vector<8x512xf32>
    %546 = arith.addf %519, %545 : vector<8x512xf32>
    %547 = arith.addf %528, %537 : vector<8x512xf32>
    %548 = arith.addf %547, %546 : vector<8x512xf32>
    %549 = vector.extract_strided_slice %548 {offsets = [0, 0], sizes = [4, 512], strides = [1, 1]} : vector<8x512xf32> to vector<4x512xf32>
    %550 = vector.broadcast %7 : vector<4x1xf32> to vector<4x512xf32>
    %551 = arith.addf %549, %550 : vector<4x512xf32>
    %552 = arith.addf %551, %1 : vector<4x512xf32>
    %c0_406 = arith.constant 0 : index
    %c0_407 = arith.constant 0 : index
    %c0_408 = arith.constant 0 : index
    %553 = vector.load %arg8[%c0_406, %c0_407, %c0_408] : memref<1x4x512xf32, #tpu.memory_space<vmem>>, vector<1x4x512xf32>
    %554 = vector.shape_cast %553 : vector<1x4x512xf32> to vector<4x512xf32>
    %555 = vector.shape_cast %552 : vector<4x512xf32> to vector<1x4x512xf32>
    tpu.vector_store %arg8[%c0_406, %c0_407, %c0_408], %555 {strides = array<i32>} : memref<1x4x512xf32, #tpu.memory_space<vmem>>, vector<1x4x512xf32>,
    return
  }
  func.func @transform_0(%arg0: i32) -> (i32, i32, i32) {
    %c0_i32 = arith.constant 0 : i32
    %c0_i32_0 = arith.constant 0 : i32
    %c0_i32_1 = arith.constant 0 : i32
    return %arg0, %c0_i32, %c0_i32_0 : i32, i32, i32
  }
  func.func @transform_1(%arg0: i32) -> (i32, i32) {
    %c0_i32 = arith.constant 0 : i32
    %c0_i32_0 = arith.constant 0 : i32
    %c0_i32_1 = arith.constant 0 : i32
    return %c0_i32, %c0_i32_0 : i32, i32
  }
  func.func @transform_2(%arg0: i32) -> (i32, i32) {
    %c0_i32 = arith.constant 0 : i32
    %c0_i32_0 = arith.constant 0 : i32
    %c0_i32_1 = arith.constant 0 : i32
    return %c0_i32, %c0_i32_0 : i32, i32
  }
  func.func @transform_3(%arg0: i32) -> (i32, i32, i32) {
    %c0_i32 = arith.constant 0 : i32
    %c0_i32_0 = arith.constant 0 : i32
    %c0_i32_1 = arith.constant 0 : i32
    %c0_i32_2 = arith.constant 0 : i32
    return %c0_i32, %c0_i32_0, %c0_i32_1 : i32, i32, i32
  }
  func.func @transform_4(%arg0: i32) -> (i32, i32, i32) {
    %c0_i32 = arith.constant 0 : i32
    %c0_i32_0 = arith.constant 0 : i32
    %c0_i32_1 = arith.constant 0 : i32
    %c0_i32_2 = arith.constant 0 : i32
    return %c0_i32, %c0_i32_0, %c0_i32_1 : i32, i32, i32
  }
  func.func @transform_5(%arg0: i32) -> (i32, i32, i32) {
    %c0_i32 = arith.constant 0 : i32
    %c0_i32_0 = arith.constant 0 : i32
    %c0_i32_1 = arith.constant 0 : i32
    %c0_i32_2 = arith.constant 0 : i32
    return %c0_i32, %c0_i32_0, %c0_i32_1 : i32, i32, i32
  }
  func.func @transform_6(%arg0: i32) -> (i32, i32, i32) {
    %c0_i32 = arith.constant 0 : i32
    %c0_i32_0 = arith.constant 0 : i32
    %c0_i32_1 = arith.constant 0 : i32
    return %arg0, %c0_i32, %c0_i32_0 : i32, i32, i32
  }
  func.func @transform_7(%arg0: i32) -> (i32, i32, i32) {
    %c0_i32 = arith.constant 0 : i32
    %c0_i32_0 = arith.constant 0 : i32
    %c0_i32_1 = arith.constant 0 : i32
    return %arg0, %c0_i32, %c0_i32_0 : i32, i32, i32
  }
}

</mosaic_0001>

<bundles_post_ra>
// kernel: resblock3d_forward.1
= control target key start
LH: loop header
LB: loop body
LE: loop exit
PB: predicated region body
PF: predicated region fallthrough
CT: control target
= control target key end

     0   :  { %s7797_s24 = smov 0   ;;  %s10523_s0 = inlined_call_operand.vmem [shape: f32[2,4,512], index: 0, kind: input, shape index: {}]   ;;  %s10524_s1 = inlined_call_operand.vmem [shape: f32[4,4], index: 1, kind: input, shape index: {}]   ;;  %s10525_s2 = inlined_call_operand.vmem [shape: f32[4,5], index: 2, kind: input, shape index: {}]   ;;  %s10526_s3 = inlined_call_operand.vmem [shape: bf16[27,8,4], index: 3, kind: input, shape index: {}]   ;;  %s10527_s4 = inlined_call_operand.vmem [shape: bf16[27,8,4], index: 4, kind: input, shape index: {}]   ;;  %s10528_s5 = inlined_call_operand.vmem [shape: f32[27,1,512], index: 5, kind: input, shape index: {}]   ;;  %s10529_s6 = inlined_call_operand.vmem [shape: f32[2,4,1], index: 6, kind: input, shape index: {}]   ;;  %s10530_s7 = inlined_call_operand.vmem [shape: f32[2,4,512], index: 7, kind: output, shape index: {}]  }
   0x1 LB: > { %s7299_s25 = sadd.s32 4294967295, %s7730_s24   ;;  %p7303_p0 = scmp.ge.s32.totalorder %s7730_s24, 1  ;;  %s7730_s24 = sphi %s7797_s24, %s17_s24  }
   0x2   : > { %p246_p1 = scmp.lt.s32.totalorder %s7730_s24, 3 }
   0x4   : > { %p247_p2 = pnand %p7303_p0, %p246_p1 }
   0x6   : > { %250 = sbr.rel (%p247_p2) target bundleno = 3234 (0xca2), region = 48 }
   0xd   : > { %p282_p3 = scmp.lt.s32.totalorder %s7299_s25, 1  ;;  %v7732_v0 = vmov 0.0   ;;  %vm307_vm0 = vcmask 1043456   ;;  %vm7733_vm1 = vmmov 0   ;;  %v10534_v12 = vmov 0   ;;  %s7737_s8 = smov 73  }
   0xe   : > { %7628 = vmatprep.subr.mxu0 %v7732_v0  ;;  %7633 = vmatprep.subr.mxu1 %v7732_v0  ;;  %v299_v13 = vld [vmem:[%s10524_s1] sm:$0xf]  ;;  %vm317_vm2 = vcmask 31744   ;;  %v7735_v17 = vmov 839922192   ;;  %v10536_v19 = vlaneseq  ;;  %v7736_v44 = vmov 1  }
   0xf   : > { %s11161_s25 = smov (!%p282_p3, %s7299_s25), 1  ;;  %7630 = vmatprep.mubr.msk.f32.mxu0 %vm7733_vm1, %v7732_v0  ;;  %7635 = vmatprep.mubr.msk.f32.mxu1 %vm7733_vm1, %v7732_v0  ;;  %v399_v18 = vunpack.c.l.s4 %v7735_v17  ;;  %v300_v39 = vld [vmem:[%s10525_s2] sm:$0xf]  ;;  %vm10671_vm3 = vcmask 1041408   ;;  %v7325_v17 = vld [vmem:[%s10526_s3 + $0x8] sm:$0xf] }
  0x10   : > { %s10531_s26 = sshll.u32 %s11161_s25, 4  ;;  %7681 = vset.pattern.permute.xlu0 %v10534_v12  ;;  %7682 = vset.pattern.permute.xlu1 %v10534_v12  ;;  %v7842_v21 = vshrl.u32 %v10536_v19, 7  ;;  %s7738_s9 = smov 72  }
  0x11   : > { %s7815_s29 = scalar_lea.vmem %s10523_s0, %s10531_s26  ;;  %v400_v20 = vunpack.c.0.s8 %v399_v18  ;;  %v7331_v18 = vld [vmem:[%s10526_s3 + $0xc] sm:$0xf]  ;;  %s7739_s10 = smov 71  }
  0x12   : > { %v297_v1 = vld [vmem:[%s7815_s29] sm:$0xff]  ;;  %v298_v2 = vld [vmem:[%s7815_s29 + $0x8] sm:$0xff]  ;;  %s7740_s11 = smov 65   ;;  %s7741_s12 = smov 64  }
  0x13   : > { %v7819_v3 = vcombine.high %v297_v1, %v297_v1  ;;  %v7821_v4 = vcombine.high %v298_v2, %v298_v2  ;;  %v308_v5 = vsel %vm307_vm0, %v297_v1, 0.0  ;;  %v311_v7 = vsel %vm307_vm0, %v298_v2, 0.0  ;;  %s7742_s13 = smov 63   ;;  %s7743_s14 = smov 57  }
  0x14   : > { %v403_v22 = vsub.s32 %v400_v20, %v7842_v21  ;;  %v7337_v20 = vld [vmem:[%s10526_s3 + $0x10] sm:$0xf]  ;;  %s7744_s15 = smov 56   ;;  %s7745_s16 = smov 55  }
  0x15   : > { %10704 = vst [vmem:[#allocation2_spill] sm:$0xff] %v7819_v3  ;;  %10705 = vst [vmem:[#allocation3_spill] sm:$0xff] %v7821_v4  ;;  %v309_v6 = vsel %vm307_vm0, %v7819_v3, 0.0  ;;  %v313_v9 = vsel %vm307_vm0, %v7821_v4, 0.0  ;;  %s7746_s17 = smov 9   ;;  %s7747_s18 = smov 8  }
  0x16   : > { %v310_v8 = vadd.f32 %v309_v6, %v308_v5  ;;  %s7748_s19 = smov 7   ;;  %s7749_s20 = smov 1  }
  0x17   : > { %s7750_s21 = smov 127   ;;  %s10544_s22 = smov 121  }
  0x18   : > { %v312_v10 = vadd.f32 %v311_v7, %v310_v8  ;;  %s10542_s23 = smov 120   ;;  %s10532_s27 = smov 119  }
  0x19   : > { %s7306_s28 = sshll.u32 %s11161_s25, 2 }
  0x1a   : > { %v314_v11 = vadd.f32 %v313_v9, %v312_v10 }
  0x1c   : > { %315 = vadd.xlane.f32.xlu0 %v314_v11 }
  0xa9   : > { %v316_v14 = vpop.xlane.xlu0 %315 }
  0xaa   : > { %7629 = vmatpush3.msk.msra.mxu0 %vm307_vm0, %v316_v14 }
  0xab   : > { %7631 = vmatmul.mubr.msk.f32.vlgmr.msra.gmra.mrb[0].mxu0 %vm317_vm2, %v299_v13 }
  0xac   : > { %613 = vmatprep.mubr.bf16.mxu0 %v10534_v12 }
 0x17e   : > { %v390_v15 = vpop.f32.mrb[0].mxu0 }
 0x17f   : > { %396 = vperm.xlu0 %7681, %v390_v15   ;;  %v7632_v16 = vpop.f32.mrb[1].mxu0  ;;  %v564_v15 = vld [vmem:[%s10526_s3] sm:$0xf] }
 0x180   : > { %v7319_v16 = vld [vmem:[%s10526_s3 + $0x4] sm:$0xf] }
 0x1fe   : > { %v397_v23 = vpop.permute.xlu0 %396 }
 0x1ff   : > { %v404_v24 = vrot.slane %v397_v23, %v403_v22  ;;  %v7349_v23 = vld [vmem:[%s10526_s3 + $0x18] sm:$0xf] }
 0x201   : > { %v406_v25 = vsub.f32 %v297_v1, %v404_v24  ;;  %v407_v26 = vsub.f32 %v298_v2, %v404_v24  ;;  %v7355_v24 = vld [vmem:[%s10526_s3 + $0x1c] sm:$0xf] }
 0x203   : > { %v408_v27 = vmul.f32 %v406_v25, %v406_v25  ;;  %v409_v28 = vmul.f32 %v407_v26, %v407_v26 }
 0x205   : > { %v412_v29 = vcombine.high %v408_v27, %v408_v27  ;;  %v413_v30 = vcombine.high %v409_v28, %v409_v28  ;;  %v416_v31 = vsel %vm307_vm0, %v408_v27, 0.0  ;;  %v419_v34 = vsel %vm307_vm0, %v409_v28, 0.0  ;;  %v7373_v27 = vld [vmem:[%s10526_s3 + $0x28] sm:$0xf]  ;;  %v7379_v28 = vld [vmem:[%s10526_s3 + $0x2c] sm:$0xf] }
 0x207   : > { %v417_v32 = vsel %vm307_vm0, %v412_v29, 0.0  ;;  %v421_v36 = vsel %vm307_vm0, %v413_v30, 0.0  ;;  %v7385_v29 = vld [vmem:[%s10526_s3 + $0x30] sm:$0xf]  ;;  %v7391_v30 = vld [vmem:[%s10526_s3 + $0x34] sm:$0xf] }
 0x208   : > { %v418_v33 = vadd.f32 %v417_v32, %v416_v31  ;;  %v7396_v31 = vld [vmem:[%s10526_s3 + $0x38] sm:$0xf]  ;;  %v7402_v32 = vld [vmem:[%s10526_s3 + $0x3c] sm:$0xf] }
 0x20a   : > { %v420_v35 = vadd.f32 %v419_v34, %v418_v33  ;;  %v7408_v33 = vld [vmem:[%s10526_s3 + $0x40] sm:$0xf]  ;;  %v7414_v34 = vld [vmem:[%s10526_s3 + $0x44] sm:$0xf] }
 0x20c   : > { %v422_v37 = vadd.f32 %v421_v36, %v420_v35  ;;  %v7420_v35 = vld [vmem:[%s10526_s3 + $0x48] sm:$0xf]  ;;  %v7426_v36 = vld [vmem:[%s10526_s3 + $0x4c] sm:$0xf] }
 0x20e   : > { %423 = vadd.xlane.f32.xlu1 %v422_v37  ;;  %v7432_v37 = vld [vmem:[%s10526_s3 + $0x50] sm:$0xf] }
 0x21f   : > { %515 = vperm.xlu1 %7682, %v300_v39  }
 0x29b   : > { %v424_v38 = vpop.xlane.xlu1 %423 }
 0x29c   : > { %7634 = vmatpush3.msk.msra.mxu1 %vm307_vm0, %v424_v38  ;;  %v7438_v38 = vld [vmem:[%s10526_s3 + $0x54] sm:$0xf] }
 0x29d   : > { %7636 = vmatmul.mubr.msk.f32.vlgmr.msra.gmra.mrb[0].mxu1 %vm317_vm2, %v299_v13 }
 0x29e   : > { %654 = vmatprep.mubr.bf16.mxu1 %v10534_v12 }
 0x29f   : > { %v516_v45 = vpop.permute.xlu1 %515 }
 0x2a0   : > { %v523_v48 = vrot.slane %v516_v45, %v403_v22 }
 0x370   : > { %v494_v40 = vpop.f32.mrb[0].mxu1 }
 0x371   : > { %v495_v41 = vadd.f32 1e-05, %v494_v40  ;;  %v7637_v42 = vpop.f32.mrb[1].mxu1  ;;  %v7450_v40 = vld [vmem:[%s10526_s3 + $0x5c] sm:$0xf] }
 0x372   : > { %v7462_v42 = vld [vmem:[%s10526_s3 + $0x64] sm:$0xf] }
 0x373   : > { %7691 = vrsqrt.f32 %v495_v41  ;;  %v7456_v41 = vld [vmem:[%s10526_s3 + $0x60] sm:$0xf] }
 0x37d   : > { %v7692_v43 = vpop.eup %7691 }
 0x37e   : > { %501 = vperm.xlu1 %7682, %v7692_v43   ;;  %v7468_v43 = vld [vmem:[%s10526_s3 + $0x68] sm:$0xf] }
 0x382   : > { %7683 = vset.pattern.permute.xlu1 %v7736_v44 }
 0x383   : > { %528 = vperm.xlu1 %7683, %v300_v39   ;;  %v7444_v39 = vld [vmem:[%s10526_s3 + $0x58] sm:$0xf] }
 0x387   : > { %7684 = vset.pattern.permute.xlu1 %v10534_v12 }
 0x3fd   : > { %v502_v46 = vpop.permute.xlu1 %501 }
 0x3fe   : > { %v509_v47 = vrot.slane %v502_v46, %v403_v22 }
 0x400   : > { %v511_v49 = vmul.f32 %v509_v47, %v406_v25  ;;  %v512_v50 = vmul.f32 %v509_v47, %v407_v26  ;;  %v7361_v25 = vld [vmem:[%s10526_s3 + $0x20] sm:$0xf]  ;;  %v7367_v26 = vld [vmem:[%s10526_s3 + $0x24] sm:$0xf] }
 0x402   : > { %v525_v51 = vmul.f32 %v523_v48, %v511_v49  ;;  %v526_v52 = vmul.f32 %v523_v48, %v512_v50  ;;  %v529_v53 = vpop.permute.xlu1 %528 }
 0x403   : > { %v536_v54 = vrot.slane %v529_v53, %v403_v22  ;;  %v7343_v22 = vld [vmem:[%s10526_s3 + $0x14] sm:$0xf] }
 0x405   : > { %v538_v55 = vadd.f32 %v536_v54, %v525_v51  ;;  %v539_v56 = vadd.f32 %v536_v54, %v526_v52 }
 0x407   : > { %v7313_v57 = vmul.f32 -1.442695, %v538_v55  ;;  %v7314_v58 = vmul.f32 -1.442695, %v539_v56 }
 0x409   : > { %7693 = vpow2.f32 %v7313_v57 }
 0x40a   : > { %7695 = vpow2.f32 %v7314_v58 }
 0x413   : > { %v7694_v59 = vpop.eup %7693 }
 0x414   : > { %v7696_v60 = vpop.eup %7695  ;;  %v546_v61 = vadd.f32 1.0, %v7694_v59 }
 0x415   : > { %v547_v62 = vadd.f32 1.0, %v7696_v60 }
 0x416   : > { %7697 = vrcp.f32 %v546_v61 }
 0x417   : > { %7699 = vrcp.f32 %v547_v62 }
 0x420   : > { %v7698_v63 = vpop.eup %7697 }
 0x421   : > { %v7700_v1 = vpop.eup %7699  ;;  %v552_v2 = vmul.f32 %v7698_v63, %v538_v55 }
 0x422   : > { %v553_v5 = vmul.f32 %v7700_v1, %v539_v56 }
 0x423   : > { %v556_v6 = vcombine.high %v552_v2, %v552_v2  ;;  %v560_v7 = vpack.c.bf16 %v552_v2, %v552_v2 }
 0x424   : > { %v557_v8 = vcombine.high %v553_v5, %v553_v5  ;;  %v562_v9 = vpack.c.bf16 %v553_v5, %v553_v5 }
 0x425   : > { %v7856_v10 = vpack.c.bf16 %v556_v6, %v556_v6  ;;  %v7861_v13 = vsel %vm10671_vm3, %v560_v7, 0 }
 0x426   : > { %v7858_v11 = vpack.c.bf16 %v557_v8, %v557_v8  ;;  %v7866_v14 = vsel %vm10671_vm3, %v562_v9, 0 }
 0x427   : > { %7315 = vmatprep.subr.msk.bf16.mxu0 %vm10671_vm3, %v7856_v10 }
 0x428   : > { %7317 = vmatprep.subr.msk.bf16.mxu1 %vm10671_vm3, %v7858_v11  ;;  %582 = vmatpush1.bf16.msra.mxu0 %v7861_v13 }
 0x429   : > { %623 = vmatpush1.bf16.msra.mxu1 %v7866_v14  ;;  %7320 = vmatprep.subr.msk.bf16.mxu0 %vm10671_vm3, %v7856_v10 }
 0x42a   : > { %7322 = vmatprep.subr.msk.bf16.mxu1 %vm10671_vm3, %v7858_v11 }
 0x42b   : > { %7316 = vmatmul.mubr.msk.bf16.vlgmr.msra.gmra.mrb[4].mxu0 %vm317_vm2, %v564_v15 }
 0x42c   : > { %7318 = vmatmul.mubr.msk.bf16.vlgmr.msra.gmra.mrb[4].mxu1 %vm317_vm2, %v564_v15  ;;  %714 = vmatpush1.bf16.msra.mxu0 %v7861_v13 }
 0x42d   : > { %755 = vmatpush1.bf16.msra.mxu1 %v7866_v14  ;;  %7326 = vmatprep.subr.msk.bf16.mxu0 %vm10671_vm3, %v7856_v10 }
 0x42e   : > { %7328 = vmatprep.subr.msk.bf16.mxu1 %vm10671_vm3, %v7858_v11  ;;  %745 = vmatprep.mubr.bf16.mxu0 %v10534_v12 }
 0x42f   : > { %786 = vmatprep.mubr.bf16.mxu1 %v10534_v12 }
 0x433   : > { %7321 = vmatmul.mubr.msk.bf16.vlgmr.msra.gmra.mrb[8].mxu0 %vm317_vm2, %v7319_v16 }
 0x434   : > { %7323 = vmatmul.mubr.msk.bf16.vlgmr.msra.gmra.mrb[8].mxu1 %vm317_vm2, %v7319_v16  ;;  %845 = vmatpush1.bf16.msra.mxu0 %v7861_v13 }
 0x435   : > { %886 = vmatpush1.bf16.msra.mxu1 %v7866_v14  ;;  %7332 = vmatprep.subr.msk.bf16.mxu0 %vm10671_vm3, %v7856_v10 }
 0x436   : > { %7334 = vmatprep.subr.msk.bf16.mxu1 %vm10671_vm3, %v7858_v11  ;;  %876 = vmatprep.mubr.bf16.mxu0 %v10534_v12 }
 0x437   : > { %917 = vmatprep.mubr.bf16.mxu1 %v10534_v12 }
 0x43b   : > { %7327 = vmatmul.mubr.msk.bf16.vlgmr.msra.gmra.mrb[12].mxu0 %vm317_vm2, %v7325_v17 }
 0x43c   : > { %7329 = vmatmul.mubr.msk.bf16.vlgmr.msra.gmra.mrb[12].mxu1 %vm317_vm2, %v7325_v17  ;;  %976 = vmatpush1.bf16.msra.mxu0 %v7861_v13 }
 0x43d   : > { %1017 = vmatpush1.bf16.msra.mxu1 %v7866_v14  ;;  %7338 = vmatprep.subr.msk.bf16.mxu0 %vm10671_vm3, %v7856_v10 }
 0x43e   : > { %7340 = vmatprep.subr.msk.bf16.mxu1 %vm10671_vm3, %v7858_v11  ;;  %1007 = vmatprep.mubr.bf16.mxu0 %v10534_v12 }
 0x43f   : > { %1048 = vmatprep.mubr.bf16.mxu1 %v10534_v12 }
 0x443   : > { %7333 = vmatmul.mubr.msk.bf16.vlgmr.msra.gmra.mrb[16].mxu0 %vm317_vm2, %v7331_v18 }
 0x444   : > { %7335 = vmatmul.mubr.msk.bf16.vlgmr.msra.gmra.mrb[16].mxu1 %vm317_vm2, %v7331_v18  ;;  %1107 = vmatpush1.bf16.msra.mxu0 %v7861_v13 }
 0x445   : > { %1148 = vmatpush1.bf16.msra.mxu1 %v7866_v14  ;;  %7344 = vmatprep.subr.msk.bf16.mxu0 %vm10671_vm3, %v7856_v10 }
 0x446   : > { %7346 = vmatprep.subr.msk.bf16.mxu1 %vm10671_vm3, %v7858_v11  ;;  %1138 = vmatprep.mubr.bf16.mxu0 %v10534_v12 }
 0x447   : > { %1179 = vmatprep.mubr.bf16.mxu1 %v10534_v12 }
 0x44b   : > { %7339 = vmatmul.mubr.msk.bf16.vlgmr.msra.gmra.mrb[20].mxu0 %vm317_vm2, %v7337_v20 }
 0x44c   : > { %7341 = vmatmul.mubr.msk.bf16.vlgmr.msra.gmra.mrb[20].mxu1 %vm317_vm2, %v7337_v20  ;;  %1238 = vmatpush1.bf16.msra.mxu0 %v7861_v13 }
 0x44d   : > { %1279 = vmatpush1.bf16.msra.mxu1 %v7866_v14  ;;  %7350 = vmatprep.subr.msk.bf16.mxu0 %vm10671_vm3, %v7856_v10 }
 0x44e   : > { %7352 = vmatprep.subr.msk.bf16.mxu1 %vm10671_vm3, %v7858_v11  ;;  %1269 = vmatprep.mubr.bf16.mxu0 %v10534_v12 }
 0x44f   : > { %1310 = vmatprep.mubr.bf16.mxu1 %v10534_v12 }
 0x453   : > { %7345 = vmatmul.mubr.msk.bf16.vlgmr.msra.gmra.mrb[24].mxu0 %vm317_vm2, %v7343_v22 }
 0x454   : > { %7347 = vmatmul.mubr.msk.bf16.vlgmr.msra.gmra.mrb[24].mxu1 %vm317_vm2, %v7343_v22  ;;  %1369 = vmatpush1.bf16.msra.mxu0 %v7861_v13 }
 0x455   : > { %1410 = vmatpush1.bf16.msra.mxu1 %v7866_v14  ;;  %7356 = vmatprep.subr.msk.bf16.mxu0 %vm10671_vm3, %v7856_v10 }
 0x456   : > { %7358 = vmatprep.subr.msk.bf16.mxu1 %vm10671_vm3, %v7858_v11  ;;  %1400 = vmatprep.mubr.bf16.mxu0 %v10534_v12 }
 0x457   : > { %1441 = vmatprep.mubr.bf16.mxu1 %v10534_v12 }
 0x45b   : > { %7351 = vmatmul.mubr.msk.bf16.vlgmr.msra.gmra.mrb[28].mxu0 %vm317_vm2, %v7349_v23 }
 0x45c   : > { %7353 = vmatmul.mubr.msk.bf16.vlgmr.msra.gmra.mrb[28].mxu1 %vm317_vm2, %v7349_v23  ;;  %1500 = vmatpush1.bf16.msra.mxu0 %v7861_v13 }
 0x45d   : > { %1541 = vmatpush1.bf16.msra.mxu1 %v7866_v14  ;;  %7362 = vmatprep.subr.msk.bf16.mxu0 %vm10671_vm3, %v7856_v10 }
 0x45e   : > { %7364 = vmatprep.subr.msk.bf16.mxu1 %vm10671_vm3, %v7858_v11  ;;  %1531 = vmatprep.mubr.bf16.mxu0 %v10534_v12 }
 0x45f   : > { %1572 = vmatprep.mubr.bf16.mxu1 %v10534_v12 }
 0x463   : > { %7357 = vmatmul.mubr.msk.bf16.vlgmr.msra.gmra.mrb[32].mxu0 %vm317_vm2, %v7355_v24 }
 0x464   : > { %7359 = vmatmul.mubr.msk.bf16.vlgmr.msra.gmra.mrb[32].mxu1 %vm317_vm2, %v7355_v24  ;;  %1631 = vmatpush1.bf16.msra.mxu0 %v7861_v13 }
 0x465   : > { %1672 = vmatpush1.bf16.msra.mxu1 %v7866_v14  ;;  %7368 = vmatprep.subr.msk.bf16.mxu0 %vm10671_vm3, %v7856_v10 }
 0x466   : > { %7370 = vmatprep.subr.msk.bf16.mxu1 %vm10671_vm3, %v7858_v11  ;;  %1662 = vmatprep.mubr.bf16.mxu0 %v10534_v12 }
 0x467   : > { %1703 = vmatprep.mubr.bf16.mxu1 %v10534_v12 }
 0x46b   : > { %7363 = vmatmul.mubr.msk.bf16.vlgmr.msra.gmra.mrb[36].mxu0 %vm317_vm2, %v7361_v25 }
 0x46c   : > { %7365 = vmatmul.mubr.msk.bf16.vlgmr.msra.gmra.mrb[36].mxu1 %vm317_vm2, %v7361_v25  ;;  %1762 = vmatpush1.bf16.msra.mxu0 %v7861_v13 }
 0x46d   : > { %1803 = vmatpush1.bf16.msra.mxu1 %v7866_v14  ;;  %7374 = vmatprep.subr.msk.bf16.mxu0 %vm10671_vm3, %v7856_v10 }
 0x46e   : > { %7376 = vmatprep.subr.msk.bf16.mxu1 %vm10671_vm3, %v7858_v11  ;;  %1793 = vmatprep.mubr.bf16.mxu0 %v10534_v12 }
 0x46f   : > { %1834 = vmatprep.mubr.bf16.mxu1 %v10534_v12 }
 0x473   : > { %7369 = vmatmul.mubr.msk.bf16.vlgmr.msra.gmra.mrb[40].mxu0 %vm317_vm2, %v7367_v26 }
 0x474   : > { %7371 = vmatmul.mubr.msk.bf16.vlgmr.msra.gmra.mrb[40].mxu1 %vm317_vm2, %v7367_v26  ;;  %1893 = vmatpush1.bf16.msra.mxu0 %v7861_v13 }
 0x475   : > { %1934 = vmatpush1.bf16.msra.mxu1 %v7866_v14  ;;  %7380 = vmatprep.subr.msk.bf16.mxu0 %vm10671_vm3, %v7856_v10 }
 0x476   : > { %7382 = vmatprep.subr.msk.bf16.mxu1 %vm10671_vm3, %v7858_v11  ;;  %1924 = vmatprep.mubr.bf16.mxu0 %v10534_v12 }
 0x477   : > { %1965 = vmatprep.mubr.bf16.mxu1 %v10534_v12 }
 0x47b   : > { %7375 = vmatmul.mubr.msk.bf16.vlgmr.msra.gmra.mrb[44].mxu0 %vm317_vm2, %v7373_v27 }
 0x47c   : > { %7377 = vmatmul.mubr.msk.bf16.vlgmr.msra.gmra.mrb[44].mxu1 %vm317_vm2, %v7373_v27  ;;  %2024 = vmatpush1.bf16.msra.mxu0 %v7861_v13 }
 0x47d   : > { %2065 = vmatpush1.bf16.msra.mxu1 %v7866_v14  ;;  %7386 = vmatprep.subr.msk.bf16.mxu0 %vm10671_vm3, %v7856_v10 }
 0x47e   : > { %7388 = vmatprep.subr.msk.bf16.mxu1 %vm10671_vm3, %v7858_v11  ;;  %2055 = vmatprep.mubr.bf16.mxu0 %v10534_v12 }
 0x47f   : > { %2096 = vmatprep.mubr.bf16.mxu1 %v10534_v12 }
 0x483   : > { %7381 = vmatmul.mubr.msk.bf16.vlgmr.msra.gmra.mrb[48].mxu0 %vm317_vm2, %v7379_v28 }
 0x484   : > { %7383 = vmatmul.mubr.msk.bf16.vlgmr.msra.gmra.mrb[48].mxu1 %vm317_vm2, %v7379_v28  ;;  %2155 = vmatpush1.bf16.msra.mxu0 %v7861_v13 }
 0x485   : > { %2196 = vmatpush1.bf16.msra.mxu1 %v7866_v14  ;;  %7392 = vmatprep.subr.msk.bf16.mxu0 %vm10671_vm3, %v7856_v10 }
 0x486   : > { %7394 = vmatprep.subr.msk.bf16.mxu1 %vm10671_vm3, %v7858_v11  ;;  %2186 = vmatprep.mubr.bf16.mxu0 %v10534_v12 }
 0x487   : > { %2227 = vmatprep.mubr.bf16.mxu1 %v10534_v12 }
 0x48b   : > { %7387 = vmatmul.mubr.msk.bf16.vlgmr.msra.gmra.mrb[52].mxu0 %vm317_vm2, %v7385_v29 }
 0x48c   : > { %7389 = vmatmul.mubr.msk.bf16.vlgmr.msra.gmra.mrb[52].mxu1 %vm317_vm2, %v7385_v29  ;;  %2286 = vmatpush1.bf16.msra.mxu0 %v7861_v13 }
 0x48d   : > { %2327 = vmatpush1.bf16.msra.mxu1 %v7866_v14  ;;  %7397 = vmatprep.subr.msk.bf16.mxu0 %vm10671_vm3, %v7856_v10 }
 0x48e   : > { %7399 = vmatprep.subr.msk.bf16.mxu1 %vm10671_vm3, %v7858_v11  ;;  %2317 = vmatprep.mubr.bf16.mxu0 %v10534_v12 }
 0x48f   : > { %2358 = vmatprep.mubr.bf16.mxu1 %v10534_v12 }
 0x493   : > { %7393 = vmatmul.mubr.msk.bf16.vlgmr.msra.gmra.mrb[56].mxu0 %vm317_vm2, %v7391_v30 }
 0x494   : > { %7395 = vmatmul.mubr.msk.bf16.vlgmr.msra.gmra.mrb[56].mxu1 %vm317_vm2, %v7391_v30  ;;  %2377 = vmatpush1.bf16.msra.mxu0 %v7861_v13 }
 0x495   : > { %2418 = vmatpush1.bf16.msra.mxu1 %v7866_v14  ;;  %7403 = vmatprep.subr.msk.bf16.mxu0 %vm10671_vm3, %v7856_v10 }
 0x496   : > { %7405 = vmatprep.subr.msk.bf16.mxu1 %vm10671_vm3, %v7858_v11  ;;  %2408 = vmatprep.mubr.bf16.mxu0 %v10534_v12 }
 0x497   : > { %2449 = vmatprep.mubr.bf16.mxu1 %v10534_v12 }
 0x49b   : > { %7398 = vmatmul.mubr.msk.bf16.vlgmr.msra.gmra.mrb[60].mxu0 %vm317_vm2, %v7396_v31 }
 0x49c   : > { %7400 = vmatmul.mubr.msk.bf16.vlgmr.msra.gmra.mrb[60].mxu1 %vm317_vm2, %v7396_v31  ;;  %2508 = vmatpush1.bf16.msra.mxu0 %v7861_v13 }
 0x49d   : > { %2549 = vmatpush1.bf16.msra.mxu1 %v7866_v14  ;;  %7409 = vmatprep.subr.msk.bf16.mxu0 %vm10671_vm3, %v7856_v10 }
 0x49e   : > { %7411 = vmatprep.subr.msk.bf16.mxu1 %vm10671_vm3, %v7858_v11  ;;  %2539 = vmatprep.mubr.bf16.mxu0 %v10534_v12 }
 0x49f   : > { %2580 = vmatprep.mubr.bf16.mxu1 %v10534_v12 }
 0x4a3   : > { %7404 = vmatmul.mubr.msk.bf16.vlgmr.msra.gmra.mrb[64].mxu0 %vm317_vm2, %v7402_v32 }
 0x4a4   : > { %7406 = vmatmul.mubr.msk.bf16.vlgmr.msra.gmra.mrb[64].mxu1 %vm317_vm2, %v7402_v32  ;;  %2639 = vmatpush1.bf16.msra.mxu0 %v7861_v13 }
 0x4a5   : > { %2680 = vmatpush1.bf16.msra.mxu1 %v7866_v14  ;;  %7415 = vmatprep.subr.msk.bf16.mxu0 %vm10671_vm3, %v7856_v10 }
 0x4a6   : > { %7417 = vmatprep.subr.msk.bf16.mxu1 %vm10671_vm3, %v7858_v11  ;;  %2670 = vmatprep.mubr.bf16.mxu0 %v10534_v12 }
 0x4a7   : > { %2711 = vmatprep.mubr.bf16.mxu1 %v10534_v12 }
 0x4ab   : > { %7410 = vmatmul.mubr.msk.bf16.vlgmr.msra.gmra.mrb[68].mxu0 %vm317_vm2, %v7408_v33 }
 0x4ac   : > { %7412 = vmatmul.mubr.msk.bf16.vlgmr.msra.gmra.mrb[68].mxu1 %vm317_vm2, %v7408_v33  ;;  %2770 = vmatpush1.bf16.msra.mxu0 %v7861_v13 }
 0x4ad   : > { %2811 = vmatpush1.bf16.msra.mxu1 %v7866_v14  ;;  %7421 = vmatprep.subr.msk.bf16.mxu0 %vm10671_vm3, %v7856_v10 }
 0x4ae   : > { %7423 = vmatprep.subr.msk.bf16.mxu1 %vm10671_vm3, %v7858_v11  ;;  %2801 = vmatprep.mubr.bf16.mxu0 %v10534_v12 }
 0x4af   : > { %2842 = vmatprep.mubr.bf16.mxu1 %v10534_v12 }
 0x4b3   : > { %7416 = vmatmul.mubr.msk.bf16.vlgmr.msra.gmra.mrb[72].mxu0 %vm317_vm2, %v7414_v34 }
 0x4b4   : > { %7418 = vmatmul.mubr.msk.bf16.vlgmr.msra.gmra.mrb[72].mxu1 %vm317_vm2, %v7414_v34  ;;  %2901 = vmatpush1.bf16.msra.mxu0 %v7861_v13 }
 0x4b5   : > { %2942 = vmatpush1.bf16.msra.mxu1 %v7866_v14  ;;  %7427 = vmatprep.subr.msk.bf16.mxu0 %vm10671_vm3, %v7856_v10 }
 0x4b6   : > { %7429 = vmatprep.subr.msk.bf16.mxu1 %vm10671_vm3, %v7858_v11  ;;  %2932 = vmatprep.mubr.bf16.mxu0 %v10534_v12 }
 0x4b7   : > { %2973 = vmatprep.mubr.bf16.mxu1 %v10534_v12 }
 0x4bb   : > { %7422 = vmatmul.mubr.msk.bf16.vlgmr.msra.gmra.mrb[76].mxu0 %vm317_vm2, %v7420_v35 }
 0x4bc   : > { %7424 = vmatmul.mubr.msk.bf16.vlgmr.msra.gmra.mrb[76].mxu1 %vm317_vm2, %v7420_v35  ;;  %3031 = vmatpush1.bf16.msra.mxu0 %v7861_v13 }
 0x4bd   : > { %3072 = vmatpush1.bf16.msra.mxu1 %v7866_v14  ;;  %7433 = vmatprep.subr.msk.bf16.mxu0 %vm10671_vm3, %v7856_v10 }
 0x4be   : > { %7435 = vmatprep.subr.msk.bf16.mxu1 %vm10671_vm3, %v7858_v11  ;;  %3062 = vmatprep.mubr.bf16.mxu0 %v10534_v12 }
 0x4bf   : > { %3103 = vmatprep.mubr.bf16.mxu1 %v10534_v12 }
 0x4c3   : > { %7428 = vmatmul.mubr.msk.bf16.vlgmr.msra.gmra.mrb[80].mxu0 %vm317_vm2, %v7426_v36 }
 0x4c4   : > { %7430 = vmatmul.mubr.msk.bf16.vlgmr.msra.gmra.mrb[80].mxu1 %vm317_vm2, %v7426_v36  ;;  %3161 = vmatpush1.bf16.msra.mxu0 %v7861_v13 }
 0x4c5   : > { %3202 = vmatpush1.bf16.msra.mxu1 %v7866_v14  ;;  %7439 = vmatprep.subr.msk.bf16.mxu0 %vm10671_vm3, %v7856_v10 }
 0x4c6   : > { %7441 = vmatprep.subr.msk.bf16.mxu1 %vm10671_vm3, %v7858_v11  ;;  %3192 = vmatprep.mubr.bf16.mxu0 %v10534_v12 }
 0x4c7   : > { %3233 = vmatprep.mubr.bf16.mxu1 %v10534_v12 }
 0x4cb   : > { %7434 = vmatmul.mubr.msk.bf16.vlgmr.msra.gmra.mrb[84].mxu0 %vm317_vm2, %v7432_v37 }
 0x4cc   : > { %7436 = vmatmul.mubr.msk.bf16.vlgmr.msra.gmra.mrb[84].mxu1 %vm317_vm2, %v7432_v37  ;;  %3291 = vmatpush1.bf16.msra.mxu0 %v7861_v13 }
 0x4cd   : > { %3332 = vmatpush1.bf16.msra.mxu1 %v7866_v14  ;;  %7445 = vmatprep.subr.msk.bf16.mxu0 %vm10671_vm3, %v7856_v10 }
 0x4ce   : > { %7447 = vmatprep.subr.msk.bf16.mxu1 %vm10671_vm3, %v7858_v11  ;;  %3322 = vmatprep.mubr.bf16.mxu0 %v10534_v12 }
 0x4cf   : > { %3363 = vmatprep.mubr.bf16.mxu1 %v10534_v12 }
 0x4d3   : > { %7440 = vmatmul.mubr.msk.bf16.vlgmr.msra.gmra.mrb[88].mxu0 %vm317_vm2, %v7438_v38 }
 0x4d4   : > { %7442 = vmatmul.mubr.msk.bf16.vlgmr.msra.gmra.mrb[88].mxu1 %vm317_vm2, %v7438_v38  ;;  %3421 = vmatpush1.bf16.msra.mxu0 %v7861_v13 }
 0x4d5   : > { %3462 = vmatpush1.bf16.msra.mxu1 %v7866_v14  ;;  %7451 = vmatprep.subr.msk.bf16.mxu0 %vm10671_vm3, %v7856_v10 }
 0x4d6   : > { %7453 = vmatprep.subr.msk.bf16.mxu1 %vm10671_vm3, %v7858_v11  ;;  %3452 = vmatprep.mubr.bf16.mxu0 %v10534_v12 }
 0x4d7   : > { %3493 = vmatprep.mubr.bf16.mxu1 %v10534_v12 }
 0x4db   : > { %7446 = vmatmul.mubr.msk.bf16.vlgmr.msra.gmra.mrb[92].mxu0 %vm317_vm2, %v7444_v39 }
 0x4dc   : > { %7448 = vmatmul.mubr.msk.bf16.vlgmr.msra.gmra.mrb[92].mxu1 %vm317_vm2, %v7444_v39  ;;  %3551 = vmatpush1.bf16.msra.mxu0 %v7861_v13 }
 0x4dd   : > { %3592 = vmatpush1.bf16.msra.mxu1 %v7866_v14  ;;  %7457 = vmatprep.subr.msk.bf16.mxu0 %vm10671_vm3, %v7856_v10 }
 0x4de   : > { %7459 = vmatprep.subr.msk.bf16.mxu1 %vm10671_vm3, %v7858_v11  ;;  %3582 = vmatprep.mubr.bf16.mxu0 %v10534_v12 }
 0x4df   : > { %3623 = vmatprep.mubr.bf16.mxu1 %v10534_v12 }
 0x4e3   : > { %7452 = vmatmul.mubr.msk.bf16.vlgmr.msra.gmra.mrb[96].mxu0 %vm317_vm2, %v7450_v40 }
 0x4e4   : > { %7454 = vmatmul.mubr.msk.bf16.vlgmr.msra.gmra.mrb[96].mxu1 %vm317_vm2, %v7450_v40  ;;  %3681 = vmatpush1.bf16.msra.mxu0 %v7861_v13 }
 0x4e5   : > { %3722 = vmatpush1.bf16.msra.mxu1 %v7866_v14  ;;  %7463 = vmatprep.subr.msk.bf16.mxu0 %vm10671_vm3, %v7856_v10 }
 0x4e6   : > { %7465 = vmatprep.subr.msk.bf16.mxu1 %vm10671_vm3, %v7858_v11  ;;  %3712 = vmatprep.mubr.bf16.mxu0 %v10534_v12 }
 0x4e7   : > { %3753 = vmatprep.mubr.bf16.mxu1 %v10534_v12 }
 0x4eb   : > { %7458 = vmatmul.mubr.msk.bf16.vlgmr.msra.gmra.mrb[100].mxu0 %vm317_vm2, %v7456_v41 }
 0x4ec   : > { %7460 = vmatmul.mubr.msk.bf16.vlgmr.msra.gmra.mrb[100].mxu1 %vm317_vm2, %v7456_v41  ;;  %3811 = vmatpush1.bf16.msra.mxu0 %v7861_v13 }
 0x4ed   : > { %3852 = vmatpush1.bf16.msra.mxu1 %v7866_v14  ;;  %7469 = vmatprep.subr.msk.bf16.mxu0 %vm10671_vm3, %v7856_v10 }
 0x4ee   : > { %7471 = vmatprep.subr.msk.bf16.mxu1 %vm10671_vm3, %v7858_v11  ;;  %3842 = vmatprep.mubr.bf16.mxu0 %v10534_v12 }
 0x4ef   : > { %3883 = vmatprep.mubr.bf16.mxu1 %v10534_v12 }
 0x4f3   : > { %7464 = vmatmul.mubr.msk.bf16.vlgmr.msra.gmra.mrb[104].mxu0 %vm317_vm2, %v7462_v42 }
 0x4f4   : > { %7466 = vmatmul.mubr.msk.bf16.vlgmr.msra.gmra.mrb[104].mxu1 %vm317_vm2, %v7462_v42  ;;  %3941 = vmatpush1.bf16.msra.mxu0 %v7861_v13 }
 0x4f5   : > { %3982 = vmatpush1.bf16.msra.mxu1 %v7866_v14  ;;  %3972 = vmatprep.mubr.bf16.mxu0 %v10534_v12 }
 0x4f6   : > { %4013 = vmatprep.mubr.bf16.mxu1 %v10534_v12  ;;  %7638 = vmatprep.subr.mxu0 %v7732_v0 }
 0x4f7   : > { %7643 = vmatprep.subr.mxu1 %v7732_v0 }
 0x4fb   : > { %7470 = vmatmul.mubr.msk.bf16.vlgmr.msra.gmra.mrb[108].mxu0 %vm317_vm2, %v7468_v43 }
 0x4fc   : > { %7472 = vmatmul.mubr.msk.bf16.vlgmr.msra.gmra.mrb[108].mxu1 %vm317_vm2, %v7468_v43  ;;  %7640 = vmatprep.mubr.msk.f32.mxu0 %vm7733_vm1, %v7732_v0 }
 0x4fd   : > { %7645 = vmatprep.mubr.msk.f32.mxu1 %vm7733_vm1, %v7732_v0 }
 0x4fe   : > { %v615_v44 = vpop.f32.mrb[4].mxu0 }
 0x4ff   : > { %v656_v45 = vpop.f32.mrb[4].mxu1  ;;  %663 = vrot.lane.b32.xlu1 %v615_v44, %s7737_s8  ;;  %v617_v46 = vpop.f32.mrb[5].mxu0 }
 0x500   : > { %v619_v47 = vpop.f32.mrb[6].mxu0  ;;  %v658_v48 = vpop.f32.mrb[5].mxu1 }
 0x501   : > { %v620_v49 = vpop.f32.mrb[7].mxu0  ;;  %v660_v50 = vpop.f32.mrb[6].mxu1 }
 0x502   : > { %v661_v51 = vpop.f32.mrb[7].mxu1 }
 0x503   : > { %667 = vrot.lane.b32.xlu1 %v656_v45, %s7737_s8 }
 0x506   : > { %v747_v52 = vpop.f32.mrb[8].mxu0 }
 0x507   : > { %v788_v53 = vpop.f32.mrb[8].mxu1  ;;  %665 = vrot.lane.b32.xlu1 %v617_v46, %s7737_s8  ;;  %v749_v54 = vpop.f32.mrb[9].mxu0 }
 0x508   : > { %799 = vrot.lane.b32.xlu0 %v788_v53, %s7738_s9  ;;  %v751_v0 = vpop.f32.mrb[10].mxu0  ;;  %v790_v55 = vpop.f32.mrb[9].mxu1 }
 0x509   : > { %v752_v56 = vpop.f32.mrb[11].mxu0  ;;  %v792_v57 = vpop.f32.mrb[10].mxu1 }
 0x50a   : > { %v793_v58 = vpop.f32.mrb[11].mxu1 }
 0x50b   : > { %669 = vrot.lane.b32.xlu1 %v658_v48, %s7737_s8 }
 0x50c   : > { %801 = vrot.lane.b32.xlu0 %v790_v55, %s7738_s9 }
 0x50e   : > { %v878_v59 = vpop.f32.mrb[12].mxu0 }
 0x50f   : > { %v919_v60 = vpop.f32.mrb[12].mxu1  ;;  %795 = vrot.lane.b32.xlu1 %v747_v52, %s7738_s9  ;;  %v880_v61 = vpop.f32.mrb[13].mxu0 }
 0x510   : > { %v921_v62 = vpop.f32.mrb[13].mxu1  ;;  %928 = vrot.lane.b32.xlu0 %v880_v61, %s7739_s10  ;;  %v882_v63 = vpop.f32.mrb[14].mxu0 }
 0x511   : > { %v883_v1 = vpop.f32.mrb[15].mxu0  ;;  %v923_v2 = vpop.f32.mrb[14].mxu1 }
 0x512   : > { %v924_v5 = vpop.f32.mrb[15].mxu1 }
 0x513   : > { %797 = vrot.lane.b32.xlu1 %v749_v54, %s7738_s9 }
 0x516   : > { %v1009_v6 = vpop.f32.mrb[16].mxu0 }
 0x517   : > { %v1050_v7 = vpop.f32.mrb[16].mxu1  ;;  %926 = vrot.lane.b32.xlu1 %v878_v59, %s7739_s10  ;;  %v1011_v8 = vpop.f32.mrb[17].mxu0 }
 0x518   : > { %1061 = vrot.lane.b32.xlu0 %v1050_v7, %s7740_s11  ;;  %v1013_v9 = vpop.f32.mrb[18].mxu0  ;;  %v1052_v10 = vpop.f32.mrb[17].mxu1 }
 0x519   : > { %v1014_v11 = vpop.f32.mrb[19].mxu0  ;;  %v1054_v13 = vpop.f32.mrb[18].mxu1 }
 0x51a   : > { %v1055_v14 = vpop.f32.mrb[19].mxu1 }
 0x51b   : > { %930 = vrot.lane.b32.xlu1 %v919_v60, %s7739_s10 }
 0x51c   : > { %1059 = vrot.lane.b32.xlu0 %v1011_v8, %s7740_s11 }
 0x51e   : > { %v1140_v15 = vpop.f32.mrb[20].mxu0 }
 0x51f   : > { %v1181_v16 = vpop.f32.mrb[20].mxu1  ;;  %932 = vrot.lane.b32.xlu1 %v921_v62, %s7739_s10  ;;  %v1142_v17 = vpop.f32.mrb[21].mxu0 }
 0x520   : > { %1188 = vrot.lane.b32.xlu0 %v1140_v15, %s7741_s12  ;;  %v1144_v18 = vpop.f32.mrb[22].mxu0  ;;  %v1183_v20 = vpop.f32.mrb[21].mxu1 }
 0x521   : > { %v1145_v22 = vpop.f32.mrb[23].mxu0  ;;  %v1185_v23 = vpop.f32.mrb[22].mxu1 }
 0x522   : > { %v1186_v24 = vpop.f32.mrb[23].mxu1 }
 0x523   : > { %1057 = vrot.lane.b32.xlu1 %v1009_v6, %s7740_s11 }
 0x524   : > { %1194 = vrot.lane.b32.xlu0 %v1183_v20, %s7741_s12 }
 0x526   : > { %v1271_v25 = vpop.f32.mrb[24].mxu0 }
 0x527   : > { %v1312_v26 = vpop.f32.mrb[24].mxu1  ;;  %1063 = vrot.lane.b32.xlu1 %v1052_v10, %s7740_s11  ;;  %v1273_v27 = vpop.f32.mrb[25].mxu0 }
 0x528   : > { %1319 = vrot.lane.b32.xlu0 %v1271_v25, %s7742_s13  ;;  %v1275_v28 = vpop.f32.mrb[26].mxu0  ;;  %v1314_v29 = vpop.f32.mrb[25].mxu1 }
 0x529   : > { %v1276_v30 = vpop.f32.mrb[27].mxu0  ;;  %v1316_v31 = vpop.f32.mrb[26].mxu1 }
 0x52a   : > { %v1317_v32 = vpop.f32.mrb[27].mxu1 }
 0x52b   : > { %1192 = vrot.lane.b32.xlu1 %v1181_v16, %s7741_s12 }
 0x52c   : > { %1323 = vrot.lane.b32.xlu0 %v1312_v26, %s7742_s13 }
 0x52e   : > { %v1402_v33 = vpop.f32.mrb[28].mxu0 }
 0x52f   : > { %v1443_v34 = vpop.f32.mrb[28].mxu1  ;;  %1190 = vrot.lane.b32.xlu1 %v1142_v17, %s7741_s12  ;;  %v1404_v35 = vpop.f32.mrb[29].mxu0 }
 0x530   : > { %1325 = vrot.lane.b32.xlu0 %v1314_v29, %s7742_s13  ;;  %v1406_v36 = vpop.f32.mrb[30].mxu0  ;;  %v1445_v37 = vpop.f32.mrb[29].mxu1 }
 0x531   : > { %v1407_v38 = vpop.f32.mrb[31].mxu0  ;;  %v1447_v39 = vpop.f32.mrb[30].mxu1 }
 0x532   : > { %v1448_v40 = vpop.f32.mrb[31].mxu1 }
 0x533   : > { %1321 = vrot.lane.b32.xlu1 %v1273_v27, %s7742_s13 }
 0x534   : > { %1452 = vrot.lane.b32.xlu0 %v1404_v35, %s7743_s14 }
 0x536   : > { %v1533_v41 = vpop.f32.mrb[32].mxu0 }
 0x537   : > { %v1574_v42 = vpop.f32.mrb[32].mxu1  ;;  %1450 = vrot.lane.b32.xlu1 %v1402_v33, %s7743_s14  ;;  %v1535_v43 = vpop.f32.mrb[33].mxu0 }
 0x538   : > { %1581 = vrot.lane.b32.xlu0 %v1533_v41, %s7744_s15  ;;  %v1537_v44 = vpop.f32.mrb[34].mxu0  ;;  %v1576_v45 = vpop.f32.mrb[33].mxu1 }
 0x539   : > { %v1538_v46 = vpop.f32.mrb[35].mxu0  ;;  %v1578_v47 = vpop.f32.mrb[34].mxu1 }
 0x53a   : > { %v1579_v48 = vpop.f32.mrb[35].mxu1 }
 0x53b   : > { %1454 = vrot.lane.b32.xlu1 %v1443_v34, %s7743_s14 }
 0x53c   : > { %1585 = vrot.lane.b32.xlu0 %v1574_v42, %s7744_s15 }
 0x53e   : > { %v1664_v49 = vpop.f32.mrb[36].mxu0 }
 0x53f   : > { %v1705_v50 = vpop.f32.mrb[36].mxu1  ;;  %1456 = vrot.lane.b32.xlu1 %v1445_v37, %s7743_s14  ;;  %v1666_v51 = vpop.f32.mrb[37].mxu0 }
 0x540   : > { %1587 = vrot.lane.b32.xlu0 %v1576_v45, %s7744_s15  ;;  %v1668_v52 = vpop.f32.mrb[38].mxu0  ;;  %v1707_v53 = vpop.f32.mrb[37].mxu1 }
 0x541   : > { %v1669_v54 = vpop.f32.mrb[39].mxu0  ;;  %v1709_v0 = vpop.f32.mrb[38].mxu1 }
 0x542   : > { %v1710_v55 = vpop.f32.mrb[39].mxu1 }
 0x543   : > { %1583 = vrot.lane.b32.xlu1 %v1535_v43, %s7744_s15 }
 0x544   : > { %1716 = vrot.lane.b32.xlu0 %v1705_v50, %s7745_s16 }
 0x546   : > { %v1795_v56 = vpop.f32.mrb[40].mxu0 }
 0x547   : > { %v1836_v57 = vpop.f32.mrb[40].mxu1  ;;  %1712 = vrot.lane.b32.xlu1 %v1664_v49, %s7745_s16  ;;  %v1797_v58 = vpop.f32.mrb[41].mxu0 }
 0x548   : > { %1714 = vrot.lane.b32.xlu0 %v1666_v51, %s7745_s16  ;;  %v1799_v59 = vpop.f32.mrb[42].mxu0  ;;  %v1838_v60 = vpop.f32.mrb[41].mxu1 }
 0x549   : > { %v1800_v61 = vpop.f32.mrb[43].mxu0  ;;  %v1840_v62 = vpop.f32.mrb[42].mxu1 }
 0x54a   : > { %v1841_v63 = vpop.f32.mrb[43].mxu1 }
 0x54b   : > { %1718 = vrot.lane.b32.xlu1 %v1707_v53, %s7745_s16 }
 0x54c   : > { %1843 = vrot.lane.b32.xlu0 %v1795_v56, %s7746_s17 }
 0x54e   : > { %v1926_v1 = vpop.f32.mrb[44].mxu0 }
 0x54f   : > { %v1967_v2 = vpop.f32.mrb[44].mxu1  ;;  %1847 = vrot.lane.b32.xlu1 %v1836_v57, %s7746_s17  ;;  %v1928_v5 = vpop.f32.mrb[45].mxu0 }
 0x550   : > { %1849 = vrot.lane.b32.xlu0 %v1838_v60, %s7746_s17  ;;  %v1930_v6 = vpop.f32.mrb[46].mxu0  ;;  %v1969_v7 = vpop.f32.mrb[45].mxu1 }
 0x551   : > { %v1931_v8 = vpop.f32.mrb[47].mxu0  ;;  %v1971_v9 = vpop.f32.mrb[46].mxu1 }
 0x552   : > { %v1972_v10 = vpop.f32.mrb[47].mxu1 }
 0x553   : > { %1845 = vrot.lane.b32.xlu1 %v1797_v58, %s7746_s17 }
 0x554   : > { %1978 = vrot.lane.b32.xlu0 %v1967_v2, %s7747_s18 }
 0x556   : > { %v2057_v11 = vpop.f32.mrb[48].mxu0 }
 0x557   : > { %v2098_v13 = vpop.f32.mrb[48].mxu1  ;;  %1974 = vrot.lane.b32.xlu1 %v1926_v1, %s7747_s18  ;;  %v2059_v14 = vpop.f32.mrb[49].mxu0 }
 0x558   : > { %1976 = vrot.lane.b32.xlu0 %v1928_v5, %s7747_s18  ;;  %v2061_v15 = vpop.f32.mrb[50].mxu0  ;;  %v2100_v16 = vpop.f32.mrb[49].mxu1 }
 0x559   : > { %v2062_v17 = vpop.f32.mrb[51].mxu0  ;;  %v2102_v18 = vpop.f32.mrb[50].mxu1 }
 0x55a   : > { %v2103_v20 = vpop.f32.mrb[51].mxu1 }
 0x55b   : > { %1980 = vrot.lane.b32.xlu1 %v1969_v7, %s7747_s18 }
 0x55c   : > { %2107 = vrot.lane.b32.xlu0 %v2059_v14, %s7748_s19 }
 0x55e   : > { %v2188_v22 = vpop.f32.mrb[52].mxu0 }
 0x55f   : > { %v2229_v23 = vpop.f32.mrb[52].mxu1  ;;  %2105 = vrot.lane.b32.xlu1 %v2057_v11, %s7748_s19  ;;  %v2190_v24 = vpop.f32.mrb[53].mxu0 }
 0x560   : > { %2236 = vrot.lane.b32.xlu0 %v2188_v22, %s7749_s20  ;;  %v2192_v25 = vpop.f32.mrb[54].mxu0  ;;  %v2231_v26 = vpop.f32.mrb[53].mxu1 }
 0x561   : > { %v2193_v27 = vpop.f32.mrb[55].mxu0  ;;  %v2233_v28 = vpop.f32.mrb[54].mxu1 }
 0x562   : > { %v2234_v29 = vpop.f32.mrb[55].mxu1 }
 0x563   : > { %2109 = vrot.lane.b32.xlu1 %v2098_v13, %s7748_s19 }
 0x564   : > { %2240 = vrot.lane.b32.xlu0 %v2229_v23, %s7749_s20 }
 0x566   : > { %v8270_v30 = vpop.f32.mrb[56].mxu0 }
 0x567   : > { %10706 = vst [vmem:[#allocation4_spill] sm:$0xff] %v8270_v30  ;;  %v8272_v31 = vpop.f32.mrb[56].mxu1  ;;  %2111 = vrot.lane.b32.xlu1 %v2100_v16, %s7748_s19  ;;  %v8275_v32 = vpop.f32.mrb[57].mxu0  ;;  %v10741_v30 = vlaneseq }
 0x568   : > { %10707 = vst [vmem:[#allocation5_spill] sm:$0xff] %v8272_v31  ;;  %10708 = vst [vmem:[#allocation6_spill] sm:$0xff] %v8275_v32  ;;  %2242 = vrot.lane.b32.xlu0 %v2231_v26, %s7749_s20  ;;  %v2323_v33 = vpop.f32.mrb[58].mxu0  ;;  %v8278_v34 = vpop.f32.mrb[57].mxu1  ;;  %v7342_v32 = vld [vmem:[%s10528_s5 + $0x10] sm:$0xf] }
 0x569   : > { %10709 = vst [vmem:[#allocation7_spill] sm:$0xff] %v8278_v34  ;;  %v2324_v35 = vpop.f32.mrb[59].mxu0  ;;  %v2364_v36 = vpop.f32.mrb[58].mxu1  ;;  %v678_v34 = vld [vmem:[%s10528_s5] sm:$0xf] }
 0x56a   : > { %v2365_v37 = vpop.f32.mrb[59].mxu1 }
 0x56b   : > { %2238 = vrot.lane.b32.xlu1 %v2190_v24, %s7749_s20 }
 0x56e   : > { %v2410_v38 = vpop.f32.mrb[60].mxu0 }
 0x56f   : > { %v2451_v39 = vpop.f32.mrb[60].mxu1  ;;  %2458 = vrot.lane.b32.xlu1 %v2410_v38, %s7750_s21  ;;  %v2412_v40 = vpop.f32.mrb[61].mxu0 }
 0x570   : > { %v2453_v41 = vpop.f32.mrb[61].mxu1  ;;  %2460 = vrot.lane.b32.xlu0 %v2412_v40, %s7750_s21  ;;  %v2414_v42 = vpop.f32.mrb[62].mxu0 }
 0x571   : > { %v2455_v43 = vpop.f32.mrb[62].mxu1  ;;  %v8283_v44 = vpop.permute.xlu1 %663 }
 0x572   : > { %v2415_v45 = vpop.f32.mrb[63].mxu0  ;;  %v2456_v46 = vpop.f32.mrb[63].mxu1 }
 0x573   : > { %2462 = vrot.lane.b32.xlu1 %v2451_v39, %s7750_s21 }
 0x574   : > { %2464 = vrot.lane.b32.xlu0 %v2453_v41, %s7750_s21 }
 0x575   : > { %v8287_v47 = vpop.permute.xlu1 %667 }
 0x576   : > { %v2541_v48 = vpop.f32.mrb[64].mxu0 }
 0x577   : > { %v2543_v49 = vpop.f32.mrb[65].mxu0  ;;  %v2582_v50 = vpop.f32.mrb[64].mxu1 }
 0x578   : > { %v2584_v51 = vpop.f32.mrb[65].mxu1  ;;  %2589 = vrot.lane.b32.xlu0 %v2541_v48, %s10544_s22  ;;  %2591 = vrot.lane.b32.xlu1 %v2543_v49, %s10544_s22  ;;  %v2545_v52 = vpop.f32.mrb[66].mxu0 }
 0x579   : > { %v2586_v53 = vpop.f32.mrb[66].mxu1  ;;  %v8291_v54 = vpop.permute.xlu1 %665 }
 0x57a   : > { %v8293_v0 = vpop.permute.xlu0 %799  ;;  %v2546_v55 = vpop.f32.mrb[67].mxu0 }
 0x57b   : > { %v2587_v56 = vpop.f32.mrb[67].mxu1 }
 0x57c   : > { %2593 = vrot.lane.b32.xlu0 %v2582_v50, %s10544_s22  ;;  %2595 = vrot.lane.b32.xlu1 %v2584_v51, %s10544_s22 }
 0x57d   : > { %v8297_v57 = vpop.permute.xlu1 %669 }
 0x57e   : > { %v8299_v58 = vpop.permute.xlu0 %801  ;;  %v2672_v59 = vpop.f32.mrb[68].mxu0 }
 0x57f   : > { %v2674_v60 = vpop.f32.mrb[69].mxu0  ;;  %v2713_v61 = vpop.f32.mrb[68].mxu1 }
 0x580   : > { %v2715_v62 = vpop.f32.mrb[69].mxu1  ;;  %2720 = vrot.lane.b32.xlu1 %v2672_v59, %s10542_s23  ;;  %2722 = vrot.lane.b32.xlu0 %v2674_v60, %s10542_s23  ;;  %v2676_v63 = vpop.f32.mrb[70].mxu0 }
 0x581   : > { %v2717_v1 = vpop.f32.mrb[70].mxu1  ;;  %v8303_v2 = vpop.permute.xlu1 %795 }
 0x582   : > { %v2677_v5 = vpop.f32.mrb[71].mxu0  ;;  %v2718_v6 = vpop.f32.mrb[71].mxu1 }
 0x583   : > { %v8309_v8 = vpop.permute.xlu0 %928 }
 0x584   : > { %2724 = vrot.lane.b32.xlu1 %v2713_v61, %s10542_s23  ;;  %2726 = vrot.lane.b32.xlu0 %v2715_v62, %s10542_s23 }
 0x585   : > { %v8307_v7 = vpop.permute.xlu1 %797 }
 0x586   : > { %v2803_v9 = vpop.f32.mrb[72].mxu0 }
 0x587   : > { %v2805_v10 = vpop.f32.mrb[73].mxu0  ;;  %v2844_v11 = vpop.f32.mrb[72].mxu1 }
 0x588   : > { %v2846_v13 = vpop.f32.mrb[73].mxu1  ;;  %2851 = vrot.lane.b32.xlu1 %v2803_v9, %s10532_s27  ;;  %2853 = vrot.lane.b32.xlu0 %v2805_v10, %s10532_s27  ;;  %v2807_v14 = vpop.f32.mrb[74].mxu0 }
 0x589   : > { %v2848_v15 = vpop.f32.mrb[74].mxu1  ;;  %v8313_v16 = vpop.permute.xlu1 %926 }
 0x58a   : > { %v8315_v17 = vpop.permute.xlu0 %1061  ;;  %v2808_v18 = vpop.f32.mrb[75].mxu0 }
 0x58b   : > { %v2849_v20 = vpop.f32.mrb[75].mxu1 }
 0x58c   : > { %2855 = vrot.lane.b32.xlu1 %v2844_v11, %s10532_s27  ;;  %2857 = vrot.lane.b32.xlu0 %v2846_v13, %s10532_s27  ;;  %s290_s27 = scalar_lea.vmem %s10529_s6, %s7306_s28 }
 0x58d   : > { %v8319_v22 = vpop.permute.xlu1 %930 }
 0x58e   : > { %v8321_v23 = vpop.permute.xlu0 %1059  ;;  %v2934_v24 = vpop.f32.mrb[76].mxu0 }
 0x58f   : > { %v2936_v25 = vpop.f32.mrb[77].mxu0  ;;  %v2975_v26 = vpop.f32.mrb[76].mxu1 }
 0x590   : > { %v2977_v27 = vpop.f32.mrb[77].mxu1  ;;  %2982 = vrot.lane.b32.xlu0 %v2934_v24, %s7737_s8  ;;  %2984 = vrot.lane.b32.xlu1 %v2936_v25, %s7737_s8  ;;  %v2938_v28 = vpop.f32.mrb[78].mxu0 }
 0x591   : > { %v2979_v29 = vpop.f32.mrb[78].mxu1  ;;  %v8325_v33 = vpop.permute.xlu1 %932 }
 0x592   : > { %v8327_v35 = vpop.permute.xlu0 %1188  ;;  %v2939_v36 = vpop.f32.mrb[79].mxu0 }
 0x593   : > { %v2980_v37 = vpop.f32.mrb[79].mxu1 }
 0x594   : > { %2986 = vrot.lane.b32.xlu0 %v2975_v26, %s7737_s8  ;;  %2988 = vrot.lane.b32.xlu1 %v2977_v27, %s7737_s8 }
 0x595   : > { %v8331_v38 = vpop.permute.xlu1 %1057 }
 0x596   : > { %v8333_v39 = vpop.permute.xlu0 %1194  ;;  %v3064_v40 = vpop.f32.mrb[80].mxu0 }
 0x597   : > { %v3066_v41 = vpop.f32.mrb[81].mxu0  ;;  %v3105_v42 = vpop.f32.mrb[80].mxu1 }
 0x598   : > { %v3107_v43 = vpop.f32.mrb[81].mxu1  ;;  %3112 = vrot.lane.b32.xlu1 %v3064_v40, %s7738_s9  ;;  %3114 = vrot.lane.b32.xlu0 %v3066_v41, %s7738_s9  ;;  %v3068_v45 = vpop.f32.mrb[82].mxu0 }
 0x599   : > { %v3109_v46 = vpop.f32.mrb[82].mxu1  ;;  %v8337_v48 = vpop.permute.xlu1 %1063 }
 0x59a   : > { %v8339_v49 = vpop.permute.xlu0 %1319  ;;  %v3069_v50 = vpop.f32.mrb[83].mxu0 }
 0x59b   : > { %v3110_v51 = vpop.f32.mrb[83].mxu1 }
 0x59c   : > { %3116 = vrot.lane.b32.xlu1 %v3105_v42, %s7738_s9  ;;  %3118 = vrot.lane.b32.xlu0 %v3107_v43, %s7738_s9 }
 0x59d   : > { %v8343_v52 = vpop.permute.xlu1 %1192 }
 0x59e   : > { %v8345_v53 = vpop.permute.xlu0 %1323  ;;  %v3194_v55 = vpop.f32.mrb[84].mxu0 }
 0x59f   : > { %v3196_v56 = vpop.f32.mrb[85].mxu0  ;;  %v3235_v59 = vpop.f32.mrb[84].mxu1 }
 0x5a0   : > { %v3237_v60 = vpop.f32.mrb[85].mxu1  ;;  %3242 = vrot.lane.b32.xlu1 %v3194_v55, %s7739_s10  ;;  %3244 = vrot.lane.b32.xlu0 %v3196_v56, %s7739_s10  ;;  %v3198_v61 = vpop.f32.mrb[86].mxu0 }
 0x5a1   : > { %v3239_v62 = vpop.f32.mrb[86].mxu1  ;;  %v8349_v63 = vpop.permute.xlu1 %1190 }
 0x5a2   : > { %v8351_v1 = vpop.permute.xlu0 %1325  ;;  %v3199_v5 = vpop.f32.mrb[87].mxu0 }
 0x5a3   : > { %v3240_v6 = vpop.f32.mrb[87].mxu1 }
 0x5a4   : > { %3246 = vrot.lane.b32.xlu1 %v3235_v59, %s7739_s10  ;;  %3248 = vrot.lane.b32.xlu0 %v3237_v60, %s7739_s10 }
 0x5a5   : > { %v8355_v9 = vpop.permute.xlu1 %1321 }
 0x5a6   : > { %v8357_v10 = vpop.permute.xlu0 %1452  ;;  %v3324_v11 = vpop.f32.mrb[88].mxu0 }
 0x5a7   : > { %v3326_v13 = vpop.f32.mrb[89].mxu0  ;;  %v3365_v14 = vpop.f32.mrb[88].mxu1 }
 0x5a8   : > { %v3367_v15 = vpop.f32.mrb[89].mxu1  ;;  %3372 = vrot.lane.b32.xlu0 %v3324_v11, %s7740_s11  ;;  %3374 = vrot.lane.b32.xlu1 %v3326_v13, %s7740_s11  ;;  %v3328_v18 = vpop.f32.mrb[90].mxu0 }
 0x5a9   : > { %v3369_v20 = vpop.f32.mrb[90].mxu1  ;;  %v8361_v24 = vpop.permute.xlu1 %1450 }
 0x5aa   : > { %10710 = vst [vmem:[#allocation8_spill] sm:$0xff] %v8361_v24  ;;  %v8363_v25 = vpop.permute.xlu0 %1581  ;;  %v3329_v26 = vpop.f32.mrb[91].mxu0 }
 0x5ab   : > { %10711 = vst [vmem:[#allocation9_spill] sm:$0xff] %v8363_v25  ;;  %v3370_v27 = vpop.f32.mrb[91].mxu1 }
 0x5ac   : > { %3376 = vrot.lane.b32.xlu0 %v3365_v14, %s7740_s11  ;;  %3378 = vrot.lane.b32.xlu1 %v3367_v15, %s7740_s11 }
 0x5ad   : > { %v8367_v28 = vpop.permute.xlu1 %1454 }
 0x5ae   : > { %10712 = vst [vmem:[#allocation10_spill] sm:$0xff] %v8367_v28  ;;  %v8369_v29 = vpop.permute.xlu0 %1585  ;;  %v3454_v36 = vpop.f32.mrb[92].mxu0 }
 0x5af   : > { %10713 = vst [vmem:[#allocation11_spill] sm:$0xff] %v8369_v29  ;;  %v3456_v37 = vpop.f32.mrb[93].mxu0  ;;  %v3495_v40 = vpop.f32.mrb[92].mxu1 }
 0x5b0   : > { %v3497_v41 = vpop.f32.mrb[93].mxu1  ;;  %3502 = vrot.lane.b32.xlu1 %v3454_v36, %s7741_s12  ;;  %3504 = vrot.lane.b32.xlu0 %v3456_v37, %s7741_s12  ;;  %v3458_v42 = vpop.f32.mrb[94].mxu0 }
 0x5b1   : > { %v3499_v43 = vpop.f32.mrb[94].mxu1  ;;  %v8373_v45 = vpop.permute.xlu1 %1456 }
 0x5b2   : > { %10714 = vst [vmem:[#allocation12_spill] sm:$0xff] %v8373_v45  ;;  %v8375_v46 = vpop.permute.xlu0 %1587  ;;  %v3459_v50 = vpop.f32.mrb[95].mxu0 }
 0x5b3   : > { %10715 = vst [vmem:[#allocation13_spill] sm:$0xff] %v8375_v46  ;;  %v3500_v51 = vpop.f32.mrb[95].mxu1 }
 0x5b4   : > { %3506 = vrot.lane.b32.xlu1 %v3495_v40, %s7741_s12  ;;  %3508 = vrot.lane.b32.xlu0 %v3497_v41, %s7741_s12 }
 0x5b5   : > { %v8379_v55 = vpop.permute.xlu1 %1583 }
 0x5b6   : > { %10716 = vst [vmem:[#allocation14_spill] sm:$0xff] %v8379_v55  ;;  %v8381_v56 = vpop.permute.xlu0 %1716  ;;  %v3584_v59 = vpop.f32.mrb[96].mxu0 }
 0x5b7   : > { %10717 = vst [vmem:[#allocation15_spill] sm:$0xff] %v8381_v56  ;;  %v3586_v60 = vpop.f32.mrb[97].mxu0  ;;  %v3625_v61 = vpop.f32.mrb[96].mxu1 }
 0x5b8   : > { %v3627_v62 = vpop.f32.mrb[97].mxu1  ;;  %3632 = vrot.lane.b32.xlu1 %v3584_v59, %s7742_s13  ;;  %3634 = vrot.lane.b32.xlu0 %v3586_v60, %s7742_s13  ;;  %v3588_v5 = vpop.f32.mrb[98].mxu0 }
 0x5b9   : > { %v3629_v6 = vpop.f32.mrb[98].mxu1  ;;  %v8385_v11 = vpop.permute.xlu1 %1712 }
 0x5ba   : > { %10718 = vst [vmem:[#allocation16_spill] sm:$0xff] %v8385_v11  ;;  %v8387_v13 = vpop.permute.xlu0 %1714  ;;  %v3589_v14 = vpop.f32.mrb[99].mxu0 }
 0x5bb   : > { %10719 = vst [vmem:[#allocation17_spill] sm:$0xff] %v8387_v13  ;;  %v3630_v15 = vpop.f32.mrb[99].mxu1 }
 0x5bc   : > { %3636 = vrot.lane.b32.xlu1 %v3625_v61, %s7742_s13  ;;  %3638 = vrot.lane.b32.xlu0 %v3627_v62, %s7742_s13 }
 0x5bd   : > { %v8391_v18 = vpop.permute.xlu1 %1718 }
 0x5be   : > { %10720 = vst [vmem:[#allocation18_spill] sm:$0xff] %v8391_v18  ;;  %v8393_v20 = vpop.permute.xlu0 %1843  ;;  %v3714_v26 = vpop.f32.mrb[100].mxu0 }
 0x5bf   : > { %10721 = vst [vmem:[#allocation19_spill] sm:$0xff] %v8393_v20  ;;  %v3716_v27 = vpop.f32.mrb[101].mxu0  ;;  %v3755_v36 = vpop.f32.mrb[100].mxu1 }
 0x5c0   : > { %v3757_v37 = vpop.f32.mrb[101].mxu1  ;;  %3762 = vrot.lane.b32.xlu0 %v3714_v26, %s7743_s14  ;;  %3764 = vrot.lane.b32.xlu1 %v3716_v27, %s7743_s14  ;;  %v3718_v40 = vpop.f32.mrb[102].mxu0 }
 0x5c1   : > { %v3759_v41 = vpop.f32.mrb[102].mxu1  ;;  %v8397_v42 = vpop.permute.xlu1 %1847 }
 0x5c2   : > { %10722 = vst [vmem:[#allocation20_spill] sm:$0xff] %v8397_v42  ;;  %v8399_v43 = vpop.permute.xlu0 %1849  ;;  %v3719_v50 = vpop.f32.mrb[103].mxu0  ;;  %v7354_v42 = vld [vmem:[%s10528_s5 + $0x18] sm:$0xf] }
 0x5c3   : > { %10723 = vst [vmem:[#allocation21_spill] sm:$0xff] %v8399_v43  ;;  %v3760_v51 = vpop.f32.mrb[103].mxu1 }
 0x5c4   : > { %3766 = vrot.lane.b32.xlu0 %v3755_v36, %s7743_s14  ;;  %3768 = vrot.lane.b32.xlu1 %v3757_v37, %s7743_s14 }
 0x5c5   : > { %v8403_v59 = vpop.permute.xlu1 %1845 }
 0x5c6   : > { %10724 = vst [vmem:[#allocation22_spill] sm:$0xff] %v8403_v59  ;;  %v8405_v60 = vpop.permute.xlu0 %1978  ;;  %v3844_v61 = vpop.f32.mrb[104].mxu0  ;;  %v7348_v59 = vld [vmem:[%s10528_s5 + $0x14] sm:$0xf] }
 0x5c7   : > { %10725 = vst [vmem:[#allocation23_spill] sm:$0xff] %v8405_v60  ;;  %v3846_v62 = vpop.f32.mrb[105].mxu0  ;;  %v3885_v5 = vpop.f32.mrb[104].mxu1 }
 0x5c8   : > { %v3887_v6 = vpop.f32.mrb[105].mxu1  ;;  %3892 = vrot.lane.b32.xlu1 %v3844_v61, %s7744_s15  ;;  %3894 = vrot.lane.b32.xlu0 %v3846_v62, %s7744_s15  ;;  %v3848_v14 = vpop.f32.mrb[106].mxu0 }
 0x5c9   : > { %v3889_v15 = vpop.f32.mrb[106].mxu1  ;;  %v8409_v26 = vpop.permute.xlu1 %1974 }
 0x5ca   : > { %10726 = vst [vmem:[#allocation24_spill] sm:$0xff] %v8409_v26  ;;  %v8411_v27 = vpop.permute.xlu0 %1976  ;;  %v3849_v36 = vpop.f32.mrb[107].mxu0  ;;  %v4073_v15 = vld [vmem:[%s290_s27] sm:$0xf] }
 0x5cb   : > { %10727 = vst [vmem:[#allocation25_spill] sm:$0xff] %v8411_v27  ;;  %v3890_v37 = vpop.f32.mrb[107].mxu1 }
 0x5cc   : > { %3896 = vrot.lane.b32.xlu1 %v3885_v5, %s7744_s15  ;;  %3898 = vrot.lane.b32.xlu0 %v3887_v6, %s7744_s15 }
 0x5cd   : > { %v8416_v40 = vpop.permute.xlu1 %1980 }
 0x5ce   : > { %10728 = vst [vmem:[#allocation26_spill] sm:$0xff] %v8416_v40  ;;  %v8418_v41 = vpop.permute.xlu0 %2107  ;;  %v3974_v50 = vpop.f32.mrb[108].mxu0 }
 0x5cf   : > { %10729 = vst [vmem:[#allocation27_spill] sm:$0xff] %v8418_v41  ;;  %v3976_v51 = vpop.f32.mrb[109].mxu0  ;;  %v4015_v61 = vpop.f32.mrb[108].mxu1 }
 0x5d0   : > { %4022 = vrot.lane.b32.xlu1 %v3974_v50, %s7745_s16  ;;  %4024 = vrot.lane.b32.xlu0 %v3976_v51, %s7745_s16  ;;  %v3978_v62 = vpop.f32.mrb[110].mxu0  ;;  %v4017_v14 = vpop.f32.mrb[109].mxu1 }
 0x5d1   : > { %v8425_v5 = vpop.permute.xlu1 %2105  ;;  %v3979_v6 = vpop.f32.mrb[111].mxu0 }
 0x5d2   : > { %10730 = vst [vmem:[#allocation28_spill] sm:$0xff] %v8425_v5  ;;  %v8427_v36 = vpop.permute.xlu0 %2236  ;;  %v4019_v37 = vpop.f32.mrb[110].mxu1 }
 0x5d3   : > { %10731 = vst [vmem:[#allocation29_spill] sm:$0xff] %v8427_v36  ;;  %v4020_v12 = vpop.f32.mrb[111].mxu1  ;;  %v8457_v37 = vsub.s32 3, %v7842_v21 }
 0x5d4   : > { %4026 = vrot.lane.b32.xlu1 %v4015_v61, %s7745_s16  ;;  %4076 = vperm.xlu0 %7681, %v4073_v15   ;;  %v8446_v12 = vsub.s32 1, %v7842_v21  ;;  %v8449_v61 = vsub.s32 2, %v7842_v21 }
 0x5d5   : > { %v8430_v19 = vpop.permute.xlu1 %2109  ;;  %v8542_v60 = vrot.slane %v7342_v32, %v8457_v37  ;;  %v8557_v13 = vrot.slane %v7348_v59, %v8457_v37  ;;  %v8586_v28 = vrot.slane %v7354_v42, %v8457_v37 }
 0x5d6   : > { %10732 = vst [vmem:[#allocation30_spill] sm:$0xff] %v8430_v19  ;;  %v8432_v4 = vpop.permute.xlu0 %2240  ;;  %v8477_v36 = vrot.slane %v678_v34, %v8449_v61  ;;  %v8548_v18 = vrot.slane %v7342_v32, %v8446_v12  ;;  %v8551_v56 = vrot.slane %v7342_v32, %v8449_v61  ;;  %v8568_v29 = vrot.slane %v7348_v59, %v8446_v12 }
 0x5d7   : > { %10733 = vst [vmem:[#allocation31_spill] sm:$0xff] %v8432_v4  ;;  %10761 = vst [vmem:[#allocation58_spill] sm:$0xff] %v8542_v60  ;;  %v8574_v46 = vrot.slane %v7354_v42, %v8446_v12  ;;  %v8577_v45 = vrot.slane %v7354_v42, %v8449_v61 }
 0x5d8   : > { %4028 = vrot.lane.b32.xlu1 %v4017_v14, %s7745_s16  ;;  %v8454_v14 = vsub.s32 0, %v7842_v21  ;;  %v8474_v21 = vrot.slane %v678_v34, %v8446_v12  ;;  %10743 = vst [vmem:[#allocation40_spill] sm:$0xff] %v8477_v36  ;;  %10762 = vst [vmem:[#allocation59_spill] sm:$0xff] %v8548_v18 }
 0x5d9   : > { %v8435_v50 = vpop.permute.xlu1 %2111  ;;  %10763 = vst [vmem:[#allocation60_spill] sm:$0xff] %v8551_v56  ;;  %10765 = vst [vmem:[#allocation62_spill] sm:$0xff] %v8557_v13 }
 0x5da   : > { %10734 = vst [vmem:[#allocation32_spill] sm:$0xff] %v8435_v50  ;;  %v8439_v62 = vpop.permute.xlu0 %2242  ;;  %10742 = vst [vmem:[#allocation39_spill] sm:$0xff] %v8474_v21  ;;  %v8533_v43 = vrot.slane %v7342_v32, %v8454_v14  ;;  %v8554_v11 = vrot.slane %v7348_v59, %v8454_v14  ;;  %v8571_v32 = vrot.slane %v7348_v59, %v8449_v61 }
 0x5db   : > { %10736 = vst [vmem:[#allocation34_spill] sm:$0xff] %v8439_v62  ;;  %v8489_v62 = vrot.slane %v678_v34, %v8457_v37  ;;  %10768 = vst [vmem:[#allocation65_spill] sm:$0xff] %v8568_v29 }
 0x5dc   : > { %10758 = vst [vmem:[#allocation55_spill] sm:$0xff] %v8533_v43  ;;  %10764 = vst [vmem:[#allocation61_spill] sm:$0xff] %v8554_v11 }
 0x5dd   : > { %v8437_v51 = vpop.permute.xlu1 %2238  ;;  %10746 = vst [vmem:[#allocation43_spill] sm:$0xff] %v8489_v62  ;;  %10769 = vst [vmem:[#allocation66_spill] sm:$0xff] %v8571_v32 }
 0x5de   : > { %10735 = vst [vmem:[#allocation33_spill] sm:$0xff] %v8437_v51  ;;  %v8468_v51 = vand.u32 127, %v10741_v30  ;;  %v8486_v30 = vrot.slane %v678_v34, %v8454_v14  ;;  %10770 = vst [vmem:[#allocation67_spill] sm:$0xff] %v8574_v46 }
 0x5df   : > { %10771 = vst [vmem:[#allocation68_spill] sm:$0xff] %v8577_v45  ;;  %10773 = vst [vmem:[#allocation70_spill] sm:$0xff] %v8586_v28  ;;  %v7378_v45 = vld [vmem:[%s10528_s5 + $0x28] sm:$0xf] }
 0x5e0   : > { %10745 = vst [vmem:[#allocation42_spill] sm:$0xff] %v8486_v30  ;;  %vm673_vm4 = vcmp.lt.s32.totalorder %v8468_v51, 73  ;;  %vm803_vm5 = vcmp.lt.s32.totalorder %v8468_v51, 72  ;;  %vm1065_vm6 = vcmp.lt.s32.totalorder %v8468_v51, 65  ;;  %vm934_vm7 = vcmp.lt.s32.totalorder %v8468_v51, 71 }
 0x5e1   : > { %v8441_v6 = vpop.permute.xlu1 %2458  ;;  %vm1196_vm8 = vcmp.lt.s32.totalorder %v8468_v51, 64  ;;  %vm1327_vm9 = vcmp.lt.s32.totalorder %v8468_v51, 63  ;;  %vm1458_vm10 = vcmp.lt.s32.totalorder %v8468_v51, 57  ;;  %vm1589_vm11 = vcmp.lt.s32.totalorder %v8468_v51, 56 }
 0x5e2   : > { %10737 = vst [vmem:[#allocation35_spill] sm:$0xff] %v8441_v6  ;;  %v8443_v3 = vpop.permute.xlu0 %2460  ;;  %vm1720_vm12 = vcmp.lt.s32.totalorder %v8468_v51, 55  ;;  %vm10679_vm13 = vcmp.lt.s32.totalorder %v8468_v51, 8  ;;  %vm10678_vm14 = vcmp.lt.s32.totalorder %v8468_v51, 9  ;;  %vm10680_vm15 = vcmp.lt.s32.totalorder %v8468_v51, 7 }
 0x5e3   : > { %10738 = vst [vmem:[#allocation36_spill] sm:$0xff] %v8443_v3  ;;  %v7324_v3 = vld [vmem:[%s10528_s5 + $0x4] sm:$0xf]  ;;  %vm2244_vm1 = vcmp.lt.s32.totalorder %v8468_v51, 1  ;;  %vm10703_vm3 = vcmp.lt.s32.totalorder %v8468_v51, 127 }
 0x5e4   : > { %v8483_v4 = vrot.slane %v7324_v3, %v8457_v37  ;;  %v8492_v31 = vrot.slane %v7324_v3, %v8454_v14  ;;  %v8502_v5 = vrot.slane %v7324_v3, %v8446_v12  ;;  %v8505_v41 = vrot.slane %v7324_v3, %v8449_v61 }
 0x5e5   : > { %v8451_v15 = vpop.permute.xlu1 %2462 }
 0x5e6   : > { %10739 = vst [vmem:[#allocation37_spill] sm:$0xff] %v8451_v15  ;;  %v8462_v6 = vpop.permute.xlu0 %2464  ;;  %v7330_v15 = vld [vmem:[%s10528_s5 + $0x8] sm:$0xf]  ;;  %10744 = vst [vmem:[#allocation41_spill] sm:$0xff] %v8483_v4 }
 0x5e7   : > { %10740 = vst [vmem:[#allocation38_spill] sm:$0xff] %v8462_v6  ;;  %v7336_v6 = vld [vmem:[%s10528_s5 + $0xc] sm:$0xf]  ;;  %10747 = vst [vmem:[#allocation44_spill] sm:$0xff] %v8492_v31  ;;  %v8508_v34 = vrot.slane %v7330_v15, %v8446_v12  ;;  %v8511_v40 = vrot.slane %v7330_v15, %v8449_v61  ;;  %v8524_v3 = vrot.slane %v7330_v15, %v8457_v37 }
 0x5e8   : > { %10750 = vst [vmem:[#allocation47_spill] sm:$0xff] %v8502_v5  ;;  %10751 = vst [vmem:[#allocation48_spill] sm:$0xff] %v8505_v41  ;;  %v8527_v20 = vrot.slane %v7336_v6, %v8446_v12  ;;  %v8536_v26 = vrot.slane %v7336_v6, %v8454_v14  ;;  %v8539_v27 = vrot.slane %v7336_v6, %v8457_v37 }
 0x5e9   : > { %10752 = vst [vmem:[#allocation49_spill] sm:$0xff] %v8508_v34  ;;  %10753 = vst [vmem:[#allocation50_spill] sm:$0xff] %v8511_v40 }
 0x5ea   : > { %v8497_v50 = vpop.permute.xlu0 %2589  ;;  %v8499_v19 = vpop.permute.xlu1 %2591  ;;  %10756 = vst [vmem:[#allocation53_spill] sm:$0xff] %v8524_v3  ;;  %10757 = vst [vmem:[#allocation54_spill] sm:$0xff] %v8527_v20 }
 0x5eb   : > { %10748 = vst [vmem:[#allocation45_spill] sm:$0xff] %v8497_v50  ;;  %10749 = vst [vmem:[#allocation46_spill] sm:$0xff] %v8499_v19  ;;  %v8518_v50 = vrot.slane %v7336_v6, %v8449_v61  ;;  %v8521_v19 = vrot.slane %v7330_v15, %v8454_v14  ;;  %v7360_v15 = vld [vmem:[%s10528_s5 + $0x1c] sm:$0xf]  ;;  %v7366_v6 = vld [vmem:[%s10528_s5 + $0x20] sm:$0xf] }
 0x5ec   : > { %10759 = vst [vmem:[#allocation56_spill] sm:$0xff] %v8536_v26  ;;  %10760 = vst [vmem:[#allocation57_spill] sm:$0xff] %v8539_v27  ;;  %v8589_v29 = vrot.slane %v7360_v15, %v8454_v14  ;;  %v8592_v59 = vrot.slane %v7360_v15, %v8457_v37  ;;  %v8599_v46 = vrot.slane %v7360_v15, %v8446_v12 }
 0x5ed   : > { %10754 = vst [vmem:[#allocation51_spill] sm:$0xff] %v8518_v50  ;;  %10755 = vst [vmem:[#allocation52_spill] sm:$0xff] %v8521_v19  ;;  %v8615_v28 = vrot.slane %v7366_v6, %v8454_v14 }
 0x5ee   : > { %v8562_v55 = vpop.permute.xlu0 %2593  ;;  %v8564_v25 = vpop.permute.xlu1 %2595  ;;  %10774 = vst [vmem:[#allocation71_spill] sm:$0xff] %v8589_v29  ;;  %10775 = vst [vmem:[#allocation72_spill] sm:$0xff] %v8592_v59  ;;  %v8608_v29 = vrot.slane %v7366_v6, %v8449_v61  ;;  %v7384_v59 = vld [vmem:[%s10528_s5 + $0x2c] sm:$0xf] }
 0x5ef   : > { %10766 = vst [vmem:[#allocation63_spill] sm:$0xff] %v8562_v55  ;;  %10767 = vst [vmem:[#allocation64_spill] sm:$0xff] %v8564_v25  ;;  %v7372_v55 = vld [vmem:[%s10528_s5 + $0x24] sm:$0xf]  ;;  %v8583_v25 = vrot.slane %v7354_v42, %v8454_v14  ;;  %v8605_v42 = vrot.slane %v7366_v6, %v8446_v12 }
 0x5f0   : > { %10776 = vst [vmem:[#allocation73_spill] sm:$0xff] %v8599_v46  ;;  %10779 = vst [vmem:[#allocation76_spill] sm:$0xff] %v8608_v29  ;;  %v8618_v46 = vrot.slane %v7366_v6, %v8457_v37  ;;  %v7390_v29 = vld [vmem:[%s10528_s5 + $0x30] sm:$0xf]  ;;  %v8634_v24 = vrot.slane %v7372_v55, %v8446_v12  ;;  %v8637_v6 = vrot.slane %v7372_v55, %v8449_v61 }
 0x5f1   : > { %10772 = vst [vmem:[#allocation69_spill] sm:$0xff] %v8583_v25  ;;  %v8602_v25 = vrot.slane %v7360_v15, %v8449_v61  ;;  %10778 = vst [vmem:[#allocation75_spill] sm:$0xff] %v8605_v42  ;;  %v8621_v15 = vrot.slane %v7372_v55, %v8454_v14  ;;  %v8624_v42 = vrot.slane %v7372_v55, %v8457_v37 }
 0x5f2   : > { %10780 = vst [vmem:[#allocation77_spill] sm:$0xff] %v8615_v28  ;;  %10781 = vst [vmem:[#allocation78_spill] sm:$0xff] %v8618_v46  ;;  %v8631_v32 = vpop.permute.xlu0 %2722  ;;  %v8640_v46 = vrot.slane %v7378_v45, %v8446_v12  ;;  %v8658_v55 = vrot.slane %v7384_v59, %v8449_v61 }
 0x5f3   : > { %10777 = vst [vmem:[#allocation74_spill] sm:$0xff] %v8602_v25  ;;  %10782 = vst [vmem:[#allocation79_spill] sm:$0xff] %v8621_v15  ;;  %v8629_v25 = vpop.permute.xlu1 %2720  ;;  %v8643_v15 = vrot.slane %v7378_v45, %v8449_v61 }
 0x5f4   : > { %10783 = vst [vmem:[#allocation80_spill] sm:$0xff] %v8624_v42  ;;  %10784 = vst [vmem:[#allocation81_spill] sm:$0xff] %v8629_v25  ;;  %v7401_v42 = vld [vmem:[%s10528_s5 + $0x38] sm:$0xf]  ;;  %v8649_v25 = vrot.slane %v7378_v45, %v8454_v14 }
 0x5f5   : > { %10785 = vst [vmem:[#allocation82_spill] sm:$0xff] %v8631_v32  ;;  %10786 = vst [vmem:[#allocation83_spill] sm:$0xff] %v8634_v24  ;;  %v8652_v32 = vrot.slane %v7378_v45, %v8457_v37  ;;  %v8655_v24 = vrot.slane %v7384_v59, %v8446_v12  ;;  %v8673_v45 = vrot.slane %v7390_v29, %v8457_v37 }
 0x5f6   : > { %10787 = vst [vmem:[#allocation84_spill] sm:$0xff] %v8637_v6  ;;  %10788 = vst [vmem:[#allocation85_spill] sm:$0xff] %v8640_v46  ;;  %v7407_v6 = vld [vmem:[%s10528_s5 + $0x3c] sm:$0xf]  ;;  %v8667_v46 = vrot.slane %v7384_v59, %v8457_v37 }
 0x5f7   : > { %10789 = vst [vmem:[#allocation86_spill] sm:$0xff] %v8643_v15  ;;  %10790 = vst [vmem:[#allocation87_spill] sm:$0xff] %v8649_v25  ;;  %v8664_v15 = vrot.slane %v7384_v59, %v8454_v14  ;;  %v8670_v25 = vrot.slane %v7390_v29, %v8454_v14  ;;  %v8686_v59 = vrot.slane %v7401_v42, %v8446_v12 }
 0x5f8   : > { %10791 = vst [vmem:[#allocation88_spill] sm:$0xff] %v8652_v32  ;;  %10792 = vst [vmem:[#allocation89_spill] sm:$0xff] %v8655_v24  ;;  %v8680_v24 = vrot.slane %v7390_v29, %v8449_v61  ;;  %v8683_v32 = vrot.slane %v7401_v42, %v8454_v14 }
 0x5f9   : > { %10793 = vst [vmem:[#allocation90_spill] sm:$0xff] %v8658_v55  ;;  %10794 = vst [vmem:[#allocation91_spill] sm:$0xff] %v8664_v15  ;;  %v8677_v55 = vrot.slane %v7390_v29, %v8446_v12  ;;  %v676_v29 = vsel %vm673_vm4, %v8283_v44, %v8291_v54  ;;  %v8719_v15 = vrot.slane %v7407_v6, %v8457_v37 }
 0x5fa   : > { %10795 = vst [vmem:[#allocation92_spill] sm:$0xff] %v8667_v46  ;;  %10796 = vst [vmem:[#allocation93_spill] sm:$0xff] %v8670_v25  ;;  %v7413_v25 = vld [vmem:[%s10528_s5 + $0x40] sm:$0xf]  ;;  %v8691_v46 = vpop.permute.xlu1 %2724 }
 0x5fb   : > { %10797 = vst [vmem:[#allocation94_spill] sm:$0xff] %v8673_v45  ;;  %10798 = vst [vmem:[#allocation95_spill] sm:$0xff] %v8677_v55  ;;  %v8693_v45 = vpop.permute.xlu0 %2726  ;;  %v8716_v55 = vrot.slane %v7407_v6, %v8449_v61 }
 0x5fc   : > { %10799 = vst [vmem:[#allocation96_spill] sm:$0xff] %v8680_v24  ;;  %10800 = vst [vmem:[#allocation97_spill] sm:$0xff] %v8683_v32  ;;  %v8700_v24 = vrot.slane %v7401_v42, %v8449_v61  ;;  %v8703_v32 = vrot.slane %v7401_v42, %v8457_v37  ;;  %v7419_v42 = vld [vmem:[%s10528_s5 + $0x44] sm:$0xf] }
 0x5fd   : > { %10801 = vst [vmem:[#allocation98_spill] sm:$0xff] %v8686_v59  ;;  %10802 = vst [vmem:[#allocation99_spill] sm:$0xff] %v8691_v46  ;;  %v8706_v59 = vrot.slane %v7407_v6, %v8454_v14  ;;  %v675_v46 = vsel %vm673_vm4, %v8291_v54, %v8287_v47  ;;  %v8729_v54 = vrot.slane %v7413_v25, %v8454_v14 }
 0x5fe   : > { %10803 = vst [vmem:[#allocation100_spill] sm:$0xff] %v8693_v45  ;;  %10804 = vst [vmem:[#allocation101_spill] sm:$0xff] %v8700_v24  ;;  %v8713_v45 = vrot.slane %v7407_v6, %v8446_v12  ;;  %v8738_v6 = vmul.f32 %v8474_v21, %v676_v29  ;;  %v702_v29 = vmul.f32 %v8477_v36, %v675_v46 }
 0x5ff   : > { %10805 = vst [vmem:[#allocation102_spill] sm:$0xff] %v8703_v32  ;;  %10806 = vst [vmem:[#allocation103_spill] sm:$0xff] %v8706_v59  ;;  %v677_v59 = vsel %vm673_vm4, %v8297_v57, %v8283_v44  ;;  %v674_v44 = vsel %vm673_vm4, %v8287_v47, %v8297_v57  ;;  %v8753_v32 = vpop.permute.xlu0 %2853  ;;  %v807_v21 = vsel %vm803_vm5, %v8299_v58, %v8303_v2  ;;  %v7425_v57 = vld [vmem:[%s10528_s5 + $0x48] sm:$0xf] }
 0x600   : > { %10807 = vst [vmem:[#allocation104_spill] sm:$0xff] %v8713_v45  ;;  %10808 = vst [vmem:[#allocation105_spill] sm:$0xff] %v8716_v55  ;;  %v8732_v45 = vrot.slane %v7413_v25, %v8446_v12  ;;  %v8735_v55 = vrot.slane %v7413_v25, %v8449_v61  ;;  %v8765_v47 = vrot.slane %v7419_v42, %v8446_v12 }
 0x601   : > { %10809 = vst [vmem:[#allocation106_spill] sm:$0xff] %v8719_v15  ;;  %10810 = vst [vmem:[#allocation107_spill] sm:$0xff] %v8729_v54  ;;  %v804_v15 = vsel %vm803_vm5, %v8293_v0, %v8299_v58  ;;  %v8749_v54 = vrot.slane %v7413_v25, %v8457_v37  ;;  %v8771_v25 = vmul.f32 %v8486_v30, %v677_v59 }
 0x602   : > { %10811 = vst [vmem:[#allocation108_spill] sm:$0xff] %v8732_v45  ;;  %10812 = vst [vmem:[#allocation109_spill] sm:$0xff] %v8735_v55  ;;  %v8751_v45 = vpop.permute.xlu1 %2851  ;;  %v8762_v55 = vrot.slane %v7419_v42, %v8454_v14  ;;  %v805_v58 = vsel %vm803_vm5, %v8307_v7, %v8293_v0  ;;  %v806_v46 = vsel %vm803_vm5, %v8303_v2, %v8307_v7 }
 0x603   : > { %10813 = vst [vmem:[#allocation110_spill] sm:$0xff] %v8749_v54  ;;  %10815 = vst [vmem:[#allocation112_spill] sm:$0xff] %v8765_v47  ;;  %v1067_v36 = vsel %vm1065_vm6, %v8321_v23, %v8315_v17  ;;  %v8786_v47 = vmul.f32 %v8483_v4, %v804_v15  ;;  %v703_v59 = vmul.f32 %v8489_v62, %v674_v44  ;;  %v8802_v54 = vpop.permute.xlu0 %2857  ;;  %v7431_v62 = vld [vmem:[%s10528_s5 + $0x4c] sm:$0xf] }
 0x604   : > { %10814 = vst [vmem:[#allocation111_spill] sm:$0xff] %v8762_v55  ;;  %v937_v0 = vsel %vm934_vm7, %v8313_v16, %v8309_v8  ;;  %v8794_v30 = vrot.slane %v7419_v42, %v8449_v61  ;;  %v831_v2 = vmul.f32 %v8492_v31, %v807_v21  ;;  %v8800_v55 = vrot.slane %v7419_v42, %v8457_v37 }
 0x605   : > { %v8805_v15 = vrot.slane %v7425_v57, %v8454_v14  ;;  %v8808_v44 = vrot.slane %v7425_v57, %v8446_v12  ;;  %v8814_v4 = vmul.f32 %v8502_v5, %v806_v46  ;;  %v8817_v21 = vmul.f32 %v8505_v41, %v805_v58 }
 0x606   : > { %10816 = vst [vmem:[#allocation113_spill] sm:$0xff] %v8794_v30  ;;  %v8797_v7 = vpop.permute.xlu1 %2855  ;;  %10817 = vst [vmem:[#allocation114_spill] sm:$0xff] %v8800_v55  ;;  %v936_v42 = vsel %vm934_vm7, %v8309_v8, %v8319_v22  ;;  %v1095_v31 = vmul.f32 %v8518_v50, %v1067_v36  ;;  %v8833_v58 = vrot.slane %v7425_v57, %v8449_v61 }
 0x607   : > { %10818 = vst [vmem:[#allocation115_spill] sm:$0xff] %v8805_v15  ;;  %10819 = vst [vmem:[#allocation116_spill] sm:$0xff] %v8808_v44  ;;  %v8825_v15 = vmul.f32 %v8508_v34, %v937_v0  ;;  %v1068_v44 = vsel %vm1065_vm6, %v8331_v38, %v8321_v23  ;;  %v8836_v46 = vrot.slane %v7425_v57, %v8457_v37 }
 0x608   : > { %10820 = vst [vmem:[#allocation117_spill] sm:$0xff] %v8833_v58  ;;  %v935_v8 = vsel %vm934_vm7, %v8319_v22, %v8325_v33  ;;  %v938_v36 = vsel %vm934_vm7, %v8325_v33, %v8313_v16  ;;  %v1200_v23 = vsel %vm1196_vm8, %v8333_v39, %v8327_v35  ;;  %v8851_v0 = vrot.slane %v7431_v62, %v8454_v14  ;;  %v8864_v33 = vpop.permute.xlu0 %2982 }
 0x609   : > { %10821 = vst [vmem:[#allocation118_spill] sm:$0xff] %v8836_v46  ;;  %v8854_v57 = vmul.f32 %v8511_v40, %v936_v42  ;;  %v1066_v22 = vsel %vm1065_vm6, %v8315_v17, %v8337_v48  ;;  %v1069_v16 = vsel %vm1065_vm6, %v8337_v48, %v8331_v38  ;;  %v8869_v5 = vrot.slane %v7431_v62, %v8446_v12  ;;  %v7437_v38 = vld [vmem:[%s10528_s5 + $0x50] sm:$0xf] }
 0x60a   : > { %10822 = vst [vmem:[#allocation119_spill] sm:$0xff] %v8851_v0  ;;  %v8866_v41 = vpop.permute.xlu1 %2984  ;;  %v8871_v50 = vadd.f32 %v1095_v31, %v702_v29  ;;  %v1094_v42 = vmul.f32 %v8527_v20, %v1068_v44  ;;  %v8876_v17 = vrot.slane %v7431_v62, %v8449_v61  ;;  %v8879_v40 = vrot.slane %v7431_v62, %v8457_v37 }
 0x60b   : > { %10823 = vst [vmem:[#allocation120_spill] sm:$0xff] %v8869_v5  ;;  %v962_v48 = vmul.f32 %v8521_v19, %v938_v36  ;;  %v965_v34 = vmul.f32 %v8524_v3, %v935_v8  ;;  %v1224_v31 = vmul.f32 %v8533_v43, %v1200_v23  ;;  %v1197_v29 = vsel %vm1196_vm8, %v8343_v52, %v8333_v39  ;;  %v7443_v36 = vld [vmem:[%s10528_s5 + $0x54] sm:$0xf] }
 0x60c   : > { %10824 = vst [vmem:[#allocation121_spill] sm:$0xff] %v8876_v17  ;;  %10825 = vst [vmem:[#allocation122_spill] sm:$0xff] %v8879_v40  ;;  %v1093_v44 = vmul.f32 %v8536_v26, %v1069_v16  ;;  %v1096_v62 = vmul.f32 %v8539_v27, %v1066_v22  ;;  %v1198_v20 = vsel %vm1196_vm8, %v8349_v63, %v8343_v52  ;;  %v8908_v23 = vpop.permute.xlu0 %2986  ;;  %v10881_v40 = vld [vmem:[#allocation85_spill] sm:$0xff] }
 0x60d   : > { %v1199_v8 = vsel %vm1196_vm8, %v8327_v35, %v8349_v63  ;;  %v1331_v39 = vsel %vm1327_vm9, %v8351_v1, %v8339_v49  ;;  %v8913_v52 = vrot.slane %v7437_v38, %v8454_v14  ;;  %v8916_v16 = vrot.slane %v7437_v38, %v8446_v12 }
 0x60e   : > { %v8910_v22 = vpop.permute.xlu1 %2988  ;;  %v8919_v35 = vrot.slane %v7437_v38, %v8449_v61  ;;  %v1098_v63 = vadd.f32 %v1094_v42, %v8738_v6  ;;  %v1227_v27 = vmul.f32 %v8542_v60, %v1197_v29  ;;  %v1328_v26 = vsel %vm1327_vm9, %v8345_v53, %v8351_v1  ;;  %v7449_v6 = vld [vmem:[%s10528_s5 + $0x58] sm:$0xf]  ;;  %v10839_v60 = vld [vmem:[#allocation12_spill] sm:$0xff] }
 0x60f   : > { %10826 = vst [vmem:[#allocation123_spill] sm:$0xff] %v8913_v52  ;;  %10827 = vst [vmem:[#allocation124_spill] sm:$0xff] %v8916_v16  ;;  %v8928_v3 = vrot.slane %v7437_v38, %v8457_v37  ;;  %v8930_v19 = vadd.f32 %v1224_v31, %v831_v2  ;;  %v1225_v43 = vmul.f32 %v8548_v18, %v1199_v8 }
 0x610   : > { %10828 = vst [vmem:[#allocation125_spill] sm:$0xff] %v8919_v35  ;;  %v1226_v16 = vmul.f32 %v8551_v56, %v1198_v20  ;;  %v8935_v35 = vrot.slane %v7443_v36, %v8454_v14  ;;  %v1097_v42 = vadd.f32 %v1093_v44, %v8771_v25  ;;  %v1100_v29 = vadd.f32 %v1096_v62, %v703_v59  ;;  %v8954_v25 = vpop.permute.xlu0 %3114  ;;  %v10833_v62 = vld [vmem:[#allocation8_spill] sm:$0xff]  ;;  %v10836_v56 = vld [vmem:[#allocation65_spill] sm:$0xff] }
 0x611   : > { %10829 = vst [vmem:[#allocation126_spill] sm:$0xff] %v8928_v3  ;;  %v1355_v1 = vmul.f32 %v8554_v11, %v1331_v39  ;;  %v1330_v2 = vsel %vm1327_vm9, %v8339_v49, %v8355_v9  ;;  %v1358_v20 = vmul.f32 %v8557_v13, %v1328_v26  ;;  %v1329_v38 = vsel %vm1327_vm9, %v8355_v9, %v8345_v53  ;;  %v10837_v13 = vld [vmem:[#allocation10_spill] sm:$0xff]  ;;  %v10852_v3 = vld [vmem:[#allocation72_spill] sm:$0xff] }
 0x612   : > { %10830 = vst [vmem:[#allocation127_spill] sm:$0xff] %v8935_v35  ;;  %v8952_v31 = vpop.permute.xlu1 %3112  ;;  %v8957_v59 = vrot.slane %v7443_v36, %v8446_v12  ;;  %v8960_v44 = vrot.slane %v7443_v36, %v8449_v61  ;;  %v1231_v49 = vadd.f32 %v1227_v27, %v8786_v47  ;;  %v1461_v26 = vsel %vm1458_vm10, %v10833_v62, %v8357_v10 }
 0x613   : > { %v8968_v8 = vrot.slane %v7443_v36, %v8457_v37  ;;  %v8971_v53 = vrot.slane %v7449_v6, %v8454_v14  ;;  %v1229_v9 = vadd.f32 %v1225_v43, %v8814_v4  ;;  %v1230_v39 = vadd.f32 %v1226_v16, %v8817_v21  ;;  %v10838_v36 = vld [vmem:[#allocation66_spill] sm:$0xff] }
 0x614   : > { %10831 = vst [vmem:[#allocation128_spill] sm:$0xff] %v8957_v59  ;;  %10832 = vst [vmem:[#allocation129_spill] sm:$0xff] %v8960_v44  ;;  %v1356_v18 = vmul.f32 %v10836_v56, %v1330_v2  ;;  %v1460_v27 = vsel %vm1458_vm10, %v8357_v10, %v10837_v13  ;;  %v8981_v47 = vadd.f32 %v1355_v1, %v962_v48  ;;  %v10840_v10 = vld [vmem:[#allocation67_spill] sm:$0xff]  ;;  %v10841_v48 = vld [vmem:[#allocation13_spill] sm:$0xff]  ;;  %v9006_v56 = vpop.permute.xlu0 %3118 }
 0x615   : > { %10834 = vst [vmem:[#allocation8_spill] sm:$0xff] %v8968_v8  ;;  %10835 = vst [vmem:[#allocation130_spill] sm:$0xff] %v8971_v53  ;;  %v1357_v11 = vmul.f32 %v10838_v36, %v1329_v38  ;;  %v1459_v4 = vsel %vm1458_vm10, %v10837_v13, %v10839_v60  ;;  %v1462_v43 = vsel %vm1458_vm10, %v10839_v60, %v10833_v62  ;;  %v10842_v1 = vld [vmem:[#allocation11_spill] sm:$0xff]  ;;  %v10843_v38 = vld [vmem:[#allocation9_spill] sm:$0xff] }
 0x616   : > { %v8993_v21 = vadd.f32 %v1358_v20, %v965_v34  ;;  %v1487_v16 = vmul.f32 %v10840_v10, %v1461_v26  ;;  %v1590_v2 = vsel %vm1589_vm11, %v10842_v1, %v10841_v48  ;;  %v1593_v13 = vsel %vm1589_vm11, %v10841_v48, %v10843_v38  ;;  %v9004_v36 = vpop.permute.xlu1 %3116  ;;  %v10844_v60 = vld [vmem:[#allocation68_spill] sm:$0xff]  ;;  %v10845_v34 = vld [vmem:[#allocation14_spill] sm:$0xff]  ;;  %v7455_v48 = vld [vmem:[%s10528_s5 + $0x5c] sm:$0xf] }
 0x617   : > { %v1488_v62 = vmul.f32 %v10844_v60, %v1460_v27  ;;  %v1592_v20 = vsel %vm1589_vm11, %v10843_v38, %v10845_v34  ;;  %v9014_v26 = vrot.slane %v7449_v6, %v8446_v12  ;;  %v9017_v10 = vrot.slane %v7449_v6, %v8449_v61  ;;  %v10848_v8 = vld [vmem:[#allocation69_spill] sm:$0xff]  ;;  %v10849_v27 = vld [vmem:[#allocation70_spill] sm:$0xff] }
 0x618   : > { %v1360_v53 = vadd.f32 %v1356_v18, %v8825_v15  ;;  %v1486_v44 = vmul.f32 %v10848_v8, %v1462_v43  ;;  %v1489_v60 = vmul.f32 %v10849_v27, %v1459_v4  ;;  %v9026_v59 = vrot.slane %v7449_v6, %v8457_v37  ;;  %v7461_v38 = vld [vmem:[%s10528_s5 + $0x60] sm:$0xf]  ;;  %v10853_v4 = vld [vmem:[#allocation73_spill] sm:$0xff]  ;;  %v9043_v27 = vpop.permute.xlu0 %3244 }
 0x619   : > { %10846 = vst [vmem:[#allocation10_spill] sm:$0xff] %v9014_v26  ;;  %10847 = vst [vmem:[#allocation12_spill] sm:$0xff] %v9017_v10  ;;  %v1361_v26 = vadd.f32 %v1357_v11, %v8854_v57  ;;  %v10851_v10 = vld [vmem:[#allocation71_spill] sm:$0xff]  ;;  %v1620_v52 = vmul.f32 %v10852_v3, %v1590_v2  ;;  %v1591_v18 = vsel %vm1589_vm11, %v10845_v34, %v10842_v1  ;;  %v10860_v34 = vld [vmem:[#allocation74_spill] sm:$0xff] }
 0x61a   : > { %10850 = vst [vmem:[#allocation13_spill] sm:$0xff] %v9026_v59  ;;  %v1617_v35 = vmul.f32 %v10851_v10, %v1593_v13  ;;  %v9038_v15 = vadd.f32 %v1487_v16, %v1098_v63  ;;  %v1618_v6 = vmul.f32 %v10853_v4, %v1592_v20  ;;  %v9041_v43 = vpop.permute.xlu1 %3242  ;;  %v9046_v8 = vrot.slane %v7455_v48, %v8454_v14  ;;  %v10861_v3 = vld [vmem:[#allocation17_spill] sm:$0xff]  ;;  %v10862_v10 = vld [vmem:[#allocation16_spill] sm:$0xff] }
 0x61b   : > { %10854 = vst [vmem:[#allocation11_spill] sm:$0xff] %v9041_v43  ;;  %v9049_v11 = vrot.slane %v7455_v48, %v8446_v12  ;;  %v9052_v57 = vadd.f32 %v1488_v62, %v8871_v50  ;;  %v9055_v2 = vrot.slane %v7455_v48, %v8449_v61  ;;  %v9058_v63 = vrot.slane %v7455_v48, %v8457_v37  ;;  %v10887_v43 = vld [vmem:[#allocation80_spill] sm:$0xff] }
 0x61c   : > { %10855 = vst [vmem:[#allocation9_spill] sm:$0xff] %v9046_v8  ;;  %v9061_v16 = vrot.slane %v7461_v38, %v8454_v14  ;;  %v1490_v1 = vadd.f32 %v1486_v44, %v1097_v42  ;;  %v1493_v13 = vadd.f32 %v1489_v60, %v1100_v29  ;;  %v1619_v20 = vmul.f32 %v10860_v34, %v1591_v18  ;;  %v10865_v44 = vld [vmem:[#allocation18_spill] sm:$0xff]  ;;  %v10872_v34 = vld [vmem:[#allocation25_spill] sm:$0xff] }
 0x61d   : > { %10856 = vst [vmem:[#allocation14_spill] sm:$0xff] %v9049_v11  ;;  %10857 = vst [vmem:[#allocation131_spill] sm:$0xff] %v9055_v2  ;;  %v1723_v4 = vsel %vm1720_vm12, %v10862_v10, %v10861_v3  ;;  %v1621_v50 = vadd.f32 %v1617_v35, %v8930_v19  ;;  %v9069_v62 = vadd.f32 %v1620_v52, %v1231_v49  ;;  %v10863_v2 = vld [vmem:[#allocation15_spill] sm:$0xff]  ;;  %v9085_v19 = vpop.permute.xlu0 %3248  ;;  %v10878_v8 = vld [vmem:[#allocation22_spill] sm:$0xff] }
 0x61e   : > { %10858 = vst [vmem:[#allocation132_spill] sm:$0xff] %v9058_v63  ;;  %10859 = vst [vmem:[#allocation133_spill] sm:$0xff] %v9061_v16  ;;  %v1722_v48 = vsel %vm1720_vm12, %v10861_v3, %v10863_v2  ;;  %v9077_v42 = vrot.slane %v7461_v38, %v8446_v12  ;;  %v1622_v29 = vadd.f32 %v1618_v6, %v1229_v9  ;;  %v9083_v18 = vpop.permute.xlu1 %3246  ;;  %v10870_v35 = vld [vmem:[#allocation75_spill] sm:$0xff]  ;;  %v10875_v16 = vld [vmem:[#allocation21_spill] sm:$0xff] }
 0x61f   : > { %v1724_v60 = vsel %vm1720_vm12, %v10865_v44, %v10862_v10  ;;  %10866 = vst [vmem:[#allocation16_spill] sm:$0xff] %v9083_v18  ;;  %10867 = vst [vmem:[#allocation15_spill] sm:$0xff] %v9085_v19  ;;  %v9088_v52 = vrot.slane %v7461_v38, %v8449_v61  ;;  %v9091_v3 = vrot.slane %v7461_v38, %v8457_v37  ;;  %v10871_v6 = vld [vmem:[#allocation23_spill] sm:$0xff]  ;;  %v7467_v38 = vld [vmem:[%s10528_s5 + $0x64] sm:$0xf] }
 0x620   : > { %10864 = vst [vmem:[#allocation17_spill] sm:$0xff] %v9077_v42  ;;  %v1749_v49 = vmul.f32 %v10870_v35, %v1723_v4  ;;  %v1721_v9 = vsel %vm1720_vm12, %v10863_v2, %v10865_v44  ;;  %v1984_v10 = vsel %vm10679_vm13, %v10872_v34, %v10871_v6  ;;  %v10873_v42 = vld [vmem:[#allocation24_spill] sm:$0xff]  ;;  %v1623_v4 = vadd.f32 %v1619_v20, %v1230_v39  ;;  %v10877_v44 = vld [vmem:[#allocation19_spill] sm:$0xff] }
 0x621   : > { %10868 = vst [vmem:[#allocation18_spill] sm:$0xff] %v9088_v52  ;;  %10869 = vst [vmem:[#allocation134_spill] sm:$0xff] %v9091_v3  ;;  %v1985_v52 = vsel %vm10679_vm13, %v10873_v42, %v10872_v34  ;;  %v10874_v35 = vld [vmem:[#allocation76_spill] sm:$0xff]  ;;  %v1855_v11 = vsel %vm10678_vm14, %v10875_v16, %v10877_v44  ;;  %v1748_v34 = vmul.f32 %v8615_v28, %v1724_v60  ;;  %v10882_v60 = vld [vmem:[#allocation86_spill] sm:$0xff]  ;;  %v9136_v19 = vpop.permute.xlu0 %3372 }
 0x622   : > { %v1750_v3 = vmul.f32 %v10874_v35, %v1722_v48  ;;  %v10876_v63 = vld [vmem:[#allocation20_spill] sm:$0xff]  ;;  %v1854_v20 = vsel %vm10678_vm14, %v10877_v44, %v10878_v8  ;;  %v10879_v48 = vld [vmem:[#allocation26_spill] sm:$0xff]  ;;  %v2011_v17 = vmul.f32 %v10881_v40, %v1985_v52  ;;  %v2012_v28 = vmul.f32 %v10882_v60, %v1984_v10  ;;  %10883 = vst [vmem:[#allocation23_spill] sm:$0xff] %v9136_v19  ;;  %v10886_v44 = vld [vmem:[#allocation79_spill] sm:$0xff] }
 0x623   : > { %v1852_v2 = vsel %vm10678_vm14, %v10876_v63, %v10875_v16  ;;  %v1853_v39 = vsel %vm10678_vm14, %v10878_v8, %v10876_v63  ;;  %v1986_v35 = vsel %vm10679_vm13, %v10879_v48, %v10873_v42  ;;  %v10880_v16 = vld [vmem:[#allocation78_spill] sm:$0xff]  ;;  %v9138_v63 = vpop.permute.xlu1 %3374  ;;  %v9141_v5 = vrot.slane %v7467_v38, %v8454_v14  ;;  %v10888_v10 = vld [vmem:[#allocation83_spill] sm:$0xff]  ;;  %v10889_v40 = vld [vmem:[#allocation84_spill] sm:$0xff] }
 0x624   : > { %v1751_v59 = vmul.f32 %v10880_v16, %v1721_v9  ;;  %10884 = vst [vmem:[#allocation25_spill] sm:$0xff] %v9138_v63  ;;  %v1753_v8 = vadd.f32 %v1749_v49, %v1360_v53  ;;  %v1879_v18 = vmul.f32 %v10886_v44, %v1855_v11  ;;  %v1882_v42 = vmul.f32 %v10887_v43, %v1852_v2  ;;  %v10890_v19 = vld [vmem:[#allocation87_spill] sm:$0xff] }
 0x625   : > { %10885 = vst [vmem:[#allocation24_spill] sm:$0xff] %v9141_v5  ;;  %v1983_v52 = vsel %vm10679_vm13, %v10871_v6, %v10879_v48  ;;  %v9149_v9 = vadd.f32 %v1750_v3, %v1361_v26  ;;  %v1880_v60 = vmul.f32 %v10888_v10, %v1854_v20  ;;  %v1881_v16 = vmul.f32 %v10889_v40, %v1853_v39  ;;  %v7473_v53 = vld [vmem:[%s10528_s5 + $0x68] sm:$0xf]  ;;  %v10894_v39 = vld [vmem:[#allocation88_spill] sm:$0xff]  ;;  %v9170_v48 = vpop.permute.xlu0 %3376 }
 0x626   : > { %v2010_v63 = vmul.f32 %v10890_v19, %v1986_v35  ;;  %vm10702_vm14 = vcmp.lt.s32.totalorder %v8468_v51, 121  ;;  %v1752_v11 = vadd.f32 %v1748_v34, %v8981_v47  ;;  %v9160_v49 = vrot.slane %v7467_v38, %v8446_v12  ;;  %v10917_v10 = vld [vmem:[#allocation36_spill] sm:$0xff] }
 0x627   : > { %v9163_v26 = vrot.slane %v7467_v38, %v8449_v61  ;;  %v9166_v3 = vrot.slane %v7467_v38, %v8457_v37  ;;  %v1755_v6 = vadd.f32 %v1751_v59, %v8993_v21  ;;  %v2015_v35 = vadd.f32 %v2011_v17, %v1622_v29  ;;  %v9172_v19 = vpop.permute.xlu1 %3378  ;;  %v10899_v21 = vld [vmem:[#allocation28_spill] sm:$0xff] }
 0x628   : > { %10891 = vst [vmem:[#allocation21_spill] sm:$0xff] %v9160_v49  ;;  %v2016_v2 = vadd.f32 %v2012_v28, %v1623_v4  ;;  %v2013_v20 = vmul.f32 %v10894_v39, %v1983_v52  ;;  %10895 = vst [vmem:[#allocation22_spill] sm:$0xff] %v9172_v19  ;;  %v1883_v47 = vadd.f32 %v1879_v18, %v1490_v1  ;;  %v10898_v28 = vld [vmem:[#allocation27_spill] sm:$0xff]  ;;  %v10900_v4 = vld [vmem:[#allocation30_spill] sm:$0xff]  ;;  %vm10701_vm13 = vcmp.lt.s32.totalorder %v8468_v51, 120 }
 0x629   : > { %10892 = vst [vmem:[#allocation20_spill] sm:$0xff] %v9163_v26  ;;  %10893 = vst [vmem:[#allocation19_spill] sm:$0xff] %v9166_v3  ;;  %v1886_v34 = vadd.f32 %v1882_v42, %v1493_v13  ;;  %v9175_v43 = vrot.slane %v7473_v53, %v8454_v14  ;;  %v9178_v44 = vrot.slane %v7473_v53, %v8446_v12  ;;  %v10901_v14 = vld [vmem:[#allocation32_spill] sm:$0xff]  ;;  %v10904_v18 = vld [vmem:[#allocation6_spill] sm:$0xff] }
 0x62a   : > { %v1884_v38 = vadd.f32 %v1880_v60, %v9038_v15  ;;  %v1885_v59 = vadd.f32 %v1881_v16, %v9052_v57  ;;  %v2014_v17 = vadd.f32 %v2010_v63, %v1621_v50  ;;  %v2116_v29 = vsel %vm10680_vm15, %v10899_v21, %v10898_v28  ;;  %v10905_v60 = vld [vmem:[#allocation5_spill] sm:$0xff]  ;;  %v10926_v3 = vld [vmem:[#allocation96_spill] sm:$0xff]  ;;  %v10927_v49 = vld [vmem:[#allocation46_spill] sm:$0xff] }
 0x62b   : > { %10896 = vst [vmem:[#allocation26_spill] sm:$0xff] %v9175_v43  ;;  %10897 = vst [vmem:[#allocation135_spill] sm:$0xff] %v9178_v44  ;;  %v2115_v1 = vsel %vm10680_vm15, %v10898_v28, %v10900_v4  ;;  %v2117_v12 = vsel %vm10680_vm15, %v10901_v14, %v10899_v21  ;;  %v9196_v15 = vrot.slane %v7473_v53, %v8449_v61  ;;  %v9212_v42 = vpop.permute.xlu1 %3502  ;;  %v9214_v61 = vpop.permute.xlu0 %3504  ;;  %v10908_v52 = vld [vmem:[#allocation89_spill] sm:$0xff]  ;;  %v10910_v28 = vld [vmem:[#allocation31_spill] sm:$0xff] }
 0x62c   : > { %v9199_v57 = vrot.slane %v7473_v53, %v8457_v37  ;;  %v2017_v13 = vadd.f32 %v2013_v20, %v9069_v62  ;;  %v2114_v50 = vsel %vm10680_vm15, %v10900_v4, %v10901_v14  ;;  %v9207_v16 = vadd.f32 %v10904_v18, %v2015_v35  ;;  %10906 = vst [vmem:[#allocation30_spill] sm:$0xff] %v9212_v42  ;;  %v10909_v53 = vld [vmem:[#allocation34_spill] sm:$0xff]  ;;  %v10911_v20 = vld [vmem:[#allocation29_spill] sm:$0xff]  ;;  %v10936_v19 = vld [vmem:[#allocation64_spill] sm:$0xff] }
 0x62d   : > { %10902 = vst [vmem:[#allocation27_spill] sm:$0xff] %v9196_v15  ;;  %v9210_v63 = vadd.f32 %v10905_v60, %v2016_v2  ;;  %10907 = vst [vmem:[#allocation32_spill] sm:$0xff] %v9214_v61  ;;  %v2142_v37 = vmul.f32 %v10908_v52, %v2116_v29  ;;  %v2245_v62 = vsel %vm2244_vm1, %v10910_v28, %v10909_v53  ;;  %v10912_v21 = vld [vmem:[#allocation33_spill] sm:$0xff]  ;;  %vm10700_vm15 = vcmp.lt.s32.totalorder %v8468_v51, 119  ;;  %v10913_v4 = vld [vmem:[#allocation90_spill] sm:$0xff] }
 0x62e   : > { %10903 = vst [vmem:[#allocation28_spill] sm:$0xff] %v9199_v57  ;;  %v2248_v35 = vsel %vm2244_vm1, %v10909_v53, %v10911_v20  ;;  %v2247_v2 = vsel %vm2244_vm1, %v10911_v20, %v10912_v21  ;;  %v2143_v14 = vmul.f32 %v10913_v4, %v2115_v1  ;;  %v10914_v29 = vld [vmem:[#allocation91_spill] sm:$0xff]  ;;  %v2246_v60 = vsel %vm2244_vm1, %v10912_v21, %v10910_v28  ;;  %v10915_v52 = vld [vmem:[#allocation4_spill] sm:$0xff]  ;;  %v10919_v15 = vld [vmem:[#allocation37_spill] sm:$0xff] }
 0x62f   : > { %v2141_v18 = vmul.f32 %v10914_v29, %v2117_v12  ;;  %v9237_v39 = vadd.f32 %v10915_v52, %v2014_v17  ;;  %v10916_v53 = vld [vmem:[#allocation92_spill] sm:$0xff]  ;;  %v10918_v57 = vld [vmem:[#allocation35_spill] sm:$0xff]  ;;  %v2468_v1 = vsel %vm10703_vm3, %v10917_v10, %v10919_v15  ;;  %v10920_v12 = vld [vmem:[#allocation38_spill] sm:$0xff]  ;;  %v9259_v44 = vpop.permute.xlu1 %3506  ;;  %v9261_v43 = vpop.permute.xlu0 %3508  ;;  %v2274_v26 = vmul.f32 %v10926_v3, %v2246_v60 }
 0x630   : > { %v2144_v40 = vmul.f32 %v10916_v53, %v2114_v50  ;;  %v2469_v20 = vsel %vm10703_vm3, %v10918_v57, %v10917_v10  ;;  %v2467_v28 = vsel %vm10703_vm3, %v10919_v15, %v10920_v12  ;;  %v10921_v21 = vld [vmem:[#allocation93_spill] sm:$0xff]  ;;  %v10922_v52 = vld [vmem:[#allocation94_spill] sm:$0xff]  ;;  %v10923_v50 = vld [vmem:[#allocation95_spill] sm:$0xff]  ;;  %v2470_v4 = vsel %vm10703_vm3, %v10920_v12, %v10918_v57  ;;  %10924 = vst [vmem:[#allocation6_spill] sm:$0xff] %v9259_v44 }
 0x631   : > { %v2272_v17 = vmul.f32 %v10921_v21, %v2248_v35  ;;  %v2275_v29 = vmul.f32 %v10922_v52, %v2245_v62  ;;  %v2273_v53 = vmul.f32 %v10923_v50, %v2247_v2  ;;  %10925 = vst [vmem:[#allocation5_spill] sm:$0xff] %v9261_v43  ;;  %v2146_v10 = vadd.f32 %v2142_v37, %v1753_v8  ;;  %v10928_v15 = vld [vmem:[#allocation45_spill] sm:$0xff]  ;;  %v10929_v62 = vld [vmem:[#allocation7_spill] sm:$0xff]  ;;  %v10931_v50 = vld [vmem:[#allocation98_spill] sm:$0xff] }
 0x632   : > { %v2600_v35 = vsel %vm10702_vm14, %v10928_v15, %v10927_v49  ;;  %v2370_v52 = vadd.f32 %v10929_v62, %v2017_v13  ;;  %v10930_v2 = vld [vmem:[#allocation97_spill] sm:$0xff]  ;;  %v2495_v5 = vmul.f32 %v10931_v50, %v2468_v1  ;;  %v2496_v57 = vmul.f32 %v8700_v24, %v2467_v28  ;;  %v10932_v12 = vld [vmem:[#allocation63_spill] sm:$0xff]  ;;  %v10933_v43 = vld [vmem:[#allocation102_spill] sm:$0xff] }
 0x633   : > { %v2494_v21 = vmul.f32 %v10930_v2, %v2469_v20  ;;  %v2599_v8 = vsel %vm10702_vm14, %v10927_v49, %v10932_v12  ;;  %v2147_v37 = vadd.f32 %v2143_v14, %v9149_v9  ;;  %v2145_v60 = vadd.f32 %v2141_v18, %v1752_v11  ;;  %v10934_v62 = vld [vmem:[#allocation103_spill] sm:$0xff]  ;;  %v9279_v2 = vpop.permute.xlu1 %3632  ;;  %v9281_v1 = vpop.permute.xlu0 %3634  ;;  %v10935_v24 = vld [vmem:[#allocation104_spill] sm:$0xff]  ;;  %v10941_v18 = vld [vmem:[#allocation105_spill] sm:$0xff] }
 0x634   : > { %v2148_v3 = vadd.f32 %v2144_v40, %v1755_v6  ;;  %v2497_v44 = vmul.f32 %v10933_v43, %v2470_v4  ;;  %v2276_v42 = vadd.f32 %v2272_v17, %v1883_v47  ;;  %v2279_v61 = vadd.f32 %v2275_v29, %v1886_v34  ;;  %v10937_v47 = vld [vmem:[#allocation82_spill] sm:$0xff]  ;;  %v10938_v34 = vld [vmem:[#allocation81_spill] sm:$0xff]  ;;  %v10940_v14 = vld [vmem:[#allocation100_spill] sm:$0xff] }
 0x635   : > { %v2277_v13 = vadd.f32 %v2273_v53, %v1884_v38  ;;  %v2625_v20 = vmul.f32 %v10934_v62, %v2600_v35  ;;  %v2278_v28 = vadd.f32 %v2274_v26, %v1885_v59  ;;  %v2626_v50 = vmul.f32 %v10935_v24, %v2599_v8  ;;  %v10939_v59 = vld [vmem:[#allocation99_spill] sm:$0xff]  ;;  %v10944_v8 = vld [vmem:[#allocation108_spill] sm:$0xff] }
 0x636   : > { %v2598_v9 = vsel %vm10702_vm14, %v10932_v12, %v10936_v19  ;;  %v2601_v40 = vsel %vm10702_vm14, %v10936_v19, %v10928_v15  ;;  %v2498_v11 = vadd.f32 %v2494_v21, %v2145_v60  ;;  %v2499_v49 = vadd.f32 %v2495_v5, %v2146_v10  ;;  %v10942_v21 = vld [vmem:[#allocation106_spill] sm:$0xff]  ;;  %v10943_v35 = vld [vmem:[#allocation107_spill] sm:$0xff]  ;;  %v10945_v60 = vld [vmem:[#allocation109_spill] sm:$0xff] }
 0x637   : > { %v2500_v6 = vadd.f32 %v2496_v57, %v2147_v37  ;;  %v2731_v26 = vsel %vm10701_vm13, %v10938_v34, %v10937_v47  ;;  %v2501_v38 = vadd.f32 %v2497_v44, %v2148_v3  ;;  %v2730_v4 = vsel %vm10701_vm13, %v10937_v47, %v10939_v59  ;;  %v9314_v17 = vpop.permute.xlu1 %3636  ;;  %v9316_v10 = vpop.permute.xlu0 %3638 }
 0x638   : > { %v2729_v29 = vsel %vm10701_vm13, %v10939_v59, %v10940_v14  ;;  %v2732_v5 = vsel %vm10701_vm13, %v10940_v14, %v10938_v34  ;;  %v2629_v19 = vadd.f32 %v2625_v20, %v2276_v42  ;;  %v2627_v53 = vmul.f32 %v10941_v18, %v2598_v9  ;;  %v10946_v9 = vld [vmem:[#allocation110_spill] sm:$0xff] }
 0x639   : > { %v2628_v44 = vmul.f32 %v10942_v21, %v2601_v40  ;;  %v2862_v3 = vsel %vm10700_vm15, %v8751_v45, %v8753_v32  ;;  %v2630_v15 = vadd.f32 %v2626_v50, %v2277_v13  ;;  %v2756_v57 = vmul.f32 %v10943_v35, %v2731_v26  ;;  %v10947_v13 = vld [vmem:[#allocation111_spill] sm:$0xff]  ;;  %v10948_v26 = vld [vmem:[#allocation112_spill] sm:$0xff]  ;;  %v10975_v35 = vld [vmem:[#allocation13_spill] sm:$0xff] }
 0x63a   : > { %v2861_v42 = vsel %vm10700_vm15, %v8753_v32, %v8797_v7  ;;  %v2860_v12 = vsel %vm10700_vm15, %v8797_v7, %v8802_v54  ;;  %v2757_v37 = vmul.f32 %v10944_v8, %v2730_v4  ;;  %v2758_v20 = vmul.f32 %v10945_v60, %v2729_v29 }
 0x63b   : > { %v2759_v40 = vmul.f32 %v10946_v9, %v2732_v5  ;;  %v2863_v50 = vsel %vm10700_vm15, %v8802_v54, %v8751_v45  ;;  %v2887_v47 = vmul.f32 %v10947_v13, %v2862_v3  ;;  %v2992_v32 = vsel %vm673_vm4, %v8864_v33, %v8866_v41  ;;  %v9359_v14 = vpop.permute.xlu1 %3764 }
 0x63c   : > { %v2991_v7 = vsel %vm673_vm4, %v8866_v41, %v8908_v23  ;;  %v2990_v34 = vsel %vm673_vm4, %v8908_v23, %v8910_v22  ;;  %v2888_v59 = vmul.f32 %v10948_v26, %v2861_v42  ;;  %v2889_v45 = vmul.f32 %v8794_v30, %v2860_v12  ;;  %v9357_v41 = vpop.permute.xlu0 %3762  ;;  %v10949_v12 = vld [vmem:[#allocation115_spill] sm:$0xff] }
 0x63d   : > { %v2993_v54 = vsel %vm673_vm4, %v8910_v22, %v8864_v33  ;;  %v3122_v4 = vsel %vm803_vm5, %v8952_v31, %v8954_v25  ;;  %v2631_v29 = vadd.f32 %v2627_v53, %v2278_v28  ;;  %v2632_v23 = vadd.f32 %v2628_v44, %v2279_v61  ;;  %v10950_v33 = vld [vmem:[#allocation116_spill] sm:$0xff] }
 0x63e   : > { %v2760_v5 = vadd.f32 %v2756_v57, %v9237_v39  ;;  %v2890_v3 = vmul.f32 %v8800_v55, %v2863_v50  ;;  %v2761_v42 = vadd.f32 %v2757_v37, %v9207_v16  ;;  %v3017_v30 = vmul.f32 %v10949_v12, %v2992_v32  ;;  %v10974_v55 = vld [vmem:[#allocation12_spill] sm:$0xff] }
 0x63f   : > { %v3018_v22 = vmul.f32 %v10950_v33, %v2991_v7  ;;  %v3019_v26 = vmul.f32 %v8833_v58, %v2990_v34  ;;  %v2762_v13 = vadd.f32 %v2758_v20, %v9210_v63  ;;  %v2763_v9 = vadd.f32 %v2759_v40, %v2370_v52  ;;  %v9376_v57 = vpop.permute.xlu1 %3768  ;;  %v10952_v40 = vld [vmem:[#allocation16_spill] sm:$0xff]  ;;  %v10954_v7 = vld [vmem:[#allocation15_spill] sm:$0xff]  ;;  %v10972_v58 = vld [vmem:[#allocation130_spill] sm:$0xff] }
 0x640   : > { %v3020_v60 = vmul.f32 %v8836_v46, %v2993_v54  ;;  %v3147_v28 = vmul.f32 %v8851_v0, %v3122_v4  ;;  %v2891_v61 = vadd.f32 %v2887_v47, %v2498_v11  ;;  %v2892_v53 = vadd.f32 %v2888_v59, %v2499_v49  ;;  %v9374_v44 = vpop.permute.xlu0 %3766  ;;  %v10951_v11 = vld [vmem:[#allocation11_spill] sm:$0xff]  ;;  %v10953_v47 = vld [vmem:[#allocation120_spill] sm:$0xff]  ;;  %v10956_v59 = vld [vmem:[#allocation122_spill] sm:$0xff] }
 0x641   : > { %v2893_v39 = vadd.f32 %v2889_v45, %v2500_v6  ;;  %v3121_v16 = vsel %vm803_vm5, %v8954_v25, %v9004_v36  ;;  %v2894_v37 = vadd.f32 %v2890_v3, %v2501_v38  ;;  %v3120_v63 = vsel %vm803_vm5, %v9004_v36, %v9006_v56  ;;  %v10958_v45 = vld [vmem:[#allocation124_spill] sm:$0xff]  ;;  %v10959_v4 = vld [vmem:[#allocation25_spill] sm:$0xff]  ;;  %v10961_v3 = vld [vmem:[#allocation22_spill] sm:$0xff] }
 0x642   : > { %v3123_v52 = vsel %vm803_vm5, %v9006_v56, %v8952_v31  ;;  %v3252_v25 = vsel %vm934_vm7, %v10951_v11, %v9043_v27  ;;  %v3021_v49 = vadd.f32 %v3017_v30, %v2629_v19  ;;  %v3022_v6 = vadd.f32 %v3018_v22, %v2630_v15  ;;  %v10955_v31 = vld [vmem:[#allocation121_spill] sm:$0xff]  ;;  %v10957_v19 = vld [vmem:[#allocation123_spill] sm:$0xff]  ;;  %v10971_v0 = vld [vmem:[#allocation8_spill] sm:$0xff] }
 0x643   : > { %v3023_v20 = vadd.f32 %v3019_v26, %v2631_v29  ;;  %v3251_v38 = vsel %vm934_vm7, %v9043_v27, %v10952_v40  ;;  %v3024_v50 = vadd.f32 %v3020_v60, %v2632_v23  ;;  %v3151_v36 = vadd.f32 %v3147_v28, %v2760_v5  ;;  %v3893_v60 = vpop.permute.xlu1 %3892  ;;  %v10960_v29 = vld [vmem:[#allocation23_spill] sm:$0xff]  ;;  %v10962_v28 = vld [vmem:[#allocation125_spill] sm:$0xff] }
 0x644   : > { %v3148_v32 = vmul.f32 %v10953_v47, %v3121_v16  ;;  %v3250_v56 = vsel %vm934_vm7, %v10952_v40, %v10954_v7  ;;  %v3149_v34 = vmul.f32 %v10955_v31, %v3120_v63  ;;  %v3150_v30 = vmul.f32 %v10956_v59, %v3123_v52  ;;  %v3895_v26 = vpop.permute.xlu0 %3894  ;;  %v10963_v52 = vld [vmem:[#allocation32_spill] sm:$0xff]  ;;  %v10965_v40 = vld [vmem:[#allocation6_spill] sm:$0xff] }
 0x645   : > { %v3277_v15 = vmul.f32 %v10957_v19, %v3252_v25  ;;  %v3253_v27 = vsel %vm934_vm7, %v10954_v7, %v10951_v11  ;;  %v3278_v54 = vmul.f32 %v10958_v45, %v3251_v38  ;;  %v3382_v23 = vsel %vm1065_vm6, %v10960_v29, %v10959_v4  ;;  %v10964_v11 = vld [vmem:[#allocation30_spill] sm:$0xff]  ;;  %v10968_v45 = vld [vmem:[#allocation127_spill] sm:$0xff]  ;;  %v10969_v19 = vld [vmem:[#allocation128_spill] sm:$0xff] }
 0x646   : > { %v3381_v5 = vsel %vm1065_vm6, %v10959_v4, %v9170_v48  ;;  %v3380_v22 = vsel %vm1065_vm6, %v9170_v48, %v10961_v3  ;;  %v3279_v16 = vmul.f32 %v10962_v28, %v3250_v56  ;;  %v3383_v63 = vsel %vm1065_vm6, %v10961_v3, %v10960_v29  ;;  %v10966_v7 = vld [vmem:[#allocation126_spill] sm:$0xff]  ;;  %v10967_v48 = vld [vmem:[#allocation5_spill] sm:$0xff] }
 0x647   : > { %v3512_v25 = vsel %vm1196_vm8, %v10964_v11, %v10963_v52  ;;  %v3511_v38 = vsel %vm1196_vm8, %v10963_v52, %v10965_v40  ;;  %v3280_v4 = vmul.f32 %v10966_v7, %v3253_v27  ;;  %v3510_v56 = vsel %vm1196_vm8, %v10965_v40, %v10967_v48  ;;  %v10970_v7 = vld [vmem:[#allocation129_spill] sm:$0xff]  ;;  %v3897_v31 = vpop.permute.xlu1 %3896 }
 0x648   : > { %v3513_v29 = vsel %vm1196_vm8, %v10967_v48, %v10964_v11  ;;  %v3642_v3 = vsel %vm1327_vm9, %v9279_v2, %v9281_v1  ;;  %v3152_v28 = vadd.f32 %v3148_v32, %v2761_v42  ;;  %v3407_v52 = vmul.f32 %v10968_v45, %v3382_v23  ;;  %v3899_v47 = vpop.permute.xlu0 %3898  ;;  %v10973_v11 = vld [vmem:[#allocation10_spill] sm:$0xff]  ;;  %v10976_v32 = vld [vmem:[#allocation9_spill] sm:$0xff] }
 0x649   : > { %v3408_v27 = vmul.f32 %v10969_v19, %v3381_v5  ;;  %v3409_v59 = vmul.f32 %v10970_v7, %v3380_v22  ;;  %v3153_v40 = vadd.f32 %v3149_v34, %v2762_v13  ;;  %v3410_v46 = vmul.f32 %v10971_v0, %v3383_v63 }
 0x64a   : > { %v3537_v33 = vmul.f32 %v10972_v58, %v3512_v25  ;;  %v3538_v48 = vmul.f32 %v10973_v11, %v3511_v38  ;;  %v3154_v12 = vadd.f32 %v3150_v30, %v2763_v9  ;;  %v3539_v8 = vmul.f32 %v10974_v55, %v3510_v56  ;;  %v10982_v38 = vld [vmem:[#allocation20_spill] sm:$0xff] }
 0x64b   : > { %v3540_v42 = vmul.f32 %v10975_v35, %v3513_v29  ;;  %v3667_v23 = vmul.f32 %v10976_v32, %v3642_v3  ;;  %v3281_v45 = vadd.f32 %v3277_v15, %v2891_v61  ;;  %v3282_v5 = vadd.f32 %v3278_v54, %v2892_v53  ;;  %v4023_v63 = vpop.permute.xlu1 %4022  ;;  %v10980_v54 = vld [vmem:[#allocation132_spill] sm:$0xff]  ;;  %v10983_v29 = vld [vmem:[#allocation133_spill] sm:$0xff] }
 0x64c   : > { %v3283_v19 = vadd.f32 %v3279_v16, %v2893_v39  ;;  %v3284_v22 = vadd.f32 %v3280_v4, %v2894_v37  ;;  %v3411_v7 = vadd.f32 %v3407_v52, %v3021_v49  ;;  %v3412_v21 = vadd.f32 %v3408_v27, %v3022_v6  ;;  %v4025_v6 = vpop.permute.xlu0 %4024  ;;  %v10985_v52 = vld [vmem:[#allocation18_spill] sm:$0xff] }
 0x64d   : > { %v3413_v13 = vadd.f32 %v3409_v59, %v3023_v20  ;;  %v3641_v34 = vsel %vm1327_vm9, %v9281_v1, %v9314_v17  ;;  %v3414_v9 = vadd.f32 %v3410_v46, %v3024_v50  ;;  %v3541_v30 = vadd.f32 %v3537_v33, %v3151_v36  ;;  %v10977_v20 = vld [vmem:[#allocation14_spill] sm:$0xff]  ;;  %v10979_v36 = vld [vmem:[#allocation24_spill] sm:$0xff] }
 0x64e   : > { %v3542_v25 = vadd.f32 %v3538_v48, %v3152_v28  ;;  %v3640_v61 = vsel %vm1327_vm9, %v9314_v17, %v9316_v10  ;;  %v3543_v53 = vadd.f32 %v3539_v8, %v3153_v40  ;;  %v3544_v39 = vadd.f32 %v3540_v42, %v3154_v12  ;;  %v10978_v8 = vld [vmem:[#allocation131_spill] sm:$0xff] }
 0x64f   : > { %v3671_v37 = vadd.f32 %v3667_v23, %v3281_v45  ;;  %v3902_v49 = vsel %vm1589_vm11, %v3893_v60, %v3895_v26  ;;  %v3668_v59 = vmul.f32 %v10977_v20, %v3641_v34  ;;  %v3643_v46 = vsel %vm1327_vm9, %v9316_v10, %v9279_v2  ;;  %v4027_v10 = vpop.permute.xlu1 %4026  ;;  %v10986_v48 = vld [vmem:[#allocation19_spill] sm:$0xff]  ;;  %v10987_v23 = vld [vmem:[#allocation26_spill] sm:$0xff] }
 0x650   : > { %v3901_v1 = vsel %vm1589_vm11, %v3895_v26, %v3897_v31  ;;  %v3900_v17 = vsel %vm1589_vm11, %v3897_v31, %v3899_v47  ;;  %v3669_v12 = vmul.f32 %v10978_v8, %v3640_v61  ;;  %v3772_v33 = vsel %vm1458_vm10, %v9357_v41, %v9359_v14  ;;  %v10988_v61 = vld [vmem:[#allocation135_spill] sm:$0xff] }
 0x651   : > { %v3771_v50 = vsel %vm1458_vm10, %v9359_v14, %v9374_v44  ;;  %v3770_v2 = vsel %vm1458_vm10, %v9374_v44, %v9376_v57  ;;  %v3927_v31 = vmul.f32 %v10979_v36, %v3902_v49  ;;  %v3903_v15 = vsel %vm1589_vm11, %v3899_v47, %v3893_v60  ;;  %v10981_v44 = vld [vmem:[#allocation21_spill] sm:$0xff] }
 0x652   : > { %v4032_v26 = vsel %vm1720_vm12, %v4023_v63, %v4025_v6  ;;  %v4031_v45 = vsel %vm1720_vm12, %v4025_v6, %v4027_v10  ;;  %v3670_v28 = vmul.f32 %v10980_v54, %v3643_v46  ;;  %v3773_v14 = vsel %vm1458_vm10, %v9376_v57, %v9357_v41  ;;  %v10984_v60 = vld [vmem:[#allocation17_spill] sm:$0xff]  ;;  %v10989_v41 = vld [vmem:[#allocation134_spill] sm:$0xff] }
 0x653   : > { %v3928_v16 = vmul.f32 %v10981_v44, %v3901_v1  ;;  %v3929_v4 = vmul.f32 %v10982_v38, %v3900_v17  ;;  %v3672_v56 = vadd.f32 %v3668_v59, %v3282_v5  ;;  %v3797_v47 = vmul.f32 %v10983_v29, %v3772_v33  ;;  %v4029_v6 = vpop.permute.xlu1 %4028  ;;  %v10990_v33 = vld [vmem:[#allocation27_spill] sm:$0xff] }
 0x654   : > { %v3798_v3 = vmul.f32 %v10984_v60, %v3771_v50  ;;  %v3799_v27 = vmul.f32 %v10985_v52, %v3770_v2  ;;  %v3673_v40 = vadd.f32 %v3669_v12, %v3283_v19  ;;  %v3930_v42 = vmul.f32 %v10986_v48, %v3903_v15  ;;  %v10991_v12 = vld [vmem:[#allocation28_spill] sm:$0xff] }
 0x655   : > { %v4057_v34 = vmul.f32 %v10987_v23, %v4032_v26  ;;  %v4058_v49 = vmul.f32 %v10988_v61, %v4031_v45  ;;  %v3800_v57 = vmul.f32 %v10989_v41, %v3773_v14  ;;  %v3931_v46 = vadd.f32 %v3927_v31, %v3541_v30 }
 0x656   : > { %v4030_v5 = vsel %vm1720_vm12, %v4027_v10, %v4029_v6  ;;  %v4033_v59 = vsel %vm1720_vm12, %v4029_v6, %v4023_v63  ;;  %v3932_v1 = vadd.f32 %v3928_v16, %v3542_v25  ;;  %v3933_v17 = vadd.f32 %v3929_v4, %v3543_v53  ;;  %v4077_v4 = vpop.permute.xlu0 %4076 }
 0x657   : > { %v4059_v19 = vmul.f32 %v10990_v33, %v4030_v5  ;;  %v4060_v50 = vmul.f32 %v10991_v12, %v4033_v59  ;;  %v3674_v2 = vadd.f32 %v3670_v28, %v3284_v22  ;;  %v3801_v15 = vadd.f32 %v3797_v47, %v3411_v7 }
 0x658   : > { %v3802_v26 = vadd.f32 %v3798_v3, %v3412_v21  ;;  %v3803_v45 = vadd.f32 %v3799_v27, %v3413_v13  ;;  %v3934_v61 = vadd.f32 %v3930_v42, %v3544_v39  ;;  %v4061_v23 = vadd.f32 %v4057_v34, %v3671_v37 }
 0x659   : > { %v4062_v14 = vadd.f32 %v4058_v49, %v3672_v56  ;;  %v4063_v30 = vadd.f32 %v4059_v19, %v3673_v40  ;;  %v3804_v31 = vadd.f32 %v3800_v57, %v3414_v9  ;;  %v4065_v54 = vadd.f32 %v3931_v46, %v3801_v15 }
 0x65a   : > { %v4066_v10 = vadd.f32 %v3932_v1, %v3802_v26  ;;  %v4067_v8 = vadd.f32 %v3933_v17, %v3803_v45  ;;  %v4064_v20 = vadd.f32 %v4060_v50, %v3674_v2 }
 0x65b   : > { %v4068_v63 = vadd.f32 %v3934_v61, %v3804_v31  ;;  %v4069_v25 = vadd.f32 %v4065_v54, %v4061_v23 }
 0x65c   : > { %v4070_v53 = vadd.f32 %v4066_v10, %v4062_v14  ;;  %v4071_v16 = vadd.f32 %v4067_v8, %v4063_v30  ;;  %v10992_v8 = vmov 0   ;;  %v7754_v14 = vmov 2   ;;  %v7720_v30 = vld [vmem:[%s10525_s2] sm:$0xf] }
 0x65d   : > { %v4072_v6 = vadd.f32 %v4068_v63, %v4064_v20  ;;  %v4079_v5 = vadd.f32 %v4077_v4, %v4069_v25  ;;  %v7719_v20 = vld [vmem:[%s10524_s1] sm:$0xf] }
 0x65e   : > { %v4080_v22 = vadd.f32 %v4077_v4, %v4070_v53  ;;  %v4081_v7 = vadd.f32 %v4077_v4, %v4071_v16  ;;  %v7755_v53 = vmov 3  }
 0x65f   : > { %v4082_v21 = vadd.f32 %v4077_v4, %v4072_v6  ;;  %v4083_v13 = vsel %vm307_vm0, %v4079_v5, 0.0 }
 0x660   : > { %v4084_v39 = vsel %vm307_vm0, %v4080_v22, 0.0  ;;  %v4086_v9 = vsel %vm307_vm0, %v4081_v7, 0.0 }
 0x661   : > { %v4085_v37 = vadd.f32 %v4084_v39, %v4083_v13  ;;  %v4088_v56 = vsel %vm307_vm0, %v4082_v21, 0.0 }
 0x663   : > { %v4087_v28 = vadd.f32 %v4086_v9, %v4085_v37 }
 0x665   : > { %v4089_v47 = vadd.f32 %v4088_v56, %v4087_v28 }
 0x667   : > { %4090 = vadd.xlane.f32.xlu0 %v4089_v47 }
 0x6f4   : > { %v4091_v54 = vpop.xlane.xlu0 %4090 }
 0x6f5   : > { %7639 = vmatpush3.msk.msra.mxu0 %vm307_vm0, %v4091_v54 }
 0x6f6   : > { %7641 = vmatmul.mubr.msk.f32.vlgmr.msra.gmra.mrb[2].mxu0 %vm317_vm2, %v7719_v20 }
 0x6f7   : > { %4366 = vmatprep.mubr.bf16.mxu0 %v10992_v8 }
 0x7c9   : > { %v4161_v3 = vpop.f32.mrb[2].mxu0 }
 0x7ca   : > { %4167 = vperm.xlu1 %7684, %v4161_v3   ;;  %v7642_v27 = vpop.f32.mrb[3].mxu0 }
 0x7ce   : > { %7685 = vset.pattern.permute.xlu1 %v7754_v14 }
 0x849   : > { %v4168_v40 = vpop.permute.xlu1 %4167 }
 0x84a   : > { %v4170_v42 = vsub.f32 %v4079_v5, %v4168_v40  ;;  %v4171_v23 = vsub.f32 %v4080_v22, %v4168_v40  ;;  %v4172_v34 = vsub.f32 %v4081_v7, %v4168_v40  ;;  %v4173_v61 = vsub.f32 %v4082_v21, %v4168_v40 }
 0x84c   : > { %v4174_v49 = vmul.f32 %v4170_v42, %v4170_v42  ;;  %v4175_v57 = vmul.f32 %v4171_v23, %v4171_v23  ;;  %v4176_v46 = vmul.f32 %v4172_v34, %v4172_v34  ;;  %v4177_v59 = vmul.f32 %v4173_v61, %v4173_v61 }
 0x84e   : > { %v4178_v1 = vsel %vm307_vm0, %v4174_v49, 0.0  ;;  %v4179_v17 = vsel %vm307_vm0, %v4175_v57, 0.0  ;;  %v4181_v50 = vsel %vm307_vm0, %v4176_v46, 0.0  ;;  %v4183_v15 = vsel %vm307_vm0, %v4177_v59, 0.0 }
 0x84f   : > { %v4180_v19 = vadd.f32 %v4179_v17, %v4178_v1 }
 0x851   : > { %v4182_v2 = vadd.f32 %v4181_v50, %v4180_v19 }
 0x853   : > { %v4184_v26 = vadd.f32 %v4183_v15, %v4182_v2 }
 0x855   : > { %4185 = vadd.xlane.f32.xlu1 %v4184_v26 }
 0x866   : > { %4271 = vperm.xlu1 %7685, %v7720_v30  }
 0x8e2   : > { %v4186_v45 = vpop.xlane.xlu1 %4185 }
 0x8e3   : > { %7644 = vmatpush3.msk.msra.mxu1 %vm307_vm0, %v4186_v45  ;;  %vm10993_vm0 = vcmask 1041408  }
 0x8e4   : > { %7646 = vmatmul.mubr.msk.f32.vlgmr.msra.gmra.mrb[2].mxu1 %vm317_vm2, %v7719_v20  ;;  %vm10994_vm15 = vmmov %vm10993_vm0 }
 0x8e5   : > { %4407 = vmatprep.mubr.bf16.mxu1 %v10992_v8  ;;  %vm10995_vm13 = vmmov %vm10993_vm0 }
 0x8e6   : > { %v4272_v4 = vpop.permute.xlu1 %4271  ;;  %vm10996_vm14 = vmmov %vm10993_vm0 }
 0x8e7   : > { %vm10997_vm3 = vmmov %vm10993_vm0 }
 0x9b7   : > { %v4256_v31 = vpop.f32.mrb[2].mxu1 }
 0x9b8   : > { %v4257_v10 = vadd.f32 1e-05, %v4256_v31  ;;  %v7647_v63 = vpop.f32.mrb[3].mxu1 }
 0x9ba   : > { %7701 = vrsqrt.f32 %v4257_v10 }
 0x9c4   : > { %v7702_v25 = vpop.eup %7701 }
 0x9c5   : > { %4263 = vperm.xlu0 %7681, %v7702_v25  }
 0x9c9   : > { %7686 = vset.pattern.permute.xlu0 %v7755_v53  ;;  %v4318_v53 = vld [vmem:[%s10527_s4] sm:$0xf] }
 0x9ca   : > { %4279 = vperm.xlu0 %7686, %v7720_v30  }
 0xa44   : > { %v4264_v16 = vpop.permute.xlu0 %4263 }
 0xa45   : > { %v4266_v6 = vmul.f32 %v4264_v16, %v4170_v42  ;;  %v4267_v5 = vmul.f32 %v4264_v16, %v4171_v23  ;;  %v4268_v22 = vmul.f32 %v4264_v16, %v4172_v34  ;;  %v4269_v7 = vmul.f32 %v4264_v16, %v4173_v61  ;;  %v7486_v16 = vld [vmem:[%s10527_s4 + $0x4] sm:$0xf] }
 0xa47   : > { %v4274_v21 = vmul.f32 %v4272_v4, %v4266_v6  ;;  %v4275_v13 = vmul.f32 %v4272_v4, %v4267_v5  ;;  %v4276_v39 = vmul.f32 %v4272_v4, %v4268_v22  ;;  %v4277_v37 = vmul.f32 %v4272_v4, %v4269_v7  ;;  %v7491_v4 = vld [vmem:[%s10527_s4 + $0x8] sm:$0xf]  ;;  %v7496_v6 = vld [vmem:[%s10527_s4 + $0xc] sm:$0xf]  ;;  %v7501_v5 = vld [vmem:[%s10527_s4 + $0x10] sm:$0xf] }
 0xa48   : > { %v7506_v22 = vld [vmem:[%s10527_s4 + $0x14] sm:$0xf]  ;;  %v7511_v7 = vld [vmem:[%s10527_s4 + $0x18] sm:$0xf] }
 0xa49   : > { %v4280_v9 = vpop.permute.xlu0 %4279 }
 0xa4a   : > { %v4282_v28 = vadd.f32 %v4280_v9, %v4274_v21  ;;  %v4283_v56 = vadd.f32 %v4280_v9, %v4275_v13  ;;  %v4284_v47 = vadd.f32 %v4280_v9, %v4276_v39  ;;  %v4285_v54 = vadd.f32 %v4280_v9, %v4277_v37  ;;  %v7516_v21 = vld [vmem:[%s10527_s4 + $0x1c] sm:$0xf]  ;;  %v7521_v13 = vld [vmem:[%s10527_s4 + $0x20] sm:$0xf]  ;;  %v7526_v39 = vld [vmem:[%s10527_s4 + $0x24] sm:$0xf] }
 0xa4b   : > { %v7531_v37 = vld [vmem:[%s10527_s4 + $0x28] sm:$0xf]  ;;  %v7536_v9 = vld [vmem:[%s10527_s4 + $0x2c] sm:$0xf] }
 0xa4c   : > { %v7478_v20 = vmul.f32 -1.442695, %v4282_v28  ;;  %v7479_v3 = vmul.f32 -1.442695, %v4283_v56  ;;  %v7480_v27 = vmul.f32 -1.442695, %v4284_v47 }
 0xa4d   : > { %v7481_v40 = vmul.f32 -1.442695, %v4285_v54 }
 0xa4e   : > { %7703 = vpow2.f32 %v7478_v20  ;;  %v7561_v20 = vld [vmem:[%s10527_s4 + $0x40] sm:$0xf] }
 0xa4f   : > { %7705 = vpow2.f32 %v7479_v3  ;;  %v7566_v3 = vld [vmem:[%s10527_s4 + $0x44] sm:$0xf] }
 0xa50   : > { %7707 = vpow2.f32 %v7480_v27  ;;  %v7571_v27 = vld [vmem:[%s10527_s4 + $0x48] sm:$0xf] }
 0xa51   : > { %7709 = vpow2.f32 %v7481_v40  ;;  %v7576_v40 = vld [vmem:[%s10527_s4 + $0x4c] sm:$0xf] }
 0xa58   : > { %v7704_v42 = vpop.eup %7703 }
 0xa59   : > { %v7706_v23 = vpop.eup %7705  ;;  %v4298_v34 = vadd.f32 1.0, %v7704_v42  ;;  %v7581_v42 = vld [vmem:[%s10527_s4 + $0x50] sm:$0xf] }
 0xa5a   : > { %v7708_v61 = vpop.eup %7707  ;;  %v4299_v49 = vadd.f32 1.0, %v7706_v23  ;;  %v7586_v23 = vld [vmem:[%s10527_s4 + $0x54] sm:$0xf] }
 0xa5b   : > { %v7710_v57 = vpop.eup %7709  ;;  %v4300_v46 = vadd.f32 1.0, %v7708_v61  ;;  %7711 = vrcp.f32 %v4298_v34  ;;  %v7591_v34 = vld [vmem:[%s10527_s4 + $0x58] sm:$0xf]  ;;  %v7596_v61 = vld [vmem:[%s10527_s4 + $0x5c] sm:$0xf] }
 0xa5c   : > { %v4301_v59 = vadd.f32 1.0, %v7710_v57  ;;  %7713 = vrcp.f32 %v4299_v49  ;;  %v7601_v49 = vld [vmem:[%s10527_s4 + $0x60] sm:$0xf]  ;;  %v7606_v57 = vld [vmem:[%s10527_s4 + $0x64] sm:$0xf] }
 0xa5d   : > { %7715 = vrcp.f32 %v4300_v46  ;;  %v7611_v46 = vld [vmem:[%s10527_s4 + $0x68] sm:$0xf] }
 0xa5e   : > { %7717 = vrcp.f32 %v4301_v59 }
 0xa65   : > { %v7712_v1 = vpop.eup %7711 }
 0xa66   : > { %v7714_v17 = vpop.eup %7713  ;;  %v4310_v19 = vmul.f32 %v7712_v1, %v4282_v28  ;;  %v7541_v28 = vld [vmem:[%s10527_s4 + $0x30] sm:$0xf] }
 0xa67   : > { %v7716_v50 = vpop.eup %7715  ;;  %v4311_v2 = vmul.f32 %v7714_v17, %v4283_v56  ;;  %v7546_v56 = vld [vmem:[%s10527_s4 + $0x34] sm:$0xf] }
 0xa68   : > { %v7718_v15 = vpop.eup %7717  ;;  %v4312_v26 = vmul.f32 %v7716_v50, %v4284_v47  ;;  %v4314_v45 = vpack.c.bf16 %v4310_v19, %v4310_v19  ;;  %v7551_v47 = vld [vmem:[%s10527_s4 + $0x38] sm:$0xf] }
 0xa69   : > { %v4313_v14 = vmul.f32 %v7718_v15, %v4285_v54  ;;  %v9533_v30 = vpack.c.bf16 %v4311_v2, %v4311_v2  ;;  %v7556_v54 = vld [vmem:[%s10527_s4 + $0x3c] sm:$0xf] }
 0xa6a   : > { %v4316_v31 = vpack.c.bf16 %v4312_v26, %v4312_v26  ;;  %v9536_v10 = vsel %vm10993_vm0, %v4314_v45, 0 }
 0xa6b   : > { %v9538_v63 = vpack.c.bf16 %v4313_v14, %v4313_v14  ;;  %7482 = vmatprep.subr.msk.bf16.mxu0 %vm10994_vm15, %v9533_v30  ;;  %vm11001_vm15 = vmmov %vm10993_vm0 }
 0xa6c   : > { %v9543_v25 = vsel %vm10995_vm13, %v4316_v31, 0  ;;  %4335 = vmatpush1.bf16.msra.mxu0 %v9536_v10  ;;  %vm10998_vm13 = vmmov %vm10993_vm0 }
 0xa6d   : > { %7484 = vmatprep.subr.msk.bf16.mxu1 %vm10996_vm14, %v9538_v63  ;;  %7487 = vmatprep.subr.msk.bf16.mxu0 %vm10993_vm0, %v9533_v30  ;;  %vm10999_vm14 = vmmov %vm10993_vm0 }
 0xa6e   : > { %4376 = vmatpush1.bf16.msra.mxu1 %v9543_v25 }
 0xa6f   : > { %7489 = vmatprep.subr.msk.bf16.mxu1 %vm10997_vm3, %v9538_v63  ;;  %7483 = vmatmul.mubr.msk.bf16.vlgmr.msra.gmra.mrb[112].mxu0 %vm317_vm2, %v4318_v53  ;;  %vm11000_vm3 = vmmov %vm10993_vm0 }
 0xa70   : > { %4442 = vmatpush1.bf16.msra.mxu0 %v9536_v10  ;;  %4473 = vmatprep.mubr.bf16.mxu0 %v10992_v8 }
 0xa71   : > { %7485 = vmatmul.mubr.msk.bf16.vlgmr.msra.gmra.mrb[112].mxu1 %vm317_vm2, %v4318_v53  ;;  %7492 = vmatprep.subr.msk.bf16.mxu0 %vm10998_vm13, %v9533_v30  ;;  %vm11002_vm13 = vmmov %vm10993_vm0 }
 0xa72   : > { %4483 = vmatpush1.bf16.msra.mxu1 %v9543_v25  ;;  %4514 = vmatprep.mubr.bf16.mxu1 %v10992_v8 }
 0xa73   : > { %7494 = vmatprep.subr.msk.bf16.mxu1 %vm10999_vm14, %v9538_v63  ;;  %vm11003_vm14 = vmmov %vm10993_vm0 }
 0xa77   : > { %7488 = vmatmul.mubr.msk.bf16.vlgmr.msra.gmra.mrb[116].mxu0 %vm317_vm2, %v7486_v16 }
 0xa78   : > { %4549 = vmatpush1.bf16.msra.mxu0 %v9536_v10  ;;  %4580 = vmatprep.mubr.bf16.mxu0 %v10992_v8 }
 0xa79   : > { %7490 = vmatmul.mubr.msk.bf16.vlgmr.msra.gmra.mrb[116].mxu1 %vm317_vm2, %v7486_v16  ;;  %7497 = vmatprep.subr.msk.bf16.mxu0 %vm11000_vm3, %v9533_v30  ;;  %vm11004_vm3 = vmmov %vm10993_vm0 }
 0xa7a   : > { %4590 = vmatpush1.bf16.msra.mxu1 %v9543_v25  ;;  %4621 = vmatprep.mubr.bf16.mxu1 %v10992_v8 }
 0xa7b   : > { %7499 = vmatprep.subr.msk.bf16.mxu1 %vm11001_vm15, %v9538_v63  ;;  %vm11005_vm15 = vmmov %vm10993_vm0 }
 0xa7f   : > { %7493 = vmatmul.mubr.msk.bf16.vlgmr.msra.gmra.mrb[120].mxu0 %vm317_vm2, %v7491_v4 }
 0xa80   : > { %4656 = vmatpush1.bf16.msra.mxu0 %v9536_v10  ;;  %4687 = vmatprep.mubr.bf16.mxu0 %v10992_v8 }
 0xa81   : > { %7495 = vmatmul.mubr.msk.bf16.vlgmr.msra.gmra.mrb[120].mxu1 %vm317_vm2, %v7491_v4  ;;  %7502 = vmatprep.subr.msk.bf16.mxu0 %vm10993_vm0, %v9533_v30 }
 0xa82   : > { %4697 = vmatpush1.bf16.msra.mxu1 %v9543_v25  ;;  %4728 = vmatprep.mubr.bf16.mxu1 %v10992_v8 }
 0xa83   : > { %7504 = vmatprep.subr.msk.bf16.mxu1 %vm11002_vm13, %v9538_v63  ;;  %vm11006_vm13 = vmmov %vm10993_vm0 }
 0xa87   : > { %7498 = vmatmul.mubr.msk.bf16.vlgmr.msra.gmra.mrb[124].mxu0 %vm317_vm2, %v7496_v6 }
 0xa88   : > { %4763 = vmatpush1.bf16.msra.mxu0 %v9536_v10  ;;  %4794 = vmatprep.mubr.bf16.mxu0 %v10992_v8 }
 0xa89   : > { %7500 = vmatmul.mubr.msk.bf16.vlgmr.msra.gmra.mrb[124].mxu1 %vm317_vm2, %v7496_v6  ;;  %7507 = vmatprep.subr.msk.bf16.mxu0 %vm11003_vm14, %v9533_v30  ;;  %vm11007_vm14 = vmmov %vm10993_vm0 }
 0xa8a   : > { %4804 = vmatpush1.bf16.msra.mxu1 %v9543_v25  ;;  %4835 = vmatprep.mubr.bf16.mxu1 %v10992_v8 }
 0xa8b   : > { %7509 = vmatprep.subr.msk.bf16.mxu1 %vm11004_vm3, %v9538_v63  ;;  %vm11008_vm3 = vmmov %vm10993_vm0 }
 0xa8f   : > { %7503 = vmatmul.mubr.msk.bf16.vlgmr.msra.gmra.mrb[128].mxu0 %vm317_vm2, %v7501_v5 }
 0xa90   : > { %4870 = vmatpush1.bf16.msra.mxu0 %v9536_v10  ;;  %4901 = vmatprep.mubr.bf16.mxu0 %v10992_v8 }
 0xa91   : > { %7505 = vmatmul.mubr.msk.bf16.vlgmr.msra.gmra.mrb[128].mxu1 %vm317_vm2, %v7501_v5  ;;  %7512 = vmatprep.subr.msk.bf16.mxu0 %vm11005_vm15, %v9533_v30  ;;  %vm11009_vm15 = vmmov %vm10993_vm0 }
 0xa92   : > { %4911 = vmatpush1.bf16.msra.mxu1 %v9543_v25  ;;  %4942 = vmatprep.mubr.bf16.mxu1 %v10992_v8 }
 0xa93   : > { %7514 = vmatprep.subr.msk.bf16.mxu1 %vm10993_vm0, %v9538_v63 }
 0xa97   : > { %7508 = vmatmul.mubr.msk.bf16.vlgmr.msra.gmra.mrb[132].mxu0 %vm317_vm2, %v7506_v22 }
 0xa98   : > { %4977 = vmatpush1.bf16.msra.mxu0 %v9536_v10  ;;  %5008 = vmatprep.mubr.bf16.mxu0 %v10992_v8 }
 0xa99   : > { %7510 = vmatmul.mubr.msk.bf16.vlgmr.msra.gmra.mrb[132].mxu1 %vm317_vm2, %v7506_v22  ;;  %7517 = vmatprep.subr.msk.bf16.mxu0 %vm11006_vm13, %v9533_v30  ;;  %vm11010_vm13 = vmmov %vm10993_vm0 }
 0xa9a   : > { %5018 = vmatpush1.bf16.msra.mxu1 %v9543_v25  ;;  %5049 = vmatprep.mubr.bf16.mxu1 %v10992_v8 }
 0xa9b   : > { %7519 = vmatprep.subr.msk.bf16.mxu1 %vm11007_vm14, %v9538_v63  ;;  %vm11011_vm14 = vmmov %vm10993_vm0 }
 0xa9f   : > { %7513 = vmatmul.mubr.msk.bf16.vlgmr.msra.gmra.mrb[136].mxu0 %vm317_vm2, %v7511_v7 }
 0xaa0   : > { %5084 = vmatpush1.bf16.msra.mxu0 %v9536_v10  ;;  %5115 = vmatprep.mubr.bf16.mxu0 %v10992_v8 }
 0xaa1   : > { %7515 = vmatmul.mubr.msk.bf16.vlgmr.msra.gmra.mrb[136].mxu1 %vm317_vm2, %v7511_v7  ;;  %7522 = vmatprep.subr.msk.bf16.mxu0 %vm11008_vm3, %v9533_v30  ;;  %vm11012_vm3 = vmmov %vm10993_vm0 }
 0xaa2   : > { %5125 = vmatpush1.bf16.msra.mxu1 %v9543_v25  ;;  %5156 = vmatprep.mubr.bf16.mxu1 %v10992_v8 }
 0xaa3   : > { %7524 = vmatprep.subr.msk.bf16.mxu1 %vm11009_vm15, %v9538_v63  ;;  %vm11013_vm15 = vmmov %vm10993_vm0 }
 0xaa7   : > { %7518 = vmatmul.mubr.msk.bf16.vlgmr.msra.gmra.mrb[140].mxu0 %vm317_vm2, %v7516_v21 }
 0xaa8   : > { %5191 = vmatpush1.bf16.msra.mxu0 %v9536_v10  ;;  %5222 = vmatprep.mubr.bf16.mxu0 %v10992_v8 }
 0xaa9   : > { %7520 = vmatmul.mubr.msk.bf16.vlgmr.msra.gmra.mrb[140].mxu1 %vm317_vm2, %v7516_v21  ;;  %7527 = vmatprep.subr.msk.bf16.mxu0 %vm10993_vm0, %v9533_v30 }
 0xaaa   : > { %5232 = vmatpush1.bf16.msra.mxu1 %v9543_v25  ;;  %5263 = vmatprep.mubr.bf16.mxu1 %v10992_v8 }
 0xaab   : > { %7529 = vmatprep.subr.msk.bf16.mxu1 %vm11010_vm13, %v9538_v63  ;;  %vm11014_vm13 = vmmov %vm10993_vm0 }
 0xaaf   : > { %7523 = vmatmul.mubr.msk.bf16.vlgmr.msra.gmra.mrb[144].mxu0 %vm317_vm2, %v7521_v13 }
 0xab0   : > { %5298 = vmatpush1.bf16.msra.mxu0 %v9536_v10  ;;  %5329 = vmatprep.mubr.bf16.mxu0 %v10992_v8 }
 0xab1   : > { %7525 = vmatmul.mubr.msk.bf16.vlgmr.msra.gmra.mrb[144].mxu1 %vm317_vm2, %v7521_v13  ;;  %7532 = vmatprep.subr.msk.bf16.mxu0 %vm11011_vm14, %v9533_v30  ;;  %vm11015_vm14 = vmmov %vm10993_vm0 }
 0xab2   : > { %5339 = vmatpush1.bf16.msra.mxu1 %v9543_v25  ;;  %5370 = vmatprep.mubr.bf16.mxu1 %v10992_v8 }
 0xab3   : > { %7534 = vmatprep.subr.msk.bf16.mxu1 %vm11012_vm3, %v9538_v63  ;;  %vm11016_vm3 = vmmov %vm10993_vm0 }
 0xab7   : > { %7528 = vmatmul.mubr.msk.bf16.vlgmr.msra.gmra.mrb[148].mxu0 %vm317_vm2, %v7526_v39 }
 0xab8   : > { %5405 = vmatpush1.bf16.msra.mxu0 %v9536_v10  ;;  %5436 = vmatprep.mubr.bf16.mxu0 %v10992_v8 }
 0xab9   : > { %7530 = vmatmul.mubr.msk.bf16.vlgmr.msra.gmra.mrb[148].mxu1 %vm317_vm2, %v7526_v39  ;;  %7537 = vmatprep.subr.msk.bf16.mxu0 %vm11013_vm15, %v9533_v30  ;;  %vm11017_vm15 = vmmov %vm10993_vm0 }
 0xaba   : > { %5446 = vmatpush1.bf16.msra.mxu1 %v9543_v25  ;;  %5477 = vmatprep.mubr.bf16.mxu1 %v10992_v8 }
 0xabb   : > { %7539 = vmatprep.subr.msk.bf16.mxu1 %vm10993_vm0, %v9538_v63 }
 0xabf   : > { %7533 = vmatmul.mubr.msk.bf16.vlgmr.msra.gmra.mrb[152].mxu0 %vm317_vm2, %v7531_v37 }
 0xac0   : > { %5512 = vmatpush1.bf16.msra.mxu0 %v9536_v10  ;;  %5543 = vmatprep.mubr.bf16.mxu0 %v10992_v8 }
 0xac1   : > { %7535 = vmatmul.mubr.msk.bf16.vlgmr.msra.gmra.mrb[152].mxu1 %vm317_vm2, %v7531_v37  ;;  %7542 = vmatprep.subr.msk.bf16.mxu0 %vm11014_vm13, %v9533_v30  ;;  %vm11018_vm13 = vmmov %vm10993_vm0 }
 0xac2   : > { %5553 = vmatpush1.bf16.msra.mxu1 %v9543_v25  ;;  %5584 = vmatprep.mubr.bf16.mxu1 %v10992_v8 }
 0xac3   : > { %7544 = vmatprep.subr.msk.bf16.mxu1 %vm11015_vm14, %v9538_v63  ;;  %vm11019_vm14 = vmmov %vm10993_vm0 }
 0xac7   : > { %7538 = vmatmul.mubr.msk.bf16.vlgmr.msra.gmra.mrb[156].mxu0 %vm317_vm2, %v7536_v9 }
 0xac8   : > { %5619 = vmatpush1.bf16.msra.mxu0 %v9536_v10  ;;  %5650 = vmatprep.mubr.bf16.mxu0 %v10992_v8 }
 0xac9   : > { %7540 = vmatmul.mubr.msk.bf16.vlgmr.msra.gmra.mrb[156].mxu1 %vm317_vm2, %v7536_v9  ;;  %7547 = vmatprep.subr.msk.bf16.mxu0 %vm11016_vm3, %v9533_v30  ;;  %vm11020_vm3 = vmmov %vm10993_vm0 }
 0xaca   : > { %5660 = vmatpush1.bf16.msra.mxu1 %v9543_v25  ;;  %5691 = vmatprep.mubr.bf16.mxu1 %v10992_v8 }
 0xacb   : > { %7549 = vmatprep.subr.msk.bf16.mxu1 %vm11017_vm15, %v9538_v63  ;;  %vm11021_vm15 = vmmov %vm10993_vm0 }
 0xacf   : > { %7543 = vmatmul.mubr.msk.bf16.vlgmr.msra.gmra.mrb[160].mxu0 %vm317_vm2, %v7541_v28 }
 0xad0   : > { %5726 = vmatpush1.bf16.msra.mxu0 %v9536_v10  ;;  %5757 = vmatprep.mubr.bf16.mxu0 %v10992_v8 }
 0xad1   : > { %7545 = vmatmul.mubr.msk.bf16.vlgmr.msra.gmra.mrb[160].mxu1 %vm317_vm2, %v7541_v28  ;;  %7552 = vmatprep.subr.msk.bf16.mxu0 %vm10993_vm0, %v9533_v30 }
 0xad2   : > { %5767 = vmatpush1.bf16.msra.mxu1 %v9543_v25  ;;  %5798 = vmatprep.mubr.bf16.mxu1 %v10992_v8 }
 0xad3   : > { %7554 = vmatprep.subr.msk.bf16.mxu1 %vm11018_vm13, %v9538_v63  ;;  %vm11022_vm13 = vmmov %vm10993_vm0 }
 0xad7   : > { %7548 = vmatmul.mubr.msk.bf16.vlgmr.msra.gmra.mrb[164].mxu0 %vm317_vm2, %v7546_v56 }
 0xad8   : > { %5817 = vmatpush1.bf16.msra.mxu0 %v9536_v10  ;;  %5848 = vmatprep.mubr.bf16.mxu0 %v10992_v8 }
 0xad9   : > { %7550 = vmatmul.mubr.msk.bf16.vlgmr.msra.gmra.mrb[164].mxu1 %vm317_vm2, %v7546_v56  ;;  %7557 = vmatprep.subr.msk.bf16.mxu0 %vm11019_vm14, %v9533_v30  ;;  %vm11023_vm14 = vmmov %vm10993_vm0 }
 0xada   : > { %5858 = vmatpush1.bf16.msra.mxu1 %v9543_v25  ;;  %5889 = vmatprep.mubr.bf16.mxu1 %v10992_v8 }
 0xadb   : > { %7559 = vmatprep.subr.msk.bf16.mxu1 %vm11020_vm3, %v9538_v63  ;;  %vm11024_vm3 = vmmov %vm10993_vm0 }
 0xadf   : > { %7553 = vmatmul.mubr.msk.bf16.vlgmr.msra.gmra.mrb[168].mxu0 %vm317_vm2, %v7551_v47 }
 0xae0   : > { %5924 = vmatpush1.bf16.msra.mxu0 %v9536_v10  ;;  %5955 = vmatprep.mubr.bf16.mxu0 %v10992_v8 }
 0xae1   : > { %7555 = vmatmul.mubr.msk.bf16.vlgmr.msra.gmra.mrb[168].mxu1 %vm317_vm2, %v7551_v47  ;;  %7562 = vmatprep.subr.msk.bf16.mxu0 %vm11021_vm15, %v9533_v30  ;;  %vm11025_vm15 = vmmov %vm10993_vm0 }
 0xae2   : > { %5965 = vmatpush1.bf16.msra.mxu1 %v9543_v25  ;;  %5996 = vmatprep.mubr.bf16.mxu1 %v10992_v8 }
 0xae3   : > { %7564 = vmatprep.subr.msk.bf16.mxu1 %vm10993_vm0, %v9538_v63 }
 0xae7   : > { %7558 = vmatmul.mubr.msk.bf16.vlgmr.msra.gmra.mrb[172].mxu0 %vm317_vm2, %v7556_v54 }
 0xae8   : > { %6031 = vmatpush1.bf16.msra.mxu0 %v9536_v10  ;;  %6062 = vmatprep.mubr.bf16.mxu0 %v10992_v8 }
 0xae9   : > { %7560 = vmatmul.mubr.msk.bf16.vlgmr.msra.gmra.mrb[172].mxu1 %vm317_vm2, %v7556_v54  ;;  %7567 = vmatprep.subr.msk.bf16.mxu0 %vm11022_vm13, %v9533_v30  ;;  %vm11026_vm13 = vmmov %vm10993_vm0 }
 0xaea   : > { %6072 = vmatpush1.bf16.msra.mxu1 %v9543_v25  ;;  %6103 = vmatprep.mubr.bf16.mxu1 %v10992_v8 }
 0xaeb   : > { %7569 = vmatprep.subr.msk.bf16.mxu1 %vm11023_vm14, %v9538_v63  ;;  %vm11027_vm14 = vmmov %vm10993_vm0 }
 0xaef   : > { %7563 = vmatmul.mubr.msk.bf16.vlgmr.msra.gmra.mrb[176].mxu0 %vm317_vm2, %v7561_v20 }
 0xaf0   : > { %6138 = vmatpush1.bf16.msra.mxu0 %v9536_v10  ;;  %6169 = vmatprep.mubr.bf16.mxu0 %v10992_v8 }
 0xaf1   : > { %7565 = vmatmul.mubr.msk.bf16.vlgmr.msra.gmra.mrb[176].mxu1 %vm317_vm2, %v7561_v20  ;;  %7572 = vmatprep.subr.msk.bf16.mxu0 %vm11024_vm3, %v9533_v30  ;;  %vm11028_vm3 = vmmov %vm10993_vm0 }
 0xaf2   : > { %6179 = vmatpush1.bf16.msra.mxu1 %v9543_v25  ;;  %6210 = vmatprep.mubr.bf16.mxu1 %v10992_v8 }
 0xaf3   : > { %7574 = vmatprep.subr.msk.bf16.mxu1 %vm11025_vm15, %v9538_v63  ;;  %vm11029_vm15 = vmmov %vm10993_vm0 }
 0xaf7   : > { %7568 = vmatmul.mubr.msk.bf16.vlgmr.msra.gmra.mrb[180].mxu0 %vm317_vm2, %v7566_v3 }
 0xaf8   : > { %6245 = vmatpush1.bf16.msra.mxu0 %v9536_v10  ;;  %6276 = vmatprep.mubr.bf16.mxu0 %v10992_v8 }
 0xaf9   : > { %7570 = vmatmul.mubr.msk.bf16.vlgmr.msra.gmra.mrb[180].mxu1 %vm317_vm2, %v7566_v3  ;;  %7577 = vmatprep.subr.msk.bf16.mxu0 %vm10993_vm0, %v9533_v30 }
 0xafa   : > { %6286 = vmatpush1.bf16.msra.mxu1 %v9543_v25  ;;  %6317 = vmatprep.mubr.bf16.mxu1 %v10992_v8 }
 0xafb   : > { %7579 = vmatprep.subr.msk.bf16.mxu1 %vm11026_vm13, %v9538_v63  ;;  %vm11030_vm13 = vmmov %vm10993_vm0 }
 0xaff   : > { %7573 = vmatmul.mubr.msk.bf16.vlgmr.msra.gmra.mrb[184].mxu0 %vm317_vm2, %v7571_v27 }
 0xb00   : > { %6352 = vmatpush1.bf16.msra.mxu0 %v9536_v10  ;;  %6383 = vmatprep.mubr.bf16.mxu0 %v10992_v8 }
 0xb01   : > { %7575 = vmatmul.mubr.msk.bf16.vlgmr.msra.gmra.mrb[184].mxu1 %vm317_vm2, %v7571_v27  ;;  %7582 = vmatprep.subr.msk.bf16.mxu0 %vm11027_vm14, %v9533_v30  ;;  %vm11031_vm14 = vmmov %vm10993_vm0 }
 0xb02   : > { %6393 = vmatpush1.bf16.msra.mxu1 %v9543_v25  ;;  %6424 = vmatprep.mubr.bf16.mxu1 %v10992_v8 }
 0xb03   : > { %7584 = vmatprep.subr.msk.bf16.mxu1 %vm11028_vm3, %v9538_v63  ;;  %vm11032_vm3 = vmmov %vm10993_vm0 }
 0xb07   : > { %7578 = vmatmul.mubr.msk.bf16.vlgmr.msra.gmra.mrb[188].mxu0 %vm317_vm2, %v7576_v40 }
 0xb08   : > { %6459 = vmatpush1.bf16.msra.mxu0 %v9536_v10  ;;  %6490 = vmatprep.mubr.bf16.mxu0 %v10992_v8 }
 0xb09   : > { %7580 = vmatmul.mubr.msk.bf16.vlgmr.msra.gmra.mrb[188].mxu1 %vm317_vm2, %v7576_v40  ;;  %7587 = vmatprep.subr.msk.bf16.mxu0 %vm11029_vm15, %v9533_v30  ;;  %vm11033_vm15 = vmmov %vm10993_vm0 }
 0xb0a   : > { %6500 = vmatpush1.bf16.msra.mxu1 %v9543_v25  ;;  %6531 = vmatprep.mubr.bf16.mxu1 %v10992_v8 }
 0xb0b   : > { %7589 = vmatprep.subr.msk.bf16.mxu1 %vm10993_vm0, %v9538_v63 }
 0xb0f   : > { %7583 = vmatmul.mubr.msk.bf16.vlgmr.msra.gmra.mrb[192].mxu0 %vm317_vm2, %v7581_v42 }
 0xb10   : > { %6566 = vmatpush1.bf16.msra.mxu0 %v9536_v10  ;;  %6597 = vmatprep.mubr.bf16.mxu0 %v10992_v8 }
 0xb11   : > { %7585 = vmatmul.mubr.msk.bf16.vlgmr.msra.gmra.mrb[192].mxu1 %vm317_vm2, %v7581_v42  ;;  %7592 = vmatprep.subr.msk.bf16.mxu0 %vm11030_vm13, %v9533_v30  ;;  %vm11034_vm13 = vmmov %vm10993_vm0 }
 0xb12   : > { %6607 = vmatpush1.bf16.msra.mxu1 %v9543_v25  ;;  %6638 = vmatprep.mubr.bf16.mxu1 %v10992_v8 }
 0xb13   : > { %7594 = vmatprep.subr.msk.bf16.mxu1 %vm11031_vm14, %v9538_v63  ;;  %vm11035_vm14 = vmmov %vm10993_vm0 }
 0xb17   : > { %7588 = vmatmul.mubr.msk.bf16.vlgmr.msra.gmra.mrb[196].mxu0 %vm317_vm2, %v7586_v23 }
 0xb18   : > { %6673 = vmatpush1.bf16.msra.mxu0 %v9536_v10  ;;  %6704 = vmatprep.mubr.bf16.mxu0 %v10992_v8 }
 0xb19   : > { %7590 = vmatmul.mubr.msk.bf16.vlgmr.msra.gmra.mrb[196].mxu1 %vm317_vm2, %v7586_v23  ;;  %7597 = vmatprep.subr.msk.bf16.mxu0 %vm11032_vm3, %v9533_v30  ;;  %vm11036_vm3 = vmmov %vm10993_vm0 }
 0xb1a   : > { %6714 = vmatpush1.bf16.msra.mxu1 %v9543_v25  ;;  %6745 = vmatprep.mubr.bf16.mxu1 %v10992_v8 }
 0xb1b   : > { %7599 = vmatprep.subr.msk.bf16.mxu1 %vm11033_vm15, %v9538_v63  ;;  %vm11037_vm15 = vmmov %vm10993_vm0 }
 0xb1f   : > { %7593 = vmatmul.mubr.msk.bf16.vlgmr.msra.gmra.mrb[200].mxu0 %vm317_vm2, %v7591_v34 }
 0xb20   : > { %6780 = vmatpush1.bf16.msra.mxu0 %v9536_v10  ;;  %6811 = vmatprep.mubr.bf16.mxu0 %v10992_v8 }
 0xb21   : > { %7595 = vmatmul.mubr.msk.bf16.vlgmr.msra.gmra.mrb[200].mxu1 %vm317_vm2, %v7591_v34  ;;  %7602 = vmatprep.subr.msk.bf16.mxu0 %vm10993_vm0, %v9533_v30 }
 0xb22   : > { %6821 = vmatpush1.bf16.msra.mxu1 %v9543_v25  ;;  %6852 = vmatprep.mubr.bf16.mxu1 %v10992_v8 }
 0xb23   : > { %7604 = vmatprep.subr.msk.bf16.mxu1 %vm11034_vm13, %v9538_v63 }
 0xb27   : > { %7598 = vmatmul.mubr.msk.bf16.vlgmr.msra.gmra.mrb[204].mxu0 %vm317_vm2, %v7596_v61 }
 0xb28   : > { %6887 = vmatpush1.bf16.msra.mxu0 %v9536_v10  ;;  %6918 = vmatprep.mubr.bf16.mxu0 %v10992_v8 }
 0xb29   : > { %7600 = vmatmul.mubr.msk.bf16.vlgmr.msra.gmra.mrb[204].mxu1 %vm317_vm2, %v7596_v61  ;;  %7607 = vmatprep.subr.msk.bf16.mxu0 %vm11035_vm14, %v9533_v30 }
 0xb2a   : > { %6928 = vmatpush1.bf16.msra.mxu1 %v9543_v25  ;;  %6959 = vmatprep.mubr.bf16.mxu1 %v10992_v8 }
 0xb2b   : > { %7609 = vmatprep.subr.msk.bf16.mxu1 %vm11036_vm3, %v9538_v63 }
 0xb2f   : > { %7603 = vmatmul.mubr.msk.bf16.vlgmr.msra.gmra.mrb[208].mxu0 %vm317_vm2, %v7601_v49 }
 0xb30   : > { %6994 = vmatpush1.bf16.msra.mxu0 %v9536_v10  ;;  %7025 = vmatprep.mubr.bf16.mxu0 %v10992_v8 }
 0xb31   : > { %7605 = vmatmul.mubr.msk.bf16.vlgmr.msra.gmra.mrb[208].mxu1 %vm317_vm2, %v7601_v49  ;;  %7612 = vmatprep.subr.msk.bf16.mxu0 %vm11037_vm15, %v9533_v30  ;;  %vm11085_vm15 = vcmp.lt.s32.totalorder %v8468_v51, 8 }
 0xb32   : > { %7035 = vmatpush1.bf16.msra.mxu1 %v9543_v25  ;;  %7066 = vmatprep.mubr.bf16.mxu1 %v10992_v8 }
 0xb33   : > { %7614 = vmatprep.subr.msk.bf16.mxu1 %vm10993_vm0, %v9538_v63  ;;  %vm11087_vm0 = vmmov %vm11085_vm15 }
 0xb37   : > { %7608 = vmatmul.mubr.msk.bf16.vlgmr.msra.gmra.mrb[212].mxu0 %vm317_vm2, %v7606_v57 }
 0xb38   : > { %7101 = vmatpush1.bf16.msra.mxu0 %v9536_v10  ;;  %7132 = vmatprep.mubr.bf16.mxu0 %v10992_v8 }
 0xb39   : > { %7610 = vmatmul.mubr.msk.bf16.vlgmr.msra.gmra.mrb[212].mxu1 %vm317_vm2, %v7606_v57 }
 0xb3a   : > { %7142 = vmatpush1.bf16.msra.mxu1 %v9543_v25  ;;  %7173 = vmatprep.mubr.bf16.mxu1 %v10992_v8 }
 0xb3f   : > { %7613 = vmatmul.mubr.msk.bf16.vlgmr.msra.gmra.mrb[216].mxu0 %vm317_vm2, %v7611_v46 }
 0xb41   : > { %7615 = vmatmul.mubr.msk.bf16.vlgmr.msra.gmra.mrb[216].mxu1 %vm317_vm2, %v7611_v46  ;;  %vm11077_vm2 = vcmp.lt.s32.totalorder %v8468_v51, 9 }
 0xb42   : > { %v4368_v59 = vpop.f32.mrb[112].mxu0  ;;  %vm11079_vm13 = vmmov %vm11077_vm2 }
 0xb43   : > { %4416 = vrot.lane.b32.xlu1 %v4368_v59, %s7737_s8  ;;  %v4370_v1 = vpop.f32.mrb[113].mxu0  ;;  %vm11081_vm14 = vmmov %vm11077_vm2 }
 0xb44   : > { %4418 = vrot.lane.b32.xlu0 %v4370_v1, %s7737_s8  ;;  %v4409_v17 = vpop.f32.mrb[112].mxu1  ;;  %v4372_v19 = vpop.f32.mrb[114].mxu0  ;;  %vm11082_vm3 = vmmov %vm11077_vm2 }
 0xb45   : > { %v4411_v50 = vpop.f32.mrb[113].mxu1  ;;  %v4373_v2 = vpop.f32.mrb[115].mxu0 }
 0xb46   : > { %v4413_v15 = vpop.f32.mrb[114].mxu1 }
 0xb47   : > { %4420 = vrot.lane.b32.xlu1 %v4409_v17, %s7737_s8  ;;  %v4414_v8 = vpop.f32.mrb[115].mxu1 }
 0xb48   : > { %4422 = vrot.lane.b32.xlu0 %v4411_v50, %s7737_s8 }
 0xb4a   : > { %v4475_v26 = vpop.f32.mrb[116].mxu0 }
 0xb4b   : > { %4523 = vrot.lane.b32.xlu1 %v4475_v26, %s7738_s9  ;;  %v4477_v45 = vpop.f32.mrb[117].mxu0 }
 0xb4c   : > { %4525 = vrot.lane.b32.xlu0 %v4477_v45, %s7738_s9  ;;  %v4516_v14 = vpop.f32.mrb[116].mxu1  ;;  %v4479_v30 = vpop.f32.mrb[118].mxu0 }
 0xb4d   : > { %v4518_v31 = vpop.f32.mrb[117].mxu1  ;;  %v4480_v10 = vpop.f32.mrb[119].mxu0 }
 0xb4e   : > { %v4520_v63 = vpop.f32.mrb[118].mxu1 }
 0xb4f   : > { %4527 = vrot.lane.b32.xlu1 %v4516_v14, %s7738_s9  ;;  %v4521_v25 = vpop.f32.mrb[119].mxu1 }
 0xb50   : > { %4529 = vrot.lane.b32.xlu0 %v4518_v31, %s7738_s9 }
 0xb52   : > { %v4582_v53 = vpop.f32.mrb[120].mxu0 }
 0xb53   : > { %4630 = vrot.lane.b32.xlu1 %v4582_v53, %s7739_s10  ;;  %v4584_v16 = vpop.f32.mrb[121].mxu0 }
 0xb54   : > { %4632 = vrot.lane.b32.xlu0 %v4584_v16, %s7739_s10  ;;  %v4623_v4 = vpop.f32.mrb[120].mxu1  ;;  %v4586_v6 = vpop.f32.mrb[122].mxu0 }
 0xb55   : > { %v4625_v5 = vpop.f32.mrb[121].mxu1  ;;  %v4587_v22 = vpop.f32.mrb[123].mxu0 }
 0xb56   : > { %v4627_v7 = vpop.f32.mrb[122].mxu1 }
 0xb57   : > { %4634 = vrot.lane.b32.xlu1 %v4623_v4, %s7739_s10  ;;  %v4628_v21 = vpop.f32.mrb[123].mxu1 }
 0xb58   : > { %4636 = vrot.lane.b32.xlu0 %v4625_v5, %s7739_s10 }
 0xb5a   : > { %v4689_v13 = vpop.f32.mrb[124].mxu0 }
 0xb5b   : > { %4737 = vrot.lane.b32.xlu1 %v4689_v13, %s7740_s11  ;;  %v4691_v39 = vpop.f32.mrb[125].mxu0 }
 0xb5c   : > { %4739 = vrot.lane.b32.xlu0 %v4691_v39, %s7740_s11  ;;  %v4730_v37 = vpop.f32.mrb[124].mxu1  ;;  %v4693_v9 = vpop.f32.mrb[126].mxu0 }
 0xb5d   : > { %v4732_v28 = vpop.f32.mrb[125].mxu1  ;;  %v4694_v56 = vpop.f32.mrb[127].mxu0 }
 0xb5e   : > { %v4734_v47 = vpop.f32.mrb[126].mxu1 }
 0xb5f   : > { %4741 = vrot.lane.b32.xlu1 %v4730_v37, %s7740_s11  ;;  %v4735_v54 = vpop.f32.mrb[127].mxu1 }
 0xb60   : > { %4743 = vrot.lane.b32.xlu0 %v4732_v28, %s7740_s11 }
 0xb62   : > { %v4796_v20 = vpop.f32.mrb[128].mxu0 }
 0xb63   : > { %4844 = vrot.lane.b32.xlu1 %v4796_v20, %s7741_s12  ;;  %v4798_v3 = vpop.f32.mrb[129].mxu0 }
 0xb64   : > { %4846 = vrot.lane.b32.xlu0 %v4798_v3, %s7741_s12  ;;  %v4837_v27 = vpop.f32.mrb[128].mxu1  ;;  %v4800_v40 = vpop.f32.mrb[130].mxu0 }
 0xb65   : > { %v4839_v42 = vpop.f32.mrb[129].mxu1  ;;  %v4801_v23 = vpop.f32.mrb[131].mxu0 }
 0xb66   : > { %v4841_v34 = vpop.f32.mrb[130].mxu1 }
 0xb67   : > { %4848 = vrot.lane.b32.xlu1 %v4837_v27, %s7741_s12  ;;  %v4842_v61 = vpop.f32.mrb[131].mxu1 }
 0xb68   : > { %4850 = vrot.lane.b32.xlu0 %v4839_v42, %s7741_s12 }
 0xb6a   : > { %v4903_v49 = vpop.f32.mrb[132].mxu0 }
 0xb6b   : > { %4951 = vrot.lane.b32.xlu1 %v4903_v49, %s7742_s13  ;;  %v4905_v57 = vpop.f32.mrb[133].mxu0 }
 0xb6c   : > { %4953 = vrot.lane.b32.xlu0 %v4905_v57, %s7742_s13  ;;  %v4944_v46 = vpop.f32.mrb[132].mxu1  ;;  %v4907_v59 = vpop.f32.mrb[134].mxu0 }
 0xb6d   : > { %v4946_v1 = vpop.f32.mrb[133].mxu1  ;;  %v4908_v17 = vpop.f32.mrb[135].mxu0 }
 0xb6e   : > { %v4948_v19 = vpop.f32.mrb[134].mxu1 }
 0xb6f   : > { %4955 = vrot.lane.b32.xlu1 %v4944_v46, %s7742_s13  ;;  %v4949_v50 = vpop.f32.mrb[135].mxu1 }
 0xb70   : > { %4957 = vrot.lane.b32.xlu0 %v4946_v1, %s7742_s13 }
 0xb72   : > { %v5010_v2 = vpop.f32.mrb[136].mxu0 }
 0xb73   : > { %5058 = vrot.lane.b32.xlu1 %v5010_v2, %s7743_s14  ;;  %v5012_v15 = vpop.f32.mrb[137].mxu0 }
 0xb74   : > { %5060 = vrot.lane.b32.xlu0 %v5012_v15, %s7743_s14  ;;  %v5051_v8 = vpop.f32.mrb[136].mxu1  ;;  %v5014_v26 = vpop.f32.mrb[138].mxu0 }
 0xb75   : > { %v5053_v45 = vpop.f32.mrb[137].mxu1  ;;  %v5015_v14 = vpop.f32.mrb[139].mxu0  ;;  %v7756_v26 = vmov 4  }
 0xb76   : > { %v5055_v30 = vpop.f32.mrb[138].mxu1  ;;  %7687 = vset.pattern.permute.xlu1 %v7756_v26  ;;  %7688 = vset.pattern.permute.xlu0 %v7756_v26 }
 0xb77   : > { %5062 = vrot.lane.b32.xlu1 %v5051_v8, %s7743_s14  ;;  %v5056_v31 = vpop.f32.mrb[139].mxu1 }
 0xb78   : > { %5064 = vrot.lane.b32.xlu0 %v5053_v45, %s7743_s14 }
 0xb7a   : > { %v5117_v10 = vpop.f32.mrb[140].mxu0 }
 0xb7b   : > { %5165 = vrot.lane.b32.xlu1 %v5117_v10, %s7744_s15  ;;  %v5119_v63 = vpop.f32.mrb[141].mxu0 }
 0xb7c   : > { %5167 = vrot.lane.b32.xlu0 %v5119_v63, %s7744_s15  ;;  %v5158_v25 = vpop.f32.mrb[140].mxu1  ;;  %v5121_v53 = vpop.f32.mrb[142].mxu0 }
 0xb7d   : > { %v5160_v16 = vpop.f32.mrb[141].mxu1  ;;  %v5122_v4 = vpop.f32.mrb[143].mxu0 }
 0xb7e   : > { %v5162_v6 = vpop.f32.mrb[142].mxu1 }
 0xb7f   : > { %5169 = vrot.lane.b32.xlu1 %v5158_v25, %s7744_s15  ;;  %v5163_v5 = vpop.f32.mrb[143].mxu1 }
 0xb80   : > { %5171 = vrot.lane.b32.xlu0 %v5160_v16, %s7744_s15 }
 0xb82   : > { %v5224_v22 = vpop.f32.mrb[144].mxu0 }
 0xb83   : > { %5272 = vrot.lane.b32.xlu1 %v5224_v22, %s7745_s16  ;;  %v5226_v7 = vpop.f32.mrb[145].mxu0 }
 0xb84   : > { %5274 = vrot.lane.b32.xlu0 %v5226_v7, %s7745_s16  ;;  %v5265_v21 = vpop.f32.mrb[144].mxu1  ;;  %v5228_v13 = vpop.f32.mrb[146].mxu0 }
 0xb85   : > { %v5267_v39 = vpop.f32.mrb[145].mxu1  ;;  %v5229_v37 = vpop.f32.mrb[147].mxu0 }
 0xb86   : > { %v5269_v9 = vpop.f32.mrb[146].mxu1 }
 0xb87   : > { %5276 = vrot.lane.b32.xlu1 %v5265_v21, %s7745_s16  ;;  %v5270_v28 = vpop.f32.mrb[147].mxu1 }
 0xb88   : > { %5278 = vrot.lane.b32.xlu0 %v5267_v39, %s7745_s16 }
 0xb8a   : > { %v5331_v56 = vpop.f32.mrb[148].mxu0 }
 0xb8b   : > { %5379 = vrot.lane.b32.xlu1 %v5331_v56, %s7746_s17  ;;  %v5333_v47 = vpop.f32.mrb[149].mxu0 }
 0xb8c   : > { %5381 = vrot.lane.b32.xlu0 %v5333_v47, %s7746_s17  ;;  %v5372_v54 = vpop.f32.mrb[148].mxu1  ;;  %v5335_v20 = vpop.f32.mrb[150].mxu0 }
 0xb8d   : > { %v5374_v3 = vpop.f32.mrb[149].mxu1  ;;  %v5336_v27 = vpop.f32.mrb[151].mxu0 }
 0xb8e   : > { %v5376_v40 = vpop.f32.mrb[150].mxu1 }
 0xb8f   : > { %5383 = vrot.lane.b32.xlu1 %v5372_v54, %s7746_s17  ;;  %v5377_v42 = vpop.f32.mrb[151].mxu1 }
 0xb90   : > { %5385 = vrot.lane.b32.xlu0 %v5374_v3, %s7746_s17  ;;  %s11038_s17 = smov 121  }
 0xb92   : > { %v5438_v23 = vpop.f32.mrb[152].mxu0 }
 0xb93   : > { %5486 = vrot.lane.b32.xlu1 %v5438_v23, %s7747_s18  ;;  %v5440_v34 = vpop.f32.mrb[153].mxu0 }
 0xb94   : > { %5488 = vrot.lane.b32.xlu0 %v5440_v34, %s7747_s18  ;;  %v5479_v61 = vpop.f32.mrb[152].mxu1  ;;  %v5442_v49 = vpop.f32.mrb[154].mxu0 }
 0xb95   : > { %v5481_v57 = vpop.f32.mrb[153].mxu1  ;;  %v5443_v46 = vpop.f32.mrb[155].mxu0 }
 0xb96   : > { %v5483_v59 = vpop.f32.mrb[154].mxu1 }
 0xb97   : > { %5490 = vrot.lane.b32.xlu1 %v5479_v61, %s7747_s18  ;;  %v5484_v1 = vpop.f32.mrb[155].mxu1 }
 0xb98   : > { %5492 = vrot.lane.b32.xlu0 %v5481_v57, %s7747_s18  ;;  %s11039_s18 = smov 120  }
 0xb9a   : > { %v5545_v17 = vpop.f32.mrb[156].mxu0 }
 0xb9b   : > { %5593 = vrot.lane.b32.xlu1 %v5545_v17, %s7748_s19  ;;  %v5547_v19 = vpop.f32.mrb[157].mxu0 }
 0xb9c   : > { %5595 = vrot.lane.b32.xlu0 %v5547_v19, %s7748_s19  ;;  %v5586_v50 = vpop.f32.mrb[156].mxu1  ;;  %v5549_v2 = vpop.f32.mrb[158].mxu0 }
 0xb9d   : > { %v5588_v15 = vpop.f32.mrb[157].mxu1  ;;  %v5550_v8 = vpop.f32.mrb[159].mxu0 }
 0xb9e   : > { %v5590_v45 = vpop.f32.mrb[158].mxu1 }
 0xb9f   : > { %5597 = vrot.lane.b32.xlu1 %v5586_v50, %s7748_s19  ;;  %v5591_v14 = vpop.f32.mrb[159].mxu1 }
 0xba0   : > { %5599 = vrot.lane.b32.xlu0 %v5588_v15, %s7748_s19  ;;  %s11040_s19 = smov 119  }
 0xba2   : > { %v5652_v30 = vpop.f32.mrb[160].mxu0 }
 0xba3   : > { %5700 = vrot.lane.b32.xlu1 %v5652_v30, %s7749_s20  ;;  %v5654_v31 = vpop.f32.mrb[161].mxu0 }
 0xba4   : > { %5702 = vrot.lane.b32.xlu0 %v5654_v31, %s7749_s20  ;;  %v5693_v10 = vpop.f32.mrb[160].mxu1  ;;  %v5656_v63 = vpop.f32.mrb[162].mxu0 }
 0xba5   : > { %v5695_v25 = vpop.f32.mrb[161].mxu1  ;;  %v5657_v53 = vpop.f32.mrb[163].mxu0 }
 0xba6   : > { %v5697_v16 = vpop.f32.mrb[162].mxu1 }
 0xba7   : > { %5704 = vrot.lane.b32.xlu1 %v5693_v10, %s7749_s20  ;;  %v5698_v4 = vpop.f32.mrb[163].mxu1 }
 0xba8   : > { %5706 = vrot.lane.b32.xlu0 %v5695_v25, %s7749_s20 }
 0xbaa   : > { %v9944_v6 = vpop.f32.mrb[164].mxu0 }
 0xbab   : > { %v9946_v5 = vpop.f32.mrb[165].mxu0 }
 0xbac   : > { %v5763_v22 = vpop.f32.mrb[166].mxu0  ;;  %v9948_v7 = vpop.f32.mrb[164].mxu1 }
 0xbad   : > { %v5764_v21 = vpop.f32.mrb[167].mxu0  ;;  %v9950_v13 = vpop.f32.mrb[165].mxu1 }
 0xbae   : > { %v5804_v39 = vpop.f32.mrb[166].mxu1 }
 0xbaf   : > { %v5805_v37 = vpop.f32.mrb[167].mxu1 }
 0xbb2   : > { %v5850_v9 = vpop.f32.mrb[168].mxu0 }
 0xbb3   : > { %5898 = vrot.lane.b32.xlu1 %v5850_v9, %s7750_s21  ;;  %v5852_v28 = vpop.f32.mrb[169].mxu0 }
 0xbb4   : > { %5900 = vrot.lane.b32.xlu0 %v5852_v28, %s7750_s21  ;;  %v5891_v56 = vpop.f32.mrb[168].mxu1  ;;  %v5854_v47 = vpop.f32.mrb[170].mxu0 }
 0xbb5   : > { %v9954_v54 = vpop.permute.xlu1 %4416  ;;  %v5893_v20 = vpop.f32.mrb[169].mxu1 }
 0xbb6   : > { %v9956_v3 = vpop.permute.xlu0 %4418  ;;  %v5855_v27 = vpop.f32.mrb[171].mxu0 }
 0xbb7   : > { %5902 = vrot.lane.b32.xlu1 %v5891_v56, %s7750_s21  ;;  %v5895_v40 = vpop.f32.mrb[170].mxu1 }
 0xbb8   : > { %5904 = vrot.lane.b32.xlu0 %v5893_v20, %s7750_s21  ;;  %v5896_v42 = vpop.f32.mrb[171].mxu1 }
 0xbb9   : > { %v9960_v23 = vpop.permute.xlu1 %4420 }
 0xbba   : > { %v9962_v34 = vpop.permute.xlu0 %4422  ;;  %v5957_v61 = vpop.f32.mrb[172].mxu0 }
 0xbbb   : > { %6005 = vrot.lane.b32.xlu1 %v5957_v61, %s11038_s17  ;;  %v5959_v49 = vpop.f32.mrb[173].mxu0 }
 0xbbc   : > { %6007 = vrot.lane.b32.xlu0 %v5959_v49, %s11038_s17  ;;  %v5998_v57 = vpop.f32.mrb[172].mxu1  ;;  %v5961_v46 = vpop.f32.mrb[174].mxu0 }
 0xbbd   : > { %v9966_v59 = vpop.permute.xlu1 %4523  ;;  %v6000_v1 = vpop.f32.mrb[173].mxu1 }
 0xbbe   : > { %v9968_v17 = vpop.permute.xlu0 %4525  ;;  %v5962_v19 = vpop.f32.mrb[175].mxu0 }
 0xbbf   : > { %6009 = vrot.lane.b32.xlu1 %v5998_v57, %s11038_s17  ;;  %v6002_v50 = vpop.f32.mrb[174].mxu1 }
 0xbc0   : > { %6011 = vrot.lane.b32.xlu0 %v6000_v1, %s11038_s17  ;;  %v6003_v2 = vpop.f32.mrb[175].mxu1 }
 0xbc1   : > { %v9972_v15 = vpop.permute.xlu1 %4527 }
 0xbc2   : > { %v4530_v8 = vpop.permute.xlu0 %4529  ;;  %v6064_v26 = vpop.f32.mrb[176].mxu0 }
 0xbc3   : > { %6112 = vrot.lane.b32.xlu1 %v6064_v26, %s11039_s18  ;;  %v6066_v45 = vpop.f32.mrb[177].mxu0 }
 0xbc4   : > { %6114 = vrot.lane.b32.xlu0 %v6066_v45, %s11039_s18  ;;  %v6105_v14 = vpop.f32.mrb[176].mxu1  ;;  %v6068_v30 = vpop.f32.mrb[178].mxu0 }
 0xbc5   : > { %v4631_v31 = vpop.permute.xlu1 %4630  ;;  %v6107_v10 = vpop.f32.mrb[177].mxu1 }
 0xbc6   : > { %v4633_v63 = vpop.permute.xlu0 %4632  ;;  %v6069_v25 = vpop.f32.mrb[179].mxu0 }
 0xbc7   : > { %v9978_v53 = vsel %vm934_vm7, %v4631_v31, %v4633_v63  ;;  %6116 = vrot.lane.b32.xlu1 %v6105_v14, %s11039_s18  ;;  %v6109_v16 = vpop.f32.mrb[178].mxu1 }
 0xbc8   : > { %6118 = vrot.lane.b32.xlu0 %v6107_v10, %s11039_s18  ;;  %v6110_v4 = vpop.f32.mrb[179].mxu1 }
 0xbc9   : > { %v4635_v22 = vpop.permute.xlu1 %4634 }
 0xbca   : > { %v9984_v21 = vsel %vm934_vm7, %v4633_v63, %v4635_v22  ;;  %v4637_v39 = vpop.permute.xlu0 %4636  ;;  %v6171_v37 = vpop.f32.mrb[180].mxu0 }
 0xbcb   : > { %v9988_v9 = vsel %vm934_vm7, %v4635_v22, %v4637_v39  ;;  %v9992_v28 = vsel %vm934_vm7, %v4637_v39, %v4631_v31  ;;  %6219 = vrot.lane.b32.xlu1 %v6171_v37, %s11040_s19  ;;  %v6173_v56 = vpop.f32.mrb[181].mxu0  ;;  %v4531_v37 = vsel %vm803_vm5, %v9972_v15, %v4530_v8 }
 0xbcc   : > { %6221 = vrot.lane.b32.xlu0 %v6173_v56, %s11040_s19  ;;  %v6212_v47 = vpop.f32.mrb[180].mxu1  ;;  %v6175_v20 = vpop.f32.mrb[182].mxu0  ;;  %v4534_v56 = vsel %vm803_vm5, %v4530_v8, %v9966_v59 }
 0xbcd   : > { %v4738_v27 = vpop.permute.xlu1 %4737  ;;  %v6214_v40 = vpop.f32.mrb[181].mxu1 }
 0xbce   : > { %v4740_v42 = vpop.permute.xlu0 %4739  ;;  %v6176_v61 = vpop.f32.mrb[183].mxu0 }
 0xbcf   : > { %v9998_v49 = vsel %vm1065_vm6, %v4738_v27, %v4740_v42  ;;  %6223 = vrot.lane.b32.xlu1 %v6212_v47, %s11040_s19  ;;  %v6216_v57 = vpop.f32.mrb[182].mxu1 }
 0xbd0   : > { %6225 = vrot.lane.b32.xlu0 %v6214_v40, %s11040_s19  ;;  %v6217_v46 = vpop.f32.mrb[183].mxu1 }
 0xbd1   : > { %v4742_v1 = vpop.permute.xlu1 %4741  ;;  %v11041_v46 = vld [vmem:[#allocation44_spill] sm:$0xff] }
 0xbd2   : > { %v10004_v19 = vsel %vm1065_vm6, %v4740_v42, %v4742_v1  ;;  %v4744_v50 = vpop.permute.xlu0 %4743  ;;  %v6278_v2 = vpop.f32.mrb[184].mxu0 }
 0xbd3   : > { %v10008_v26 = vsel %vm1065_vm6, %v4742_v1, %v4744_v50  ;;  %v10012_v45 = vsel %vm1065_vm6, %v4744_v50, %v4738_v27  ;;  %6326 = vrot.lane.b32.xlu1 %v6278_v2, %s7737_s8  ;;  %v6280_v14 = vpop.f32.mrb[185].mxu0  ;;  %v4535_v1 = vmul.f32 %v4534_v56, %v11041_v46  ;;  %v11042_v50 = vld [vmem:[#allocation41_spill] sm:$0xff]  ;;  %v11043_v2 = vld [vmem:[#allocation55_spill] sm:$0xff] }
 0xbd4   : > { %6328 = vrot.lane.b32.xlu0 %v6280_v14, %s7737_s8  ;;  %v6319_v30 = vpop.f32.mrb[184].mxu1  ;;  %v6282_v31 = vpop.f32.mrb[186].mxu0  ;;  %v4538_v8 = vmul.f32 %v4531_v37, %v11042_v50  ;;  %v4426_v50 = vsel %vm673_vm4, %v9954_v54, %v9956_v3 }
 0xbd5   : > { %v4845_v10 = vpop.permute.xlu1 %4844  ;;  %v6321_v63 = vpop.f32.mrb[185].mxu1 }
 0xbd6   : > { %v4847_v25 = vpop.permute.xlu0 %4846  ;;  %v6283_v16 = vpop.f32.mrb[187].mxu0 }
 0xbd7   : > { %v10018_v4 = vsel %vm1196_vm8, %v4845_v10, %v4847_v25  ;;  %6330 = vrot.lane.b32.xlu1 %v6319_v30, %s7737_s8  ;;  %v6323_v22 = vpop.f32.mrb[186].mxu1  ;;  %v11044_v30 = vld [vmem:[#allocation58_spill] sm:$0xff] }
 0xbd8   : > { %6332 = vrot.lane.b32.xlu0 %v6321_v63, %s7737_s8  ;;  %v6324_v39 = vpop.f32.mrb[187].mxu1 }
 0xbd9   : > { %v4849_v47 = vpop.permute.xlu1 %4848 }
 0xbda   : > { %v10030_v20 = vsel %vm1196_vm8, %v4847_v25, %v4849_v47  ;;  %v4851_v27 = vpop.permute.xlu0 %4850  ;;  %v6385_v40 = vpop.f32.mrb[188].mxu0 }
 0xbdb   : > { %v4852_v42 = vsel %vm1196_vm8, %v4849_v47, %v4851_v27  ;;  %v4855_v61 = vsel %vm1196_vm8, %v4851_v27, %v4845_v10  ;;  %6433 = vrot.lane.b32.xlu1 %v6385_v40, %s7738_s9  ;;  %v6387_v57 = vpop.f32.mrb[189].mxu0  ;;  %v11045_v40 = vld [vmem:[#allocation49_spill] sm:$0xff] }
 0xbdc   : > { %v4856_v14 = vmul.f32 %v4855_v61, %v11043_v2  ;;  %v4859_v31 = vmul.f32 %v4852_v42, %v11044_v30  ;;  %6435 = vrot.lane.b32.xlu0 %v6387_v57, %s7738_s9  ;;  %v6426_v63 = vpop.f32.mrb[188].mxu1  ;;  %v6389_v25 = vpop.f32.mrb[190].mxu0  ;;  %v4643_v42 = vmul.f32 %v9978_v53, %v11045_v40  ;;  %v11046_v61 = vld [vmem:[#allocation65_spill] sm:$0xff] }
 0xbdd   : > { %v4952_v16 = vpop.permute.xlu1 %4951  ;;  %v6428_v22 = vpop.f32.mrb[189].mxu1  ;;  %v11050_v40 = vld [vmem:[#allocation53_spill] sm:$0xff] }
 0xbde   : > { %v10042_v39 = vadd.f32 %v4856_v14, %v4535_v1  ;;  %v10044_v10 = vadd.f32 %v4859_v31, %v4538_v8  ;;  %v4954_v47 = vpop.permute.xlu0 %4953  ;;  %v6390_v27 = vpop.f32.mrb[191].mxu0  ;;  %v11047_v8 = vld [vmem:[#allocation50_spill] sm:$0xff] }
 0xbdf   : > { %v4961_v56 = vsel %vm1327_vm9, %v4952_v16, %v4954_v47  ;;  %6437 = vrot.lane.b32.xlu1 %v6426_v63, %s7738_s9  ;;  %v6430_v37 = vpop.f32.mrb[190].mxu1  ;;  %v4644_v2 = vmul.f32 %v9984_v21, %v11047_v8  ;;  %v11048_v63 = vld [vmem:[#allocation52_spill] sm:$0xff] }
 0xbe0   : > { %v4964_v57 = vmul.f32 %v4961_v56, %v11046_v61  ;;  %6439 = vrot.lane.b32.xlu0 %v6428_v22, %s7738_s9  ;;  %v6431_v46 = vpop.f32.mrb[191].mxu1  ;;  %v4642_v25 = vmul.f32 %v9992_v28, %v11048_v63  ;;  %v11049_v22 = vld [vmem:[#allocation66_spill] sm:$0xff]  ;;  %v11054_v63 = vld [vmem:[#allocation39_spill] sm:$0xff] }
 0xbe1   : > { %v4956_v1 = vpop.permute.xlu1 %4955  ;;  %v11053_v28 = vld [vmem:[#allocation62_spill] sm:$0xff] }
 0xbe2   : > { %v10059_v14 = vadd.f32 %v4964_v57, %v4643_v42  ;;  %v4960_v30 = vsel %vm1327_vm9, %v4954_v47, %v4956_v1  ;;  %v4958_v53 = vpop.permute.xlu0 %4957  ;;  %v6492_v31 = vpop.f32.mrb[192].mxu0  ;;  %v4645_v42 = vmul.f32 %v9988_v9, %v11050_v40  ;;  %v11051_v47 = vld [vmem:[#allocation54_spill] sm:$0xff]  ;;  %v11052_v57 = vld [vmem:[#allocation61_spill] sm:$0xff]  ;;  %v4424_v9 = vsel %vm673_vm4, %v9960_v23, %v9962_v34 }
 0xbe3   : > { %v4965_v27 = vmul.f32 %v4960_v30, %v11049_v22  ;;  %v4959_v56 = vsel %vm1327_vm9, %v4956_v1, %v4958_v53  ;;  %v4962_v37 = vsel %vm1327_vm9, %v4958_v53, %v4952_v16  ;;  %6540 = vrot.lane.b32.xlu1 %v6492_v31, %s7739_s10  ;;  %v6494_v21 = vpop.f32.mrb[193].mxu0  ;;  %v4750_v61 = vmul.f32 %v9998_v49, %v11051_v47 }
 0xbe4   : > { %v4963_v46 = vmul.f32 %v4962_v37, %v11052_v57  ;;  %v4966_v8 = vmul.f32 %v4959_v56, %v11053_v28  ;;  %6542 = vrot.lane.b32.xlu0 %v6494_v21, %s7739_s10  ;;  %v6533_v30 = vpop.f32.mrb[192].mxu1  ;;  %v6496_v1 = vpop.f32.mrb[194].mxu0  ;;  %v4429_v22 = vmul.f32 %v4426_v50, %v11054_v63  ;;  %v4425_v16 = vsel %vm673_vm4, %v9956_v3, %v9960_v23  ;;  %v11055_v50 = vld [vmem:[#allocation51_spill] sm:$0xff]  ;;  %v11056_v57 = vld [vmem:[#allocation56_spill] sm:$0xff] }
 0xbe5   : > { %v10087_v49 = vadd.f32 %v4965_v27, %v4644_v2  ;;  %v5059_v53 = vpop.permute.xlu1 %5058  ;;  %v6535_v31 = vpop.f32.mrb[193].mxu1  ;;  %v4427_v56 = vsel %vm673_vm4, %v9962_v34, %v9954_v54  ;;  %v4751_v37 = vmul.f32 %v10004_v19, %v11055_v50  ;;  %v4749_v23 = vmul.f32 %v10012_v45, %v11056_v57  ;;  %v11057_v28 = vld [vmem:[#allocation40_spill] sm:$0xff]  ;;  %v11058_v1 = vld [vmem:[#allocation57_spill] sm:$0xff]  ;;  %v11061_v45 = vld [vmem:[#allocation43_spill] sm:$0xff] }
 0xbe6   : > { %v10095_v21 = vadd.f32 %v4963_v46, %v4642_v25  ;;  %v10097_v3 = vadd.f32 %v4966_v8, %v4645_v42  ;;  %v5061_v40 = vpop.permute.xlu0 %5060  ;;  %v6497_v47 = vpop.f32.mrb[195].mxu0  ;;  %v4430_v54 = vmul.f32 %v4425_v16, %v11057_v28  ;;  %v4754_v34 = vadd.f32 %v4750_v61, %v4429_v22  ;;  %v11059_v25 = vld [vmem:[#allocation67_spill] sm:$0xff]  ;;  %v11060_v8 = vld [vmem:[#allocation42_spill] sm:$0xff] }
 0xbe7   : > { %v5068_v2 = vsel %vm1458_vm10, %v5059_v53, %v5061_v40  ;;  %6544 = vrot.lane.b32.xlu1 %v6533_v30, %s7739_s10  ;;  %v6537_v27 = vpop.f32.mrb[194].mxu1  ;;  %v4752_v19 = vmul.f32 %v10008_v26, %v11058_v1  ;;  %v4428_v63 = vmul.f32 %v4427_v56, %v11060_v8  ;;  %v4431_v50 = vmul.f32 %v4424_v9, %v11061_v45  ;;  %v11063_v28 = vld [vmem:[#allocation59_spill] sm:$0xff]  ;;  %v11065_v1 = vld [vmem:[#allocation70_spill] sm:$0xff] }
 0xbe8   : > { %v5071_v42 = vmul.f32 %v5068_v2, %v11059_v25  ;;  %6546 = vrot.lane.b32.xlu0 %v6535_v31, %s7739_s10  ;;  %v6538_v46 = vpop.f32.mrb[195].mxu1  ;;  %v4533_v30 = vsel %vm803_vm5, %v9966_v59, %v9968_v17  ;;  %v4755_v16 = vadd.f32 %v4751_v37, %v4430_v54  ;;  %v11062_v2 = vld [vmem:[#allocation68_spill] sm:$0xff]  ;;  %v4857_v54 = vmul.f32 %v10018_v4, %v11063_v28  ;;  %s11159_s10 = sshll.u32 %s11161_s25, 4 }
 0xbe9   : > { %v5063_v47 = vpop.permute.xlu1 %5062  ;;  %v4753_v31 = vadd.f32 %v4749_v23, %v4428_v63  ;;  %v4756_v37 = vadd.f32 %v4752_v19, %v4431_v50  ;;  %v4532_v19 = vsel %vm803_vm5, %v9968_v17, %v9972_v15  ;;  %v11069_v15 = vld [vmem:[#allocation48_spill] sm:$0xff] }
 0xbea   : > { %v10115_v61 = vadd.f32 %v5071_v42, %v4754_v34  ;;  %v5067_v26 = vsel %vm1458_vm10, %v5061_v40, %v5063_v47  ;;  %v5065_v22 = vpop.permute.xlu0 %5064  ;;  %v6599_v57 = vpop.f32.mrb[196].mxu0  ;;  %v11064_v34 = vld [vmem:[#allocation69_spill] sm:$0xff] }
 0xbeb   : > { %v5072_v27 = vmul.f32 %v5067_v26, %v11062_v2  ;;  %v5066_v9 = vsel %vm1458_vm10, %v5063_v47, %v5065_v22  ;;  %v5069_v56 = vsel %vm1458_vm10, %v5065_v22, %v5059_v53  ;;  %6647 = vrot.lane.b32.xlu1 %v6599_v57, %s7740_s11  ;;  %v6601_v59 = vpop.f32.mrb[197].mxu0  ;;  %v11066_v53 = vld [vmem:[#allocation47_spill] sm:$0xff]  ;;  %v11067_v22 = vld [vmem:[#allocation60_spill] sm:$0xff] }
 0xbec   : > { %v5070_v40 = vmul.f32 %v5069_v56, %v11064_v34  ;;  %v5073_v25 = vmul.f32 %v5066_v9, %v11065_v1  ;;  %6649 = vrot.lane.b32.xlu0 %v6601_v59, %s7740_s11  ;;  %v6640_v23 = vpop.f32.mrb[196].mxu1  ;;  %v6603_v42 = vpop.f32.mrb[198].mxu0  ;;  %v4536_v45 = vmul.f32 %v4533_v30, %v11066_v53  ;;  %v4858_v57 = vmul.f32 %v10030_v20, %v11067_v22  ;;  %v11072_v53 = vld [vmem:[#allocation72_spill] sm:$0xff] }
 0xbed   : > { %v10130_v46 = vadd.f32 %v5072_v27, %v4755_v16  ;;  %v5166_v8 = vpop.permute.xlu1 %5165  ;;  %v6642_v63 = vpop.f32.mrb[197].mxu1  ;;  %v11068_v27 = vld [vmem:[#allocation73_spill] sm:$0xff]  ;;  %v11071_v42 = vld [vmem:[#allocation71_spill] sm:$0xff] }
 0xbee   : > { %v10137_v4 = vadd.f32 %v5070_v40, %v4753_v31  ;;  %v10139_v50 = vadd.f32 %v5073_v25, %v4756_v37  ;;  %v5168_v47 = vpop.permute.xlu0 %5167  ;;  %v6604_v26 = vpop.f32.mrb[199].mxu0  ;;  %v4861_v2 = vadd.f32 %v4857_v54, %v4536_v45  ;;  %v4537_v31 = vmul.f32 %v4532_v19, %v11069_v15  ;;  %v11070_v40 = vld [vmem:[#allocation74_spill] sm:$0xff] }
 0xbef   : > { %v5175_v16 = vsel %vm1589_vm11, %v5166_v8, %v5168_v47  ;;  %6651 = vrot.lane.b32.xlu1 %v6640_v23, %s7740_s11  ;;  %v6644_v30 = vpop.f32.mrb[198].mxu1 }
 0xbf0   : > { %v5178_v9 = vmul.f32 %v5175_v16, %v11068_v27  ;;  %6653 = vrot.lane.b32.xlu0 %v6642_v63, %s7740_s11  ;;  %v6645_v17 = vpop.f32.mrb[199].mxu1  ;;  %v4862_v34 = vadd.f32 %v4858_v57, %v4537_v31 }
 0xbf1   : > { %v5170_v56 = vpop.permute.xlu1 %5169  ;;  %v11073_v17 = vld [vmem:[#allocation75_spill] sm:$0xff] }
 0xbf2   : > { %v10149_v59 = vadd.f32 %v5178_v9, %v4861_v2  ;;  %v5174_v20 = vsel %vm1589_vm11, %v5168_v47, %v5170_v56  ;;  %v5172_v37 = vpop.permute.xlu0 %5171  ;;  %v6706_v28 = vpop.f32.mrb[200].mxu0 }
 0xbf3   : > { %v5179_v1 = vmul.f32 %v5174_v20, %v11070_v40  ;;  %v5173_v54 = vsel %vm1589_vm11, %v5170_v56, %v5172_v37  ;;  %v5176_v25 = vsel %vm1589_vm11, %v5172_v37, %v5166_v8  ;;  %6754 = vrot.lane.b32.xlu1 %v6706_v28, %s7741_s12  ;;  %v6708_v23 = vpop.f32.mrb[201].mxu0  ;;  %v11074_v28 = vld [vmem:[#allocation76_spill] sm:$0xff] }
 0xbf4   : > { %v5177_v63 = vmul.f32 %v5176_v25, %v11071_v42  ;;  %v5180_v45 = vmul.f32 %v5173_v54, %v11072_v53  ;;  %6756 = vrot.lane.b32.xlu0 %v6708_v23, %s7741_s12  ;;  %v6747_v19 = vpop.f32.mrb[200].mxu1  ;;  %v6710_v47 = vpop.f32.mrb[202].mxu0  ;;  %v11075_v25 = vld [vmem:[#allocation77_spill] sm:$0xff] }
 0xbf5   : > { %v10162_v26 = vadd.f32 %v5179_v1, %v4862_v34  ;;  %v5273_v22 = vpop.permute.xlu1 %5272  ;;  %v6749_v57 = vpop.f32.mrb[201].mxu1 }
 0xbf6   : > { %v10165_v16 = vadd.f32 %v5177_v63, %v10042_v39  ;;  %v10168_v8 = vadd.f32 %v5180_v45, %v10044_v10  ;;  %v5275_v30 = vpop.permute.xlu0 %5274  ;;  %v6711_v2 = vpop.f32.mrb[203].mxu0 }
 0xbf7   : > { %v5282_v27 = vsel %vm1720_vm12, %v5273_v22, %v5275_v30  ;;  %6758 = vrot.lane.b32.xlu1 %v6747_v19, %s7741_s12  ;;  %v6751_v9 = vpop.f32.mrb[202].mxu1 }
 0xbf8   : > { %v5285_v15 = vmul.f32 %v5282_v27, %v11073_v17  ;;  %6760 = vrot.lane.b32.xlu0 %v6749_v57, %s7741_s12  ;;  %v6752_v31 = vpop.f32.mrb[203].mxu1  ;;  %v11078_v17 = vld [vmem:[#allocation83_spill] sm:$0xff] }
 0xbf9   : > { %v5277_v56 = vpop.permute.xlu1 %5276 }
 0xbfa   : > { %v10176_v39 = vadd.f32 %v5285_v15, %v10059_v14  ;;  %v5281_v10 = vsel %vm1720_vm12, %v5275_v30, %v5277_v56  ;;  %v5279_v20 = vpop.permute.xlu0 %5278  ;;  %v6813_v37 = vpop.f32.mrb[204].mxu0  ;;  %v11076_v14 = vld [vmem:[#allocation78_spill] sm:$0xff] }
 0xbfb   : > { %v5286_v34 = vmul.f32 %v5281_v10, %v11074_v28  ;;  %v5280_v40 = vsel %vm1720_vm12, %v5277_v56, %v5279_v20  ;;  %v5283_v1 = vsel %vm1720_vm12, %v5279_v20, %v5273_v22  ;;  %6861 = vrot.lane.b32.xlu1 %v6813_v37, %s7742_s13  ;;  %v6815_v54 = vpop.f32.mrb[205].mxu0  ;;  %v11080_v20 = vld [vmem:[#allocation84_spill] sm:$0xff] }
 0xbfc   : > { %v5284_v23 = vmul.f32 %v5283_v1, %v11075_v25  ;;  %v5287_v42 = vmul.f32 %v5280_v40, %v11076_v14  ;;  %6863 = vrot.lane.b32.xlu0 %v6815_v54, %s7742_s13  ;;  %v6854_v63 = vpop.f32.mrb[204].mxu1  ;;  %v6817_v53 = vpop.f32.mrb[206].mxu0  ;;  %v11083_v1 = vld [vmem:[#allocation79_spill] sm:$0xff] }
 0xbfd   : > { %v10190_v45 = vadd.f32 %v5286_v34, %v10087_v49  ;;  %v5380_v19 = vpop.permute.xlu1 %5379  ;;  %v6856_v47 = vpop.f32.mrb[205].mxu1 }
 0xbfe   : > { %v10193_v57 = vadd.f32 %v5284_v23, %v10095_v21  ;;  %v10196_v22 = vadd.f32 %v5287_v42, %v10097_v3  ;;  %v5382_v30 = vpop.permute.xlu0 %5381  ;;  %v6818_v2 = vpop.f32.mrb[207].mxu0 }
 0xbff   : > { %v5389_v27 = vsel %vm11077_vm2, %v5380_v19, %v5382_v30  ;;  %6865 = vrot.lane.b32.xlu1 %v6854_v63, %s7742_s13  ;;  %v6858_v9 = vpop.f32.mrb[206].mxu1  ;;  %vm11089_vm2 = vmmov %vm11087_vm0 }
 0xc00   : > { %v5392_v15 = vmul.f32 %v5389_v27, %v11078_v17  ;;  %6867 = vrot.lane.b32.xlu0 %v6856_v47, %s7742_s13  ;;  %v6859_v49 = vpop.f32.mrb[207].mxu1  ;;  %v11086_v17 = vld [vmem:[#allocation85_spill] sm:$0xff]  ;;  %s295_s13 = scalar_lea.vmem %s10530_s7, %s11159_s10 }
 0xc01   : > { %v5384_v31 = vpop.permute.xlu1 %5383 }
 0xc02   : > { %v10204_v21 = vadd.f32 %v5392_v15, %v10115_v61  ;;  %v5388_v3 = vsel %vm11079_vm13, %v5382_v30, %v5384_v31  ;;  %v5386_v56 = vpop.permute.xlu0 %5385  ;;  %v6920_v10 = vpop.f32.mrb[208].mxu0  ;;  %v11084_v61 = vld [vmem:[#allocation80_spill] sm:$0xff]  ;;  %vm11090_vm13 = vmmov %vm11087_vm0 }
 0xc03   : > { %v5393_v37 = vmul.f32 %v5388_v3, %v11080_v20  ;;  %v5387_v28 = vsel %vm11081_vm14, %v5384_v31, %v5386_v56  ;;  %v5390_v34 = vsel %vm11082_vm3, %v5386_v56, %v5380_v19  ;;  %6968 = vrot.lane.b32.xlu1 %v6920_v10, %s7743_s14  ;;  %v6922_v40 = vpop.f32.mrb[209].mxu0  ;;  %v11088_v56 = vld [vmem:[#allocation86_spill] sm:$0xff]  ;;  %vm11093_vm14 = vcmp.lt.s32.totalorder %v8468_v51, 7 }
 0xc04   : > { %v5391_v54 = vmul.f32 %v5390_v34, %v11083_v1  ;;  %v5394_v25 = vmul.f32 %v5387_v28, %v11084_v61  ;;  %6970 = vrot.lane.b32.xlu0 %v6922_v40, %s7743_s14  ;;  %v6961_v23 = vpop.f32.mrb[208].mxu1  ;;  %v6924_v14 = vpop.f32.mrb[210].mxu0  ;;  %v11091_v34 = vld [vmem:[#allocation87_spill] sm:$0xff]  ;;  %v11092_v1 = vld [vmem:[#allocation88_spill] sm:$0xff]  ;;  %vm11095_vm3 = vmmov %vm11093_vm14 }
 0xc05   : > { %v10218_v42 = vadd.f32 %v5393_v37, %v10130_v46  ;;  %v5487_v63 = vpop.permute.xlu1 %5486  ;;  %v6963_v53 = vpop.f32.mrb[209].mxu1 }
 0xc06   : > { %v10221_v47 = vadd.f32 %v5391_v54, %v10137_v4  ;;  %v10224_v19 = vadd.f32 %v5394_v25, %v10139_v50  ;;  %v5489_v30 = vpop.permute.xlu0 %5488  ;;  %v6925_v2 = vpop.f32.mrb[211].mxu0 }
 0xc07   : > { %v5496_v27 = vsel %vm11085_vm15, %v5487_v63, %v5489_v30  ;;  %6972 = vrot.lane.b32.xlu1 %v6961_v23, %s7743_s14  ;;  %v6965_v9 = vpop.f32.mrb[210].mxu1  ;;  %vm11097_vm15 = vmmov %vm11095_vm3 }
 0xc08   : > { %v5499_v15 = vmul.f32 %v5496_v27, %v11086_v17  ;;  %6974 = vrot.lane.b32.xlu0 %v6963_v53, %s7743_s14  ;;  %v6966_v46 = vpop.f32.mrb[211].mxu1 }
 0xc09   : > { %v5491_v49 = vpop.permute.xlu1 %5490 }
 0xc0a   : > { %v5503_v4 = vadd.f32 %v5499_v15, %v10149_v59  ;;  %v5495_v50 = vsel %vm11087_vm0, %v5489_v30, %v5491_v49  ;;  %v5493_v31 = vpop.permute.xlu0 %5492  ;;  %v7027_v3 = vpop.f32.mrb[212].mxu0  ;;  %vm11098_vm0 = vmmov %vm11095_vm3 }
 0xc0b   : > { %v5500_v10 = vmul.f32 %v5495_v50, %v11088_v56  ;;  %v5494_v20 = vsel %vm11089_vm2, %v5491_v49, %v5493_v31  ;;  %v5497_v37 = vsel %vm11090_vm13, %v5493_v31, %v5487_v63  ;;  %7075 = vrot.lane.b32.xlu1 %v7027_v3, %s7744_s15  ;;  %v7029_v28 = vpop.f32.mrb[213].mxu0  ;;  %v11096_v3 = vld [vmem:[#allocation90_spill] sm:$0xff]  ;;  %vm11105_vm2 = vcmp.lt.s32.totalorder %v8468_v51, 127 }
 0xc0c   : > { %v5498_v40 = vmul.f32 %v5497_v37, %v11091_v34  ;;  %v5501_v59 = vmul.f32 %v5494_v20, %v11092_v1  ;;  %7077 = vrot.lane.b32.xlu0 %v7029_v28, %s7744_s15  ;;  %v7068_v54 = vpop.f32.mrb[212].mxu1  ;;  %v7031_v61 = vpop.f32.mrb[214].mxu0  ;;  %v10244_v25 = vadd.f32 %v9946_v5, %v5503_v4  ;;  %v11094_v5 = vld [vmem:[#allocation89_spill] sm:$0xff]  ;;  %v11099_v20 = vld [vmem:[#allocation91_spill] sm:$0xff]  ;;  %v11100_v28 = vld [vmem:[#allocation92_spill] sm:$0xff] }
 0xc0d   : > { %v5504_v23 = vadd.f32 %v5500_v10, %v10162_v26  ;;  %v5594_v14 = vpop.permute.xlu1 %5593  ;;  %v7070_v53 = vpop.f32.mrb[213].mxu1 }
 0xc0e   : > { %v5502_v63 = vadd.f32 %v5498_v40, %v10165_v16  ;;  %v5505_v30 = vadd.f32 %v5501_v59, %v10168_v8  ;;  %v5596_v2 = vpop.permute.xlu0 %5595  ;;  %v7032_v27 = vpop.f32.mrb[215].mxu0 }
 0xc0f   : > { %v5603_v9 = vsel %vm11093_vm14, %v5594_v14, %v5596_v2  ;;  %7079 = vrot.lane.b32.xlu1 %v7068_v54, %s7744_s15  ;;  %v7072_v17 = vpop.f32.mrb[214].mxu1  ;;  %v10253_v15 = vadd.f32 %v9948_v7, %v5504_v23 }
 0xc10   : > { %v5606_v46 = vmul.f32 %v5603_v9, %v11094_v5  ;;  %7081 = vrot.lane.b32.xlu0 %v7070_v53, %s7744_s15  ;;  %v7073_v26 = vpop.f32.mrb[215].mxu1  ;;  %v10258_v16 = vadd.f32 %v9944_v6, %v5502_v63  ;;  %v10261_v8 = vadd.f32 %v9950_v13, %v5505_v30  ;;  %v11102_v5 = vld [vmem:[#allocation96_spill] sm:$0xff] }
 0xc11   : > { %v5598_v49 = vpop.permute.xlu1 %5597 }
 0xc12   : > { %v5610_v4 = vadd.f32 %v5606_v46, %v10176_v39  ;;  %v5602_v50 = vsel %vm11095_vm3, %v5596_v2, %v5598_v49  ;;  %v5600_v31 = vpop.permute.xlu0 %5599  ;;  %v7134_v7 = vpop.f32.mrb[216].mxu0  ;;  %v11101_v2 = vld [vmem:[#allocation95_spill] sm:$0xff]  ;;  %vm11112_vm3 = vcmp.lt.s32.totalorder %v8468_v51, 121 }
 0xc13   : > { %v5607_v56 = vmul.f32 %v5602_v50, %v11096_v3  ;;  %v5601_v10 = vsel %vm11097_vm15, %v5598_v49, %v5600_v31  ;;  %v5604_v6 = vsel %vm11098_vm0, %v5600_v31, %v5594_v14  ;;  %7182 = vrot.lane.b32.xlu1 %v7134_v7, %s7745_s16  ;;  %v7136_v13 = vpop.f32.mrb[217].mxu0  ;;  %v7721_v50 = vld [vmem:[%s10525_s2] sm:$0xf]  ;;  %v11103_v31 = vld [vmem:[#allocation93_spill] sm:$0xff]  ;;  %vm11113_vm15 = vmmov %vm11112_vm3 }
 0xc14   : > { %v5605_v37 = vmul.f32 %v5604_v6, %v11099_v20  ;;  %v5608_v39 = vmul.f32 %v5601_v10, %v11100_v28  ;;  %7184 = vrot.lane.b32.xlu0 %v7136_v13, %s7745_s16  ;;  %v7175_v34 = vpop.f32.mrb[216].mxu1  ;;  %v7138_v40 = vpop.f32.mrb[218].mxu0  ;;  %v11106_v28 = vld [vmem:[#allocation97_spill] sm:$0xff]  ;;  %vm11114_vm0 = vmmov %vm11112_vm3 }
 0xc15   : > { %v5611_v1 = vadd.f32 %v5607_v56, %v10190_v45  ;;  %v5701_v59 = vpop.permute.xlu1 %5700  ;;  %v7177_v54 = vpop.f32.mrb[217].mxu1 }
 0xc16   : > { %v5609_v61 = vadd.f32 %v5605_v37, %v10193_v57  ;;  %v5612_v23 = vadd.f32 %v5608_v39, %v10196_v22  ;;  %v5703_v14 = vpop.permute.xlu0 %5702  ;;  %v7139_v53 = vpop.f32.mrb[219].mxu0 }
 0xc17   : > { %v5710_v63 = vsel %vm2244_vm1, %v5701_v59, %v5703_v14  ;;  %7186 = vrot.lane.b32.xlu1 %v7175_v34, %s7745_s16  ;;  %v7179_v30 = vpop.f32.mrb[218].mxu1 }
 0xc18   : > { %v5713_v27 = vmul.f32 %v5710_v63, %v11101_v2  ;;  %7188 = vrot.lane.b32.xlu0 %v7177_v54, %s7745_s16  ;;  %v7180_v9 = vpop.f32.mrb[219].mxu1 }
 0xc19   : > { %v5705_v45 = vpop.permute.xlu1 %5704 }
 0xc1a   : > { %v5717_v17 = vadd.f32 %v5713_v27, %v10204_v21  ;;  %v5709_v57 = vsel %vm2244_vm1, %v5703_v14, %v5705_v45  ;;  %v5707_v22 = vpop.permute.xlu0 %5706  ;;  %v11104_v21 = vld [vmem:[#allocation94_spill] sm:$0xff] }
 0xc1b   : > { %v5714_v46 = vmul.f32 %v5709_v57, %v11102_v5  ;;  %v5708_v26 = vsel %vm2244_vm1, %v5705_v45, %v5707_v22  ;;  %v5711_v49 = vsel %vm2244_vm1, %v5707_v22, %v5701_v59  ;;  %7211 = vperm.xlu1 %7687, %v7721_v50   ;;  %vm11107_vm1 = vmmov %vm11105_vm2  ;;  %v11108_v14 = vld [vmem:[#allocation98_spill] sm:$0xff] }
 0xc1c   : > { %v5712_v7 = vmul.f32 %v5711_v49, %v11103_v31  ;;  %v5715_v3 = vmul.f32 %v5708_v26, %v11104_v21  ;;  %vm11109_vm13 = vmmov %vm11107_vm1 }
 0xc1d   : > { %v5718_v56 = vadd.f32 %v5714_v46, %v10218_v42  ;;  %vm11110_vm14 = vmmov %vm11107_vm1 }
 0xc1e   : > { %v5716_v10 = vadd.f32 %v5712_v7, %v10221_v47  ;;  %v5719_v6 = vadd.f32 %v5715_v3, %v10224_v19  ;;  %v11111_v19 = vld [vmem:[#allocation101_spill] sm:$0xff] }
 0xc25   : > { %v5899_v13 = vpop.permute.xlu1 %5898 }
 0xc26   : > { %v5901_v20 = vpop.permute.xlu0 %5900 }
 0xc27   : > { %v5908_v37 = vsel %vm11105_vm2, %v5899_v13, %v5901_v20  ;;  %vm11115_vm2 = vmmov %vm11114_vm0 }
 0xc28   : > { %v5910_v39 = vmul.f32 %v5908_v37, %v11106_v28 }
 0xc29   : > { %v5903_v34 = vpop.permute.xlu1 %5902 }
 0xc2a   : > { %v5914_v40 = vadd.f32 %v5910_v39, %v5609_v61  ;;  %v5907_v59 = vsel %vm11107_vm1, %v5901_v20, %v5903_v34  ;;  %v5905_v54 = vpop.permute.xlu0 %5904  ;;  %vm11117_vm1 = vcmp.lt.s32.totalorder %v8468_v51, 120  ;;  %v11120_v39 = vld [vmem:[#allocation108_spill] sm:$0xff] }
 0xc2b   : > { %v5911_v53 = vmul.f32 %v5907_v59, %v11108_v14  ;;  %v5906_v42 = vsel %vm11109_vm13, %v5903_v34, %v5905_v54  ;;  %v5909_v47 = vsel %vm11110_vm14, %v5905_v54, %v5899_v13  ;;  %v11118_v13 = vld [vmem:[#allocation107_spill] sm:$0xff]  ;;  %vm11119_vm13 = vmmov %vm11117_vm1  ;;  %v11123_v59 = vld [vmem:[#allocation109_spill] sm:$0xff] }
 0xc2c   : > { %v5912_v63 = vmul.f32 %v5906_v42, %v11111_v19  ;;  %v5913_v30 = vmul.f32 %v5909_v47, %v10933_v43  ;;  %vm11121_vm14 = vmmov %vm11117_vm1  ;;  %v11124_v14 = vld [vmem:[#allocation110_spill] sm:$0xff] }
 0xc2d   : > { %v5915_v2 = vadd.f32 %v5911_v53, %v5610_v4  ;;  %v6006_v27 = vpop.permute.xlu1 %6005 }
 0xc2e   : > { %v5916_v9 = vadd.f32 %v5912_v63, %v5611_v1  ;;  %v5917_v61 = vadd.f32 %v5913_v30, %v5612_v23  ;;  %v6008_v45 = vpop.permute.xlu0 %6007  ;;  %v11116_v23 = vld [vmem:[#allocation106_spill] sm:$0xff] }
 0xc2f   : > { %v6015_v57 = vsel %vm11112_vm3, %v6006_v27, %v6008_v45  ;;  %vm11122_vm3 = vmmov %vm11117_vm1 }
 0xc30   : > { %v6017_v22 = vmul.f32 %v6015_v57, %v10934_v62 }
 0xc31   : > { %v6010_v5 = vpop.permute.xlu1 %6009 }
 0xc32   : > { %v10314_v46 = vadd.f32 %v6017_v22, %v5716_v10  ;;  %v6014_v26 = vsel %vm11113_vm15, %v6008_v45, %v6010_v5  ;;  %v6012_v49 = vpop.permute.xlu0 %6011  ;;  %vm11125_vm15 = vcmp.lt.s32.totalorder %v8468_v51, 119 }
 0xc33   : > { %v6018_v50 = vmul.f32 %v6014_v26, %v10935_v24  ;;  %v6013_v43 = vsel %vm11114_vm0, %v6010_v5, %v6012_v49  ;;  %v6016_v4 = vsel %vm11115_vm2, %v6012_v49, %v6006_v27  ;;  %v11126_v27 = vld [vmem:[#allocation111_spill] sm:$0xff]  ;;  %vm11127_vm0 = vmmov %vm11125_vm15  ;;  %v11128_v26 = vld [vmem:[#allocation112_spill] sm:$0xff] }
 0xc34   : > { %v6019_v1 = vmul.f32 %v6013_v43, %v10941_v18  ;;  %v6020_v31 = vmul.f32 %v6016_v4, %v11116_v23  ;;  %vm11129_vm2 = vmmov %vm11127_vm0  ;;  %v11132_v4 = vld [vmem:[#allocation114_spill] sm:$0xff] }
 0xc35   : > { %v10325_v62 = vadd.f32 %v6018_v50, %v5717_v17  ;;  %v6113_v7 = vpop.permute.xlu1 %6112  ;;  %v11131_v50 = vld [vmem:[#allocation113_spill] sm:$0xff] }
 0xc36   : > { %v10327_v21 = vadd.f32 %v6019_v1, %v5718_v56  ;;  %v10329_v3 = vadd.f32 %v6020_v31, %v5719_v6  ;;  %v6115_v10 = vpop.permute.xlu0 %6114 }
 0xc37   : > { %v6122_v24 = vsel %vm11117_vm1, %v6113_v7, %v6115_v10  ;;  %vm11130_vm1 = vmmov %vm11127_vm0 }
 0xc38   : > { %v6124_v20 = vmul.f32 %v6122_v24, %v11118_v13 }
 0xc39   : > { %v6117_v37 = vpop.permute.xlu1 %6116 }
 0xc3a   : > { %v10335_v28 = vadd.f32 %v6124_v20, %v10258_v16  ;;  %v6121_v18 = vsel %vm11119_vm13, %v6115_v10, %v6117_v37  ;;  %v6119_v17 = vpop.permute.xlu0 %6118 }
 0xc3b   : > { %v6125_v34 = vmul.f32 %v6121_v18, %v11120_v39  ;;  %v6120_v56 = vsel %vm11121_vm14, %v6117_v37, %v6119_v17  ;;  %v6123_v6 = vsel %vm11122_vm3, %v6119_v17, %v6113_v7 }
 0xc3c   : > { %v6126_v54 = vmul.f32 %v6120_v56, %v11123_v59  ;;  %v6127_v53 = vmul.f32 %v6123_v6, %v11124_v14 }
 0xc3d   : > { %v10347_v42 = vadd.f32 %v6125_v34, %v10244_v25  ;;  %v6220_v16 = vpop.permute.xlu1 %6219 }
 0xc3e   : > { %v10350_v47 = vadd.f32 %v6126_v54, %v10253_v15  ;;  %v10353_v19 = vadd.f32 %v6127_v53, %v10261_v8  ;;  %v6222_v63 = vpop.permute.xlu0 %6221 }
 0xc3f   : > { %v6229_v30 = vsel %vm11125_vm15, %v6220_v16, %v6222_v63 }
 0xc40   : > { %v6231_v45 = vmul.f32 %v6229_v30, %v11126_v27 }
 0xc41   : > { %v6224_v57 = vpop.permute.xlu1 %6223 }
 0xc42   : > { %v10358_v22 = vadd.f32 %v6231_v45, %v5914_v40  ;;  %v6228_v25 = vsel %vm11127_vm0, %v6222_v63, %v6224_v57  ;;  %v6226_v5 = vpop.permute.xlu0 %6225 }
 0xc43   : > { %v6232_v49 = vmul.f32 %v6228_v25, %v11128_v26  ;;  %v6227_v15 = vsel %vm11129_vm2, %v6224_v57, %v6226_v5  ;;  %v6230_v8 = vsel %vm11130_vm1, %v6226_v5, %v6220_v16  ;;  %v11134_v26 = vld [vmem:[#allocation115_spill] sm:$0xff] }
 0xc44   : > { %v6233_v43 = vmul.f32 %v6227_v15, %v11131_v50  ;;  %v6234_v1 = vmul.f32 %v6230_v8, %v11132_v4  ;;  %v11135_v15 = vld [vmem:[#allocation116_spill] sm:$0xff] }
 0xc45   : > { %v10369_v23 = vadd.f32 %v6232_v49, %v5915_v2  ;;  %v6327_v40 = vpop.permute.xlu1 %6326 }
 0xc46   : > { %v10371_v31 = vadd.f32 %v6233_v43, %v5916_v9  ;;  %v10373_v7 = vadd.f32 %v6234_v1, %v5917_v61  ;;  %v6329_v10 = vpop.permute.xlu0 %6328  ;;  %v11136_v43 = vld [vmem:[#allocation117_spill] sm:$0xff]  ;;  %v11137_v1 = vld [vmem:[#allocation118_spill] sm:$0xff] }
 0xc47   : > { %v6336_v63 = vsel %vm673_vm4, %v6327_v40, %v6329_v10 }
 0xc48   : > { %11133 = vst [vmem:[#allocation34_spill] sm:$0xff] %v10373_v7  ;;  %v6338_v49 = vmul.f32 %v6336_v63, %v11134_v26 }
 0xc49   : > { %v6331_v24 = vpop.permute.xlu1 %6330 }
 0xc4a   : > { %v6333_v13 = vpop.permute.xlu0 %6332  ;;  %v6335_v30 = vsel %vm673_vm4, %v6329_v10, %v6331_v24 }
 0xc4b   : > { %v6334_v45 = vsel %vm673_vm4, %v6331_v24, %v6333_v13  ;;  %v6337_v57 = vsel %vm673_vm4, %v6333_v13, %v6327_v40  ;;  %v6339_v8 = vmul.f32 %v6335_v30, %v11135_v15  ;;  %v11138_v24 = vld [vmem:[#allocation119_spill] sm:$0xff]  ;;  %v11139_v13 = vld [vmem:[#allocation120_spill] sm:$0xff] }
 0xc4c   : > { %v6340_v4 = vmul.f32 %v6334_v45, %v11136_v43  ;;  %v6341_v10 = vmul.f32 %v6337_v57, %v11137_v1  ;;  %v11140_v43 = vld [vmem:[#allocation121_spill] sm:$0xff] }
 0xc4d   : > { %v6434_v20 = vpop.permute.xlu1 %6433  ;;  %v6343_v45 = vadd.f32 %v6339_v8, %v10325_v62 }
 0xc4e   : > { %v6436_v37 = vpop.permute.xlu0 %6435  ;;  %v6345_v26 = vadd.f32 %v6341_v10, %v10329_v3  ;;  %v11142_v3 = vld [vmem:[#allocation123_spill] sm:$0xff] }
 0xc4f   : > { %v6443_v25 = vsel %vm803_vm5, %v6434_v20, %v6436_v37 }
 0xc50   : > { %v6445_v12 = vmul.f32 %v6443_v25, %v11138_v24  ;;  %v6344_v25 = vadd.f32 %v6340_v4, %v10327_v21 }
 0xc51   : > { %v6438_v18 = vpop.permute.xlu1 %6437 }
 0xc52   : > { %v6440_v17 = vpop.permute.xlu0 %6439  ;;  %v6442_v50 = vsel %vm803_vm5, %v6436_v37, %v6438_v18  ;;  %v6342_v37 = vadd.f32 %v6338_v49, %v10314_v46  ;;  %v6449_v15 = vadd.f32 %v6445_v12, %v10335_v28 }
 0xc53   : > { %v6446_v7 = vmul.f32 %v6442_v50, %v11139_v13  ;;  %v6441_v63 = vsel %vm803_vm5, %v6438_v18, %v6440_v17  ;;  %v6444_v30 = vsel %vm803_vm5, %v6440_v17, %v6434_v20  ;;  %v11141_v20 = vld [vmem:[#allocation122_spill] sm:$0xff]  ;;  %v11145_v13 = vld [vmem:[#allocation128_spill] sm:$0xff] }
 0xc54   : > { %v6447_v1 = vmul.f32 %v6441_v63, %v11140_v43  ;;  %v6448_v17 = vmul.f32 %v6444_v30, %v11141_v20  ;;  %v11146_v30 = vld [vmem:[#allocation129_spill] sm:$0xff] }
 0xc55   : > { %v6541_v39 = vpop.permute.xlu1 %6540  ;;  %v6450_v21 = vadd.f32 %v6446_v7, %v10347_v42  ;;  %v11144_v42 = vld [vmem:[#allocation127_spill] sm:$0xff] }
 0xc56   : > { %v6543_v34 = vpop.permute.xlu0 %6542  ;;  %v6451_v43 = vadd.f32 %v6447_v1, %v10350_v47  ;;  %v6452_v20 = vadd.f32 %v6448_v17, %v10353_v19 }
 0xc57   : > { %v6550_v57 = vsel %vm934_vm7, %v6541_v39, %v6543_v34 }
 0xc58   : > { %v6552_v8 = vmul.f32 %v6550_v57, %v11142_v3  ;;  %v11148_v3 = vld [vmem:[#allocation126_spill] sm:$0xff] }
 0xc59   : > { %v6545_v56 = vpop.permute.xlu1 %6544 }
 0xc5a   : > { %v6547_v6 = vpop.permute.xlu0 %6546  ;;  %v6549_v50 = vsel %vm934_vm7, %v6543_v34, %v6545_v56  ;;  %v11143_v34 = vld [vmem:[#allocation124_spill] sm:$0xff] }
 0xc5b   : > { %v6553_v4 = vmul.f32 %v6549_v50, %v11143_v34  ;;  %v6548_v10 = vsel %vm934_vm7, %v6545_v56, %v6547_v6  ;;  %v6551_v24 = vsel %vm934_vm7, %v6547_v6, %v6541_v39 }
 0xc5d   : > { %v6648_v59 = vpop.permute.xlu1 %6647 }
 0xc5e   : > { %v6650_v54 = vpop.permute.xlu0 %6649 }
 0xc5f   : > { %v6657_v46 = vsel %vm1065_vm6, %v6648_v59, %v6650_v54 }
 0xc60   : > { %v6659_v7 = vmul.f32 %v6657_v46, %v11144_v42  ;;  %v11147_v46 = vld [vmem:[#allocation125_spill] sm:$0xff] }
 0xc61   : > { %v6652_v2 = vpop.permute.xlu1 %6651 }
 0xc62   : > { %v6654_v14 = vpop.permute.xlu0 %6653  ;;  %v6656_v62 = vsel %vm1065_vm6, %v6650_v54, %v6652_v2 }
 0xc63   : > { %v6655_v12 = vsel %vm1065_vm6, %v6652_v2, %v6654_v14  ;;  %v6658_v28 = vsel %vm1065_vm6, %v6654_v14, %v6648_v59  ;;  %v6660_v63 = vmul.f32 %v6656_v62, %v11145_v13  ;;  %v6554_v62 = vmul.f32 %v6548_v10, %v11147_v46 }
 0xc64   : > { %v6661_v57 = vmul.f32 %v6655_v12, %v11146_v30  ;;  %v6662_v56 = vmul.f32 %v6658_v28, %v10971_v0  ;;  %v6555_v12 = vmul.f32 %v6551_v24, %v11148_v3  ;;  %v6663_v28 = vadd.f32 %v6659_v7, %v6342_v37 }
 0xc65   : > { %v6755_v53 = vpop.permute.xlu1 %6754  ;;  %v6664_v1 = vadd.f32 %v6660_v63, %v6343_v45 }
 0xc66   : > { %v6757_v9 = vpop.permute.xlu0 %6756  ;;  %v6666_v17 = vadd.f32 %v6662_v56, %v6345_v26 }
 0xc67   : > { %v6764_v54 = vsel %vm1196_vm8, %v6755_v53, %v6757_v9 }
 0xc69   : > { %v6759_v16 = vpop.permute.xlu1 %6758 }
 0xc6a   : > { %v6761_v61 = vpop.permute.xlu0 %6760  ;;  %v6763_v2 = vsel %vm1196_vm8, %v6757_v9, %v6759_v16  ;;  %v6556_v9 = vadd.f32 %v6552_v8, %v10358_v22  ;;  %v6665_v22 = vadd.f32 %v6661_v57, %v6344_v25 }
 0xc6b   : > { %v6762_v59 = vsel %vm1196_vm8, %v6759_v16, %v6761_v61  ;;  %v6765_v39 = vsel %vm1196_vm8, %v6761_v61, %v6755_v53  ;;  %v6766_v16 = vmul.f32 %v6764_v54, %v10972_v58  ;;  %v6767_v0 = vmul.f32 %v6763_v2, %v10973_v11  ;;  %v11149_v2 = vld [vmem:[#allocation14_spill] sm:$0xff] }
 0xc6c   : > { %v6768_v53 = vmul.f32 %v6762_v59, %v10974_v55  ;;  %v6557_v61 = vadd.f32 %v6553_v4, %v10369_v23  ;;  %v6769_v34 = vmul.f32 %v6765_v39, %v10975_v35 }
 0xc6d   : > { %v10379_v27 = vpop.permute.xlu1 %6861  ;;  %v6770_v10 = vadd.f32 %v6766_v16, %v6449_v15  ;;  %v6771_v23 = vadd.f32 %v6767_v0, %v6450_v21  ;;  %v11151_v16 = vld [vmem:[#allocation132_spill] sm:$0xff] }
 0xc6e   : > { %v10387_v5 = vpop.permute.xlu0 %6863  ;;  %v6773_v25 = vadd.f32 %v6769_v34, %v6452_v20  ;;  %v11153_v34 = vld [vmem:[#allocation34_spill] sm:$0xff] }
 0xc6f   : > { %v6871_v37 = vsel %vm1327_vm9, %v10379_v27, %v10387_v5 }
 0xc71   : > { %v10396_v33 = vpop.permute.xlu1 %6865 }
 0xc72   : > { %v10398_v40 = vpop.permute.xlu0 %6867  ;;  %v6870_v26 = vsel %vm1327_vm9, %v10387_v5, %v10396_v33 }
 0xc75   : > { %v6969_v18 = vpop.permute.xlu1 %6968 }
 0xc76   : > { %v6971_v49 = vpop.permute.xlu0 %6970 }
 0xc77   : > { %v6978_v6 = vsel %vm1458_vm10, %v6969_v18, %v6971_v49 }
 0xc78   : > { %v6980_v47 = vmul.f32 %v6978_v6, %v10983_v29  ;;  %v6772_v29 = vadd.f32 %v6768_v53, %v6451_v43  ;;  %v11150_v43 = vld [vmem:[#allocation131_spill] sm:$0xff]  ;;  %v6558_v53 = vadd.f32 %v6554_v62, %v10371_v31 }
 0xc79   : > { %v6973_v14 = vpop.permute.xlu1 %6972  ;;  %v11155_v62 = vld [vmem:[#allocation27_spill] sm:$0xff] }
 0xc7a   : > { %v6975_v50 = vpop.permute.xlu0 %6974  ;;  %v6977_v58 = vsel %vm1458_vm10, %v6971_v49, %v6973_v14  ;;  %v6984_v15 = vadd.f32 %v6980_v47, %v6663_v28  ;;  %v6559_v47 = vadd.f32 %v6555_v12, %v11153_v34  ;;  %v11156_v12 = vld [vmem:[#allocation28_spill] sm:$0xff] }
 0xc7b   : > { %v6976_v11 = vsel %vm1458_vm10, %v6973_v14, %v6975_v50  ;;  %v6979_v55 = vsel %vm1458_vm10, %v6975_v50, %v6969_v18  ;;  %v6981_v18 = vmul.f32 %v6977_v58, %v10984_v60  ;;  %v11154_v58 = vld [vmem:[#allocation135_spill] sm:$0xff] }
 0xc7c   : > { %v6982_v21 = vmul.f32 %v6976_v11, %v10985_v52  ;;  %v6983_v4 = vmul.f32 %v6979_v55, %v10989_v41  ;;  %v6869_v52 = vsel %vm1327_vm9, %v10396_v33, %v10398_v40 }
 0xc7d   : > { %v7076_v19 = vpop.permute.xlu1 %7075  ;;  %v6985_v59 = vadd.f32 %v6981_v18, %v6664_v1 }
 0xc7e   : > { %v7078_v8 = vpop.permute.xlu0 %7077  ;;  %v6986_v57 = vadd.f32 %v6982_v21, %v6665_v22  ;;  %v6987_v56 = vadd.f32 %v6983_v4, %v6666_v17  ;;  %v7722_v4 = vld [vmem:[%s7815_s29] sm:$0xff] }
 0xc7f   : > { %v7085_v35 = vsel %vm1589_vm11, %v7076_v19, %v7078_v8 }
 0xc80   : > { %v7087_v45 = vmul.f32 %v7085_v35, %v10979_v36  ;;  %v6873_v36 = vmul.f32 %v6871_v37, %v10976_v32  ;;  %v6874_v32 = vmul.f32 %v6870_v26, %v11149_v2 }
 0xc81   : > { %v7080_v49 = vpop.permute.xlu1 %7079 }
 0xc82   : > { %v7091_v24 = vadd.f32 %v7087_v45, %v6770_v10  ;;  %v7084_v54 = vsel %vm1589_vm11, %v7078_v8, %v7080_v49  ;;  %v7082_v42 = vpop.permute.xlu0 %7081  ;;  %v6877_v50 = vadd.f32 %v6873_v36, %v6556_v9  ;;  %v7723_v36 = vld [vmem:[%s7815_s29 + $0x8] sm:$0xff] }
 0xc83   : > { %v7088_v7 = vmul.f32 %v7084_v54, %v10981_v44  ;;  %v7083_v5 = vsel %vm1589_vm11, %v7080_v49, %v7082_v42  ;;  %v7086_v60 = vsel %vm1589_vm11, %v7082_v42, %v7076_v19  ;;  %v6872_v44 = vsel %vm1327_vm9, %v10398_v40, %v10379_v27  ;;  %v11152_v27 = vld [vmem:[#allocation26_spill] sm:$0xff] }
 0xc84   : > { %v7202_v41 = vadd.f32 %v7091_v24, %v6984_v15  ;;  %v7089_v13 = vmul.f32 %v7083_v5, %v10982_v38  ;;  %v7090_v63 = vmul.f32 %v7086_v60, %v10986_v48  ;;  %v6875_v38 = vmul.f32 %v6869_v52, %v11150_v43  ;;  %v11157_v54 = vld [vmem:[#allocation2_spill] sm:$0xff]  ;;  %v11158_v5 = vld [vmem:[#allocation3_spill] sm:$0xff] }
 0xc85   : > { %v7092_v14 = vadd.f32 %v7088_v7, %v6771_v23  ;;  %v7183_v30 = vpop.permute.xlu1 %7182  ;;  %v6876_v46 = vmul.f32 %v6872_v44, %v11151_v16  ;;  %v6878_v19 = vadd.f32 %v6874_v32, %v6557_v61 }
 0xc86   : > { %v7093_v39 = vadd.f32 %v7089_v13, %v6772_v29  ;;  %v7094_v6 = vadd.f32 %v7090_v63, %v6773_v25  ;;  %v7185_v33 = vpop.permute.xlu0 %7184  ;;  %v6879_v17 = vadd.f32 %v6875_v38, %v6558_v53 }
 0xc87   : > { %v7203_v20 = vadd.f32 %v7092_v14, %v6985_v59  ;;  %v7192_v48 = vsel %vm1720_vm12, %v7183_v30, %v7185_v33  ;;  %v6880_v31 = vadd.f32 %v6876_v46, %v6559_v47 }
 0xc88   : > { %v7204_v3 = vadd.f32 %v7093_v39, %v6986_v57  ;;  %v7205_v0 = vadd.f32 %v7094_v6, %v6987_v56  ;;  %v7194_v40 = vmul.f32 %v7192_v48, %v11152_v27 }
 0xc89   : > { %v7187_v28 = vpop.permute.xlu1 %7186 }
 0xc8a   : > { %v7198_v1 = vadd.f32 %v7194_v40, %v6877_v50  ;;  %v7191_v9 = vsel %vm1720_vm12, %v7185_v33, %v7187_v28  ;;  %v7189_v22 = vpop.permute.xlu0 %7188 }
 0xc8b   : > { %v7195_v8 = vmul.f32 %v7191_v9, %v11154_v58  ;;  %v7190_v10 = vsel %vm1720_vm12, %v7187_v28, %v7189_v22  ;;  %v7193_v11 = vsel %vm1720_vm12, %v7189_v22, %v7183_v30 }
 0xc8c   : > { %v7196_v55 = vmul.f32 %v7190_v10, %v11155_v62  ;;  %v7197_v61 = vmul.f32 %v7193_v11, %v11156_v12  ;;  %v7206_v35 = vadd.f32 %v7202_v41, %v7198_v1 }
 0xc8d   : > { %v7199_v23 = vadd.f32 %v7195_v8, %v6878_v19 }
 0xc8e   : > { %v7200_v29 = vadd.f32 %v7196_v55, %v6879_v17  ;;  %v7201_v37 = vadd.f32 %v7197_v61, %v6880_v31 }
 0xc8f   : > { %v7207_v45 = vadd.f32 %v7203_v20, %v7199_v23 }
 0xc90   : > { %v7208_v25 = vadd.f32 %v7204_v3, %v7200_v29  ;;  %v7209_v26 = vadd.f32 %v7205_v0, %v7201_v37 }
 0xc9a   : > { %v7212_v15 = vpop.permute.xlu1 %7211 }
 0xc9b   : > { %v7214_v18 = vadd.f32 %v7212_v15, %v7206_v35  ;;  %v7215_v49 = vadd.f32 %v7212_v15, %v7207_v45  ;;  %v7216_v51 = vadd.f32 %v7212_v15, %v7208_v25  ;;  %v7217_v21 = vadd.f32 %v7212_v15, %v7209_v26 }
 0xc9d   : > { %v7218_v24 = vadd.f32 %v7722_v4, %v7214_v18  ;;  %v7219_v42 = vadd.f32 %v7215_v49, %v11157_v54  ;;  %v7220_v7 = vadd.f32 %v7723_v36, %v7216_v51  ;;  %v7221_v60 = vadd.f32 %v7217_v21, %v11158_v5 }
 0xc9f   : > { %v7226_v52 = vcombine.low %v7218_v24, %v7219_v42  ;;  %v7227_v41 = vcombine.low %v7220_v7, %v7221_v60 }
 0xca1   : > { %7230 = vst [vmem:[%s295_s13] sm:$0xff] %v7226_v52  ;;  %7231 = vst [vmem:[%s295_s13 + $0x8] sm:$0xff] %v7227_v41 }
 0xca2 PF: > { %s17_s24 = sadd.s32 1, %s7730_s24  }
 0xca3   : > { %p14_p4 = scmp.ge.s32.totalorder %s17_s24, 4  }
 0xca5   :  { %16 = sbr.rel (!%p14_p4) target bundleno = 1 (0x1), region = 158 }

</bundles_post_ra>
